<compile_context>
chip_gen: v6e
topology: v6e:2x2x1
jax: 0.10.0
libtpu: 0.0.40
codegen_flags: <defaults>
</compile_context>

<pallas_src>
import functools

import jax
import jax.numpy as jnp
import numpy as np
from jax.experimental import pallas as pl
from jax.experimental.pallas import tpu as pltpu


def _transformer_block_kernel(heads, block_b, seq_len, dim, fused_heads,
                              x_ref,
                              ln1_g_ref, ln1_b_ref,
                              wqkv_ref, bqkv_ref,
                              wo_ref, bo_ref,
                              ln2_g_ref, ln2_b_ref,
                              w1_ref, b1_ref, w2_ref, b2_ref,
                              o_ref):
    Bt, S, D, H = block_b, seq_len, dim, heads
    hd = D // H
    R = Bt * S
    eps = 1e-5
    w_dtype = wqkv_ref.dtype                       # bf16 weights -> bf16 MXU ops

    # (Bt, S, D) -> (Bt*S, D): merging leading dims is layout-free (no copies).
    x = x_ref[...].reshape(R, D).astype(jnp.float32)

    def layer_norm(v, g, b):
        # One-pass statistics: var = E[x^2] - E[x]^2 (no dependent second
        # centered reduction).  LN math stays in f32.
        mu = jnp.mean(v, axis=-1, keepdims=True)
        mu2 = jnp.mean(v * v, axis=-1, keepdims=True)
        var = jnp.maximum(mu2 - mu * mu, 0.0)
        return (v - mu) * jax.lax.rsqrt(var + eps) * g + b

    # ---------------- self-attention branch ----------------
    xn = layer_norm(x, ln1_g_ref[...], ln1_b_ref[...])               # (R, D) f32
    qkv = jnp.dot(xn.astype(w_dtype), wqkv_ref[...],
                  preferred_element_type=jnp.float32) + bqkv_ref[...]  # (R, 3D) f32

    scale = 1.0 / float(hd) ** 0.5
    q = qkv[:, :D] * scale            # fold 1/sqrt(hd) into q (cheapest place)
    k = qkv[:, D:2 * D]
    v = qkv[:, 2 * D:]

    if fused_heads:
        # Single reshape+transpose head split; ONE batched einsum over Bt*H.
        def split(t):                                   # (R, D) -> (Bt*H, S, hd)
            t = t.astype(w_dtype).reshape(Bt, S, H, hd)
            return jnp.transpose(t, (0, 2, 1, 3)).reshape(Bt * H, S, hd)

        qh, kh, vh = split(q), split(k), split(v)
        s = jnp.einsum('nqd,nkd->nqk', qh, kh,
                       preferred_element_type=jnp.float32)           # (Bt*H, S, S)
        s = s - jnp.max(s, axis=-1, keepdims=True)
        e = jnp.exp(s)
        p = e * pl.reciprocal(jnp.sum(e, axis=-1, keepdims=True), approx=True)
        ctx = jnp.einsum('nqk,nkd->nqd', p.astype(w_dtype), vh,
                         preferred_element_type=jnp.float32)         # (Bt*H, S, hd)
        # Merge heads back with one transpose + leading-dim reshape.
        ctx = jnp.transpose(ctx.astype(w_dtype).reshape(Bt, H, S, hd),
                            (0, 2, 1, 3)).reshape(R, D)
    else:
        # Fallback: per-head lane slices, still one Bt-batched einsum per head
        # (no per-batch Python loops, single final concat).
        q3 = q.astype(w_dtype).reshape(Bt, S, D)
        k3 = k.astype(w_dtype).reshape(Bt, S, D)
        v3 = v.astype(w_dtype).reshape(Bt, S, D)
        outs = []
        for h in range(H):
            sl = slice(h * hd, (h + 1) * hd)
            s = jnp.einsum('bqd,bkd->bqk', q3[..., sl], k3[..., sl],
                           preferred_element_type=jnp.float32)       # (Bt, S, S)
            s = s - jnp.max(s, axis=-1, keepdims=True)
            e = jnp.exp(s)
            p = e * pl.reciprocal(jnp.sum(e, axis=-1, keepdims=True), approx=True)
            outs.append(jnp.einsum('bqk,bkd->bqd', p.astype(w_dtype), v3[..., sl],
                                   preferred_element_type=jnp.float32))
        ctx = jnp.concatenate(outs, axis=-1).reshape(R, D)

    attn_out = jnp.dot(ctx.astype(w_dtype), wo_ref[...],
                       preferred_element_type=jnp.float32) + bo_ref[...]
    x = x + attn_out                                                 # residual 1

    # ---------------- feed-forward branch ----------------
    xn2 = layer_norm(x, ln2_g_ref[...], ln2_b_ref[...])
    h1 = jnp.dot(xn2.astype(w_dtype), w1_ref[...],
                 preferred_element_type=jnp.float32) + b1_ref[...]
    # Exact (erf-based) GELU == torch.nn.GELU() default.  (tanh approximation
    # would map to the EUP on v6e/v7x but changes numerics slightly.)
    h1 = 0.5 * h1 * (1.0 + jax.lax.erf(h1 * 0.7071067811865476))
    h2 = jnp.dot(h1.astype(w_dtype), w2_ref[...],
                 preferred_element_type=jnp.float32) + b2_ref[...]
    x = x + h2                                                       # residual 2

    # Single lane-dense store for the whole tile.
    o_ref[...] = x.reshape(Bt, S, D).astype(o_ref.dtype)


def _vmem_budget_bytes():
    """Physical VMEM of the local TPU generation (best effort)."""
    cap = None
    try:
        info = pltpu.get_tpu_info()
        cap = getattr(info, "vmem_capacity_bytes", None)
    except Exception:
        cap = None
    if not cap:
        kind = ""
        try:
            kind = jax.devices()[0].device_kind.lower()
        except Exception:
            pass
        if "v7" in kind:
            cap = 64 * 1024 * 1024
        elif ("v4" in kind) or ("v5" in kind) or ("v6" in kind):
            cap = 128 * 1024 * 1024
        else:
            cap = 64 * 1024 * 1024          # unknown generation: stay conservative
    return int(cap)


def _pick_block_b(B, S, target_rows, min_grid):
    """Largest divisor of B with block_b*S <= target_rows and grid >= min_grid."""
    target = max(1, target_rows // S)
    best = 1
    for d in range(1, B + 1):
        if B % d != 0 or d > target:
            continue
        if min_grid > 1 and (B // d) < min_grid:
            continue
        best = d
    return best


def _replicated_spec(arr, single_buffer):
    nd = arr.ndim
    idx = lambda i, _nd=nd: (0,) * _nd
    if single_buffer:
        # Constant index_map -> double buffering buys nothing; halve weight VMEM.
        return pl.BlockSpec(arr.shape, idx, pipeline_mode=pl.Buffered(buffer_count=1))
    return pl.BlockSpec(arr.shape, idx)


def transformer_block(x, params, heads=4, block_b=None):
    B, S, D = x.shape

    vmem_cap = _vmem_budget_bytes()
    small_vmem = vmem_cap <= 64 * 1024 * 1024          # v7x-class chip
    vmem_limit = int(vmem_cap * 0.85)                  # headroom under physical budget
    target_rows = 256 if small_vmem else 512           # amortize per-step overhead
    min_grid = 2 if (small_vmem and B >= 2) else 1     # keep both v7x TCs busy

    if block_b is None:
        block_b = _pick_block_b(B, S, target_rows, min_grid)
    grid = (B // block_b,)

    in_arrays = [
        x,
        params["ln1_g"], params["ln1_b"],
        params["wqkv"], params["bqkv"],
        params["wo"], params["bo"],
        params["ln2_g"], params["ln2_b"],
        params["w1"], params["b1"], params["w2"], params["b2"],
    ]

    def build(fused_heads, single_buffer):
        kernel = functools.partial(_transformer_block_kernel,
                                   heads, block_b, S, D, fused_heads)
        in_specs = [pl.BlockSpec((block_b, S, D), lambda i: (i, 0, 0))] + \
                   [_replicated_spec(a, single_buffer) for a in in_arrays[1:]]
        return pl.pallas_call(
            kernel,
            out_shape=jax.ShapeDtypeStruct((B, S, D), x.dtype),
            grid_spec=pltpu.PrefetchScalarGridSpec(
                num_scalar_prefetch=0,
                grid=grid,
                in_specs=in_specs,
                out_specs=pl.BlockSpec((block_b, S, D), lambda i: (i, 0, 0)),
            ),
            compiler_params=pltpu.CompilerParams(
                dimension_semantics=("parallel",),
                vmem_limit_bytes=vmem_limit),
        )

    # Prefer the fused head-transpose path + single-buffered weights; degrade
    # gracefully if either feature is unsupported by the local jax/Mosaic build.
    last_err = None
    for fused_heads, single_buffer in ((True, True), (True, False),
                                       (False, True), (False, False)):
        try:
            out = build(fused_heads, single_buffer)(*in_arrays)
            return jax.block_until_ready(out)
        except Exception as e:          # lowering / pipeline-mode not supported
            last_err = e
    raise last_err


def init_params(key, dim, heads, ff_hidden_dim, w_dtype=jnp.bfloat16):
    ks = jax.random.split(key, 12)
    scale = 0.02

    def lin(kw, kb, din, dout):
        # weight stored as (in, out) = torch W.T, in bf16 for the MXU
        w = (scale * jax.random.normal(kw, (din, dout), jnp.float32)).astype(w_dtype)
        b = scale * jax.random.normal(kb, (1, dout), jnp.float32)
        return w, b

    wq, bq = lin(ks[0], ks[1], dim, dim)
    wk, bk = lin(ks[2], ks[3], dim, dim)
    wv, bv = lin(ks[4], ks[5], dim, dim)
    wo, bo = lin(ks[6], ks[7], dim, dim)
    w1, b1 = lin(ks[8], ks[9], dim, ff_hidden_dim)
    w2, b2 = lin(ks[10], ks[11], ff_hidden_dim, dim)
    # fused QKV: one (D, 3D) weight / (1, 3D) bias -> one MXU pass
    wqkv = jnp.concatenate([wq, wk, wv], axis=1)
    bqkv = jnp.concatenate([bq, bk, bv], axis=1)
    return dict(
        ln1_g=jnp.ones((1, dim), jnp.float32), ln1_b=jnp.zeros((1, dim), jnp.float32),
        wqkv=wqkv, bqkv=bqkv, wo=wo, bo=bo,
        ln2_g=jnp.ones((1, dim), jnp.float32), ln2_b=jnp.zeros((1, dim), jnp.float32),
        w1=w1, b1=b1, w2=w2, b2=b2,
    )


def reference_transformer_block(x, p, heads):
    """Pure-JAX f32 reference mirroring the PyTorch forward (dropout=identity)."""
    B, S, D = x.shape
    hd = D // heads
    f32 = lambda a: a.astype(jnp.float32)

    def ln(v, g, b):
        mu = jnp.mean(v, -1, keepdims=True)
        var = jnp.mean((v - mu) ** 2, -1, keepdims=True)
        return (v - mu) / jnp.sqrt(var + 1e-5) * g + b

    xn = ln(x, p["ln1_g"][0], p["ln1_b"][0])
    qkv = xn @ f32(p["wqkv"]) + p["bqkv"][0]
    q, k, v = qkv[..., :D], qkv[..., D:2 * D], qkv[..., 2 * D:]
    q = q.reshape(B, S, heads, hd).transpose(0, 2, 1, 3)
    k = k.reshape(B, S, heads, hd).transpose(0, 2, 1, 3)
    v = v.reshape(B, S, heads, hd).transpose(0, 2, 1, 3)
    scores = jnp.einsum("bhqd,bhkd->bhqk", q, k) / hd ** 0.5
    attn = jax.nn.softmax(scores, axis=-1)
    out = jnp.einsum("bhqk,bhkd->bhqd", attn, v)
    out = out.transpose(0, 2, 1, 3).reshape(B, S, D)
    out = out @ f32(p["wo"]) + p["bo"][0]
    x = x + out
    xn2 = ln(x, p["ln2_g"][0], p["ln2_b"][0])
    h1 = xn2 @ f32(p["w1"]) + p["b1"][0]
    h1 = 0.5 * h1 * (1.0 + jax.lax.erf(h1 / jnp.sqrt(2.0)))
    x = x + (h1 @ f32(p["w2"]) + p["b2"][0])
    return x


if __name__ == "__main__":
    B, S, D = 2, 8, 32
    heads = 4
    ff_hidden = 4 * D

    key = jax.random.PRNGKey(0)
    kx, kp = jax.random.split(key)
    x = jax.random.normal(kx, (B, S, D), jnp.float32)
    params = init_params(kp, D, heads, ff_hidden)

    out = transformer_block(x, params, heads=heads)
    out = jax.block_until_ready(out)

    ref = reference_transformer_block(x, params, heads)
    # bf16 matmul operands + approx reciprocal -> loosen tolerance vs f32 ref.
    np.testing.assert_allclose(np.asarray(out), np.asarray(ref),
                               rtol=2e-2, atol=2e-2)
    print("KERNEL_OK")
</pallas_src>

<mosaic_0001>
module attributes {stable_mosaic.version = 11 : i64} {
  func.func @_transformer_block_kernel(%arg0: i32, %arg1: memref<1x8x32xf32, #tpu.memory_space<vmem>>, %arg2: memref<1x32xf32, #tpu.memory_space<vmem>>, %arg3: memref<1x32xf32, #tpu.memory_space<vmem>>, %arg4: memref<32x96xbf16, #tpu.memory_space<vmem>>, %arg5: memref<1x96xf32, #tpu.memory_space<vmem>>, %arg6: memref<32x32xbf16, #tpu.memory_space<vmem>>, %arg7: memref<1x32xf32, #tpu.memory_space<vmem>>, %arg8: memref<1x32xf32, #tpu.memory_space<vmem>>, %arg9: memref<1x32xf32, #tpu.memory_space<vmem>>, %arg10: memref<32x128xbf16, #tpu.memory_space<vmem>>, %arg11: memref<1x128xf32, #tpu.memory_space<vmem>>, %arg12: memref<128x32xbf16, #tpu.memory_space<vmem>>, %arg13: memref<1x32xf32, #tpu.memory_space<vmem>>, %arg14: memref<1x8x32xf32, #tpu.memory_space<vmem>>) attributes {dimension_semantics = [#tpu.dimension_semantics<parallel>], iteration_bounds = array<i64: 2>, scalar_prefetch = 0 : i64, scratch_operands = 0 : i64, tpu.core_type = #tpu.core_type<tc>, window_params = [{transform_indices = @transform_0, window_bounds = array<i64: 1, 8, 32>}, {pipeline_mode = #tpu.pipeline_mode<synchronous>, transform_indices = @transform_1, window_bounds = array<i64: 1, 32>}, {pipeline_mode = #tpu.pipeline_mode<synchronous>, transform_indices = @transform_2, window_bounds = array<i64: 1, 32>}, {pipeline_mode = #tpu.pipeline_mode<synchronous>, transform_indices = @transform_3, window_bounds = array<i64: 32, 96>}, {pipeline_mode = #tpu.pipeline_mode<synchronous>, transform_indices = @transform_4, window_bounds = array<i64: 1, 96>}, {pipeline_mode = #tpu.pipeline_mode<synchronous>, transform_indices = @transform_5, window_bounds = array<i64: 32, 32>}, {pipeline_mode = #tpu.pipeline_mode<synchronous>, transform_indices = @transform_6, window_bounds = array<i64: 1, 32>}, {pipeline_mode = #tpu.pipeline_mode<synchronous>, transform_indices = @transform_7, window_bounds = array<i64: 1, 32>}, {pipeline_mode = #tpu.pipeline_mode<synchronous>, transform_indices = @transform_8, window_bounds = array<i64: 1, 32>}, {pipeline_mode = #tpu.pipeline_mode<synchronous>, transform_indices = @transform_9, window_bounds = array<i64: 32, 128>}, {pipeline_mode = #tpu.pipeline_mode<synchronous>, transform_indices = @transform_10, window_bounds = array<i64: 1, 128>}, {pipeline_mode = #tpu.pipeline_mode<synchronous>, transform_indices = @transform_11, window_bounds = array<i64: 128, 32>}, {pipeline_mode = #tpu.pipeline_mode<synchronous>, transform_indices = @transform_12, window_bounds = array<i64: 1, 32>}, {transform_indices = @transform_13, window_bounds = array<i64: 1, 8, 32>}]} {
    %c0 = arith.constant 0 : index
    %c0_0 = arith.constant 0 : index
    %c0_1 = arith.constant 0 : index
    %0 = vector.load %arg1[%c0, %c0_0, %c0_1] : memref<1x8x32xf32, #tpu.memory_space<vmem>>, vector<1x8x32xf32>
    %1 = vector.shape_cast %0 : vector<1x8x32xf32> to vector<8x32xf32>
    %c0_2 = arith.constant 0 : index
    %c0_3 = arith.constant 0 : index
    %2 = vector.load %arg2[%c0_2, %c0_3] : memref<1x32xf32, #tpu.memory_space<vmem>>, vector<1x32xf32>
    %c0_4 = arith.constant 0 : index
    %c0_5 = arith.constant 0 : index
    %3 = vector.load %arg3[%c0_4, %c0_5] : memref<1x32xf32, #tpu.memory_space<vmem>>, vector<1x32xf32>
    %cst = arith.constant dense<0.000000e+00> : vector<8xf32>
    %4 = vector.multi_reduction <add>, %1, %cst [1] : vector<8x32xf32> to vector<8xf32>
    %5 = vector.shape_cast %4 : vector<8xf32> to vector<8x1xf32>
    %cst_6 = arith.constant 3.200000e+01 : f32
    %6 = vector.broadcast %cst_6 : f32 to vector<8x1xf32>
    %7 = arith.divf %5, %6 : vector<8x1xf32>
    %8 = arith.mulf %1, %1 : vector<8x32xf32>
    %cst_7 = arith.constant dense<0.000000e+00> : vector<8xf32>
    %9 = vector.multi_reduction <add>, %8, %cst_7 [1] : vector<8x32xf32> to vector<8xf32>
    %10 = vector.shape_cast %9 : vector<8xf32> to vector<8x1xf32>
    %cst_8 = arith.constant 3.200000e+01 : f32
    %11 = vector.broadcast %cst_8 : f32 to vector<8x1xf32>
    %12 = arith.divf %10, %11 : vector<8x1xf32>
    %13 = arith.mulf %7, %7 : vector<8x1xf32>
    %14 = arith.subf %12, %13 : vector<8x1xf32>
    %cst_9 = arith.constant 0.000000e+00 : f32
    %15 = vector.broadcast %cst_9 : f32 to vector<8x1xf32>
    %16 = arith.maximumf %14, %15 : vector<8x1xf32>
    %17 = vector.broadcast %7 : vector<8x1xf32> to vector<8x32xf32>
    %18 = arith.subf %1, %17 : vector<8x32xf32>
    %cst_10 = arith.constant 9.99999974E-6 : f32
    %19 = vector.broadcast %cst_10 : f32 to vector<8x1xf32>
    %20 = arith.addf %16, %19 : vector<8x1xf32>
    %21 = math.rsqrt %20 : vector<8x1xf32>
    %22 = vector.broadcast %21 : vector<8x1xf32> to vector<8x32xf32>
    %23 = arith.mulf %18, %22 : vector<8x32xf32>
    %24 = vector.broadcast %2 : vector<1x32xf32> to vector<8x32xf32>
    %25 = arith.mulf %23, %24 : vector<8x32xf32>
    %26 = vector.broadcast %3 : vector<1x32xf32> to vector<8x32xf32>
    %27 = arith.addf %25, %26 : vector<8x32xf32>
    %28 = arith.truncf %27 : vector<8x32xf32> to vector<8x32xbf16>
    %c0_11 = arith.constant 0 : index
    %c0_12 = arith.constant 0 : index
    %29 = vector.load %arg4[%c0_11, %c0_12] : memref<32x96xbf16, #tpu.memory_space<vmem>>, vector<32x96xbf16>
    %cst_13 = arith.constant dense<0.000000e+00> : vector<8x96xf32>
    %30 = tpu.matmul %28, %29, %cst_13 {dimension_numbers = #tpu.dot_dimension_numbers<[1], [0], [0], [1], [0, 0, 1, 1], [], []>} : vector<8x32xbf16>, vector<32x96xbf16>, vector<8x96xf32> -> vector<8x96xf32>
    %c0_14 = arith.constant 0 : index
    %c0_15 = arith.constant 0 : index
    %31 = vector.load %arg5[%c0_14, %c0_15] : memref<1x96xf32, #tpu.memory_space<vmem>>, vector<1x96xf32>
    %32 = vector.broadcast %31 : vector<1x96xf32> to vector<8x96xf32>
    %33 = arith.addf %30, %32 : vector<8x96xf32>
    %34 = vector.extract_strided_slice %33 {offsets = [0, 0], sizes = [8, 32], strides = [1, 1]} : vector<8x96xf32> to vector<8x32xf32>
    %cst_16 = arith.constant 0.353553385 : f32
    %35 = vector.broadcast %cst_16 : f32 to vector<8x32xf32>
    %36 = arith.mulf %34, %35 : vector<8x32xf32>
    %37 = vector.extract_strided_slice %33 {offsets = [0, 32], sizes = [8, 32], strides = [1, 1]} : vector<8x96xf32> to vector<8x32xf32>
    %38 = vector.extract_strided_slice %33 {offsets = [0, 64], sizes = [8, 32], strides = [1, 1]} : vector<8x96xf32> to vector<8x32xf32>
    %39 = arith.truncf %36 : vector<8x32xf32> to vector<8x32xbf16>
    %40 = vector.shape_cast %39 : vector<8x32xbf16> to vector<1x8x4x8xbf16>
    %41 = tpu.transpose %40, [0, 2, 1, 3] : vector<1x8x4x8xbf16> -> vector<1x4x8x8xbf16>
    %42 = vector.shape_cast %41 : vector<1x4x8x8xbf16> to vector<4x8x8xbf16>
    %43 = arith.truncf %37 : vector<8x32xf32> to vector<8x32xbf16>
    %44 = vector.shape_cast %43 : vector<8x32xbf16> to vector<1x8x4x8xbf16>
    %45 = tpu.transpose %44, [0, 2, 1, 3] : vector<1x8x4x8xbf16> -> vector<1x4x8x8xbf16>
    %46 = vector.shape_cast %45 : vector<1x4x8x8xbf16> to vector<4x8x8xbf16>
    %47 = arith.truncf %38 : vector<8x32xf32> to vector<8x32xbf16>
    %48 = vector.shape_cast %47 : vector<8x32xbf16> to vector<1x8x4x8xbf16>
    %49 = tpu.transpose %48, [0, 2, 1, 3] : vector<1x8x4x8xbf16> -> vector<1x4x8x8xbf16>
    %50 = vector.shape_cast %49 : vector<1x4x8x8xbf16> to vector<4x8x8xbf16>
    "tpu.trace_start"() <{level = 10 : i32, message = "nqd,nkd->nqk"}> : () -> ()
    %cst_17 = arith.constant dense<0.000000e+00> : vector<4x8x8xf32>
    %51 = tpu.matmul %42, %46, %cst_17 {dimension_numbers = #tpu.dot_dimension_numbers<[2], [2], [1], [1], [0, 0, 0, 1, 1, 1], [0], [0]>} : vector<4x8x8xbf16>, vector<4x8x8xbf16>, vector<4x8x8xf32> -> vector<4x8x8xf32>
    "tpu.trace_stop"() : () -> ()
    %cst_18 = arith.constant dense<0xFF800000> : vector<4x8xf32>
    %52 = vector.multi_reduction <maximumf>, %51, %cst_18 [2] : vector<4x8x8xf32> to vector<4x8xf32>
    %53 = vector.shape_cast %52 : vector<4x8xf32> to vector<4x8x1xf32>
    %54 = vector.broadcast %53 : vector<4x8x1xf32> to vector<4x8x8xf32>
    %55 = arith.subf %51, %54 : vector<4x8x8xf32>
    %56 = math.exp %55 : vector<4x8x8xf32>
    %cst_19 = arith.constant dense<0.000000e+00> : vector<4x8xf32>
    %57 = vector.multi_reduction <add>, %56, %cst_19 [2] : vector<4x8x8xf32> to vector<4x8xf32>
    %58 = vector.shape_cast %57 : vector<4x8xf32> to vector<4x8x1xf32>
    %59 = tpu.reciprocal %58 {approx = true} : vector<4x8x1xf32> -> vector<4x8x1xf32>
    %60 = vector.broadcast %59 : vector<4x8x1xf32> to vector<4x8x8xf32>
    %61 = arith.mulf %56, %60 : vector<4x8x8xf32>
    %62 = arith.truncf %61 : vector<4x8x8xf32> to vector<4x8x8xbf16>
    "tpu.trace_start"() <{level = 10 : i32, message = "nqk,nkd->nqd"}> : () -> ()
    %cst_20 = arith.constant dense<0.000000e+00> : vector<4x8x8xf32>
    %63 = tpu.matmul %62, %50, %cst_20 {dimension_numbers = #tpu.dot_dimension_numbers<[2], [1], [1], [2], [0, 0, 0, 1, 1, 2], [0], [0]>} : vector<4x8x8xbf16>, vector<4x8x8xbf16>, vector<4x8x8xf32> -> vector<4x8x8xf32>
    "tpu.trace_stop"() : () -> ()
    %64 = arith.truncf %63 : vector<4x8x8xf32> to vector<4x8x8xbf16>
    %65 = vector.shape_cast %64 : vector<4x8x8xbf16> to vector<1x4x8x8xbf16>
    %66 = tpu.transpose %65, [0, 2, 1, 3] : vector<1x4x8x8xbf16> -> vector<1x8x4x8xbf16>
    %67 = vector.shape_cast %66 : vector<1x8x4x8xbf16> to vector<8x32xbf16>
    %c0_21 = arith.constant 0 : index
    %c0_22 = arith.constant 0 : index
    %68 = vector.load %arg6[%c0_21, %c0_22] : memref<32x32xbf16, #tpu.memory_space<vmem>>, vector<32x32xbf16>
    %cst_23 = arith.constant dense<0.000000e+00> : vector<8x32xf32>
    %69 = tpu.matmul %67, %68, %cst_23 {dimension_numbers = #tpu.dot_dimension_numbers<[1], [0], [0], [1], [0, 0, 1, 1], [], []>} : vector<8x32xbf16>, vector<32x32xbf16>, vector<8x32xf32> -> vector<8x32xf32>
    %c0_24 = arith.constant 0 : index
    %c0_25 = arith.constant 0 : index
    %70 = vector.load %arg7[%c0_24, %c0_25] : memref<1x32xf32, #tpu.memory_space<vmem>>, vector<1x32xf32>
    %71 = vector.broadcast %70 : vector<1x32xf32> to vector<8x32xf32>
    %72 = arith.addf %69, %71 : vector<8x32xf32>
    %73 = arith.addf %1, %72 : vector<8x32xf32>
    %c0_26 = arith.constant 0 : index
    %c0_27 = arith.constant 0 : index
    %74 = vector.load %arg8[%c0_26, %c0_27] : memref<1x32xf32, #tpu.memory_space<vmem>>, vector<1x32xf32>
    %c0_28 = arith.constant 0 : index
    %c0_29 = arith.constant 0 : index
    %75 = vector.load %arg9[%c0_28, %c0_29] : memref<1x32xf32, #tpu.memory_space<vmem>>, vector<1x32xf32>
    %cst_30 = arith.constant dense<0.000000e+00> : vector<8xf32>
    %76 = vector.multi_reduction <add>, %73, %cst_30 [1] : vector<8x32xf32> to vector<8xf32>
    %77 = vector.shape_cast %76 : vector<8xf32> to vector<8x1xf32>
    %cst_31 = arith.constant 3.200000e+01 : f32
    %78 = vector.broadcast %cst_31 : f32 to vector<8x1xf32>
    %79 = arith.divf %77, %78 : vector<8x1xf32>
    %80 = arith.mulf %73, %73 : vector<8x32xf32>
    %cst_32 = arith.constant dense<0.000000e+00> : vector<8xf32>
    %81 = vector.multi_reduction <add>, %80, %cst_32 [1] : vector<8x32xf32> to vector<8xf32>
    %82 = vector.shape_cast %81 : vector<8xf32> to vector<8x1xf32>
    %cst_33 = arith.constant 3.200000e+01 : f32
    %83 = vector.broadcast %cst_33 : f32 to vector<8x1xf32>
    %84 = arith.divf %82, %83 : vector<8x1xf32>
    %85 = arith.mulf %79, %79 : vector<8x1xf32>
    %86 = arith.subf %84, %85 : vector<8x1xf32>
    %cst_34 = arith.constant 0.000000e+00 : f32
    %87 = vector.broadcast %cst_34 : f32 to vector<8x1xf32>
    %88 = arith.maximumf %86, %87 : vector<8x1xf32>
    %89 = vector.broadcast %79 : vector<8x1xf32> to vector<8x32xf32>
    %90 = arith.subf %73, %89 : vector<8x32xf32>
    %cst_35 = arith.constant 9.99999974E-6 : f32
    %91 = vector.broadcast %cst_35 : f32 to vector<8x1xf32>
    %92 = arith.addf %88, %91 : vector<8x1xf32>
    %93 = math.rsqrt %92 : vector<8x1xf32>
    %94 = vector.broadcast %93 : vector<8x1xf32> to vector<8x32xf32>
    %95 = arith.mulf %90, %94 : vector<8x32xf32>
    %96 = vector.broadcast %74 : vector<1x32xf32> to vector<8x32xf32>
    %97 = arith.mulf %95, %96 : vector<8x32xf32>
    %98 = vector.broadcast %75 : vector<1x32xf32> to vector<8x32xf32>
    %99 = arith.addf %97, %98 : vector<8x32xf32>
    %100 = arith.truncf %99 : vector<8x32xf32> to vector<8x32xbf16>
    %c0_36 = arith.constant 0 : index
    %c0_37 = arith.constant 0 : index
    %101 = vector.load %arg10[%c0_36, %c0_37] : memref<32x128xbf16, #tpu.memory_space<vmem>>, vector<32x128xbf16>
    %cst_38 = arith.constant dense<0.000000e+00> : vector<8x128xf32>
    %102 = tpu.matmul %100, %101, %cst_38 {dimension_numbers = #tpu.dot_dimension_numbers<[1], [0], [0], [1], [0, 0, 1, 1], [], []>} : vector<8x32xbf16>, vector<32x128xbf16>, vector<8x128xf32> -> vector<8x128xf32>
    %c0_39 = arith.constant 0 : index
    %c0_40 = arith.constant 0 : index
    %103 = vector.load %arg11[%c0_39, %c0_40] : memref<1x128xf32, #tpu.memory_space<vmem>>, vector<1x128xf32>
    %104 = vector.broadcast %103 : vector<1x128xf32> to vector<8x128xf32>
    %105 = arith.addf %102, %104 : vector<8x128xf32>
    %cst_41 = arith.constant 5.000000e-01 : f32
    %106 = vector.broadcast %cst_41 : f32 to vector<8x128xf32>
    %107 = arith.mulf %106, %105 : vector<8x128xf32>
    %cst_42 = arith.constant 0.707106769 : f32
    %108 = vector.broadcast %cst_42 : f32 to vector<8x128xf32>
    %109 = arith.mulf %105, %108 : vector<8x128xf32>
    %110 = math.erf %109 : vector<8x128xf32>
    %cst_43 = arith.constant 1.000000e+00 : f32
    %111 = vector.broadcast %cst_43 : f32 to vector<8x128xf32>
    %112 = arith.addf %111, %110 : vector<8x128xf32>
    %113 = arith.mulf %107, %112 : vector<8x128xf32>
    %114 = arith.truncf %113 : vector<8x128xf32> to vector<8x128xbf16>
    %c0_44 = arith.constant 0 : index
    %c0_45 = arith.constant 0 : index
    %115 = vector.load %arg12[%c0_44, %c0_45] : memref<128x32xbf16, #tpu.memory_space<vmem>>, vector<128x32xbf16>
    %cst_46 = arith.constant dense<0.000000e+00> : vector<8x32xf32>
    %116 = tpu.matmul %114, %115, %cst_46 {dimension_numbers = #tpu.dot_dimension_numbers<[1], [0], [0], [1], [0, 0, 1, 1], [], []>} : vector<8x128xbf16>, vector<128x32xbf16>, vector<8x32xf32> -> vector<8x32xf32>
    %c0_47 = arith.constant 0 : index
    %c0_48 = arith.constant 0 : index
    %117 = vector.load %arg13[%c0_47, %c0_48] : memref<1x32xf32, #tpu.memory_space<vmem>>, vector<1x32xf32>
    %118 = vector.broadcast %117 : vector<1x32xf32> to vector<8x32xf32>
    %119 = arith.addf %116, %118 : vector<8x32xf32>
    %120 = arith.addf %73, %119 : vector<8x32xf32>
    %121 = vector.shape_cast %120 : vector<8x32xf32> to vector<1x8x32xf32>
    %c0_49 = arith.constant 0 : index
    %c0_50 = arith.constant 0 : index
    %c0_51 = arith.constant 0 : index
    %122 = vector.load %arg14[%c0_49, %c0_50, %c0_51] : memref<1x8x32xf32, #tpu.memory_space<vmem>>, vector<1x8x32xf32>
    tpu.vector_store %arg14[%c0_49, %c0_50, %c0_51], %121 {strides = array<i32>} : memref<1x8x32xf32, #tpu.memory_space<vmem>>, vector<1x8x32xf32>,
    return
  }
  func.func @transform_0(%arg0: i32) -> (i32, i32, i32) {
    %c0_i32 = arith.constant 0 : i32
    %c0_i32_0 = arith.constant 0 : i32
    %c0_i32_1 = arith.constant 0 : i32
    return %arg0, %c0_i32, %c0_i32_0 : i32, i32, i32
  }
  func.func @transform_1(%arg0: i32) -> (i32, i32) {
    %c0_i32 = arith.constant 0 : i32
    %c0_i32_0 = arith.constant 0 : i32
    %c0_i32_1 = arith.constant 0 : i32
    return %c0_i32, %c0_i32_0 : i32, i32
  }
  func.func @transform_2(%arg0: i32) -> (i32, i32) {
    %c0_i32 = arith.constant 0 : i32
    %c0_i32_0 = arith.constant 0 : i32
    %c0_i32_1 = arith.constant 0 : i32
    return %c0_i32, %c0_i32_0 : i32, i32
  }
  func.func @transform_3(%arg0: i32) -> (i32, i32) {
    %c0_i32 = arith.constant 0 : i32
    %c0_i32_0 = arith.constant 0 : i32
    %c0_i32_1 = arith.constant 0 : i32
    return %c0_i32, %c0_i32_0 : i32, i32
  }
  func.func @transform_4(%arg0: i32) -> (i32, i32) {
    %c0_i32 = arith.constant 0 : i32
    %c0_i32_0 = arith.constant 0 : i32
    %c0_i32_1 = arith.constant 0 : i32
    return %c0_i32, %c0_i32_0 : i32, i32
  }
  func.func @transform_5(%arg0: i32) -> (i32, i32) {
    %c0_i32 = arith.constant 0 : i32
    %c0_i32_0 = arith.constant 0 : i32
    %c0_i32_1 = arith.constant 0 : i32
    return %c0_i32, %c0_i32_0 : i32, i32
  }
  func.func @transform_6(%arg0: i32) -> (i32, i32) {
    %c0_i32 = arith.constant 0 : i32
    %c0_i32_0 = arith.constant 0 : i32
    %c0_i32_1 = arith.constant 0 : i32
    return %c0_i32, %c0_i32_0 : i32, i32
  }
  func.func @transform_7(%arg0: i32) -> (i32, i32) {
    %c0_i32 = arith.constant 0 : i32
    %c0_i32_0 = arith.constant 0 : i32
    %c0_i32_1 = arith.constant 0 : i32
    return %c0_i32, %c0_i32_0 : i32, i32
  }
  func.func @transform_8(%arg0: i32) -> (i32, i32) {
    %c0_i32 = arith.constant 0 : i32
    %c0_i32_0 = arith.constant 0 : i32
    %c0_i32_1 = arith.constant 0 : i32
    return %c0_i32, %c0_i32_0 : i32, i32
  }
  func.func @transform_9(%arg0: i32) -> (i32, i32) {
    %c0_i32 = arith.constant 0 : i32
    %c0_i32_0 = arith.constant 0 : i32
    %c0_i32_1 = arith.constant 0 : i32
    return %c0_i32, %c0_i32_0 : i32, i32
  }
  func.func @transform_10(%arg0: i32) -> (i32, i32) {
    %c0_i32 = arith.constant 0 : i32
    %c0_i32_0 = arith.constant 0 : i32
    %c0_i32_1 = arith.constant 0 : i32
    return %c0_i32, %c0_i32_0 : i32, i32
  }
  func.func @transform_11(%arg0: i32) -> (i32, i32) {
    %c0_i32 = arith.constant 0 : i32
    %c0_i32_0 = arith.constant 0 : i32
    %c0_i32_1 = arith.constant 0 : i32
    return %c0_i32, %c0_i32_0 : i32, i32
  }
  func.func @transform_12(%arg0: i32) -> (i32, i32) {
    %c0_i32 = arith.constant 0 : i32
    %c0_i32_0 = arith.constant 0 : i32
    %c0_i32_1 = arith.constant 0 : i32
    return %c0_i32, %c0_i32_0 : i32, i32
  }
  func.func @transform_13(%arg0: i32) -> (i32, i32, i32) {
    %c0_i32 = arith.constant 0 : i32
    %c0_i32_0 = arith.constant 0 : i32
    %c0_i32_1 = arith.constant 0 : i32
    return %arg0, %c0_i32, %c0_i32_0 : i32, i32, i32
  }
}

module attributes {stable_mosaic.version = 11 : i64} {
  func.func @_transformer_block_kernel(%arg0: i32, %arg1: memref<1x8x32xf32, #tpu.memory_space<vmem>>, %arg2: memref<1x32xf32, #tpu.memory_space<vmem>>, %arg3: memref<1x32xf32, #tpu.memory_space<vmem>>, %arg4: memref<32x96xbf16, #tpu.memory_space<vmem>>, %arg5: memref<1x96xf32, #tpu.memory_space<vmem>>, %arg6: memref<32x32xbf16, #tpu.memory_space<vmem>>, %arg7: memref<1x32xf32, #tpu.memory_space<vmem>>, %arg8: memref<1x32xf32, #tpu.memory_space<vmem>>, %arg9: memref<1x32xf32, #tpu.memory_space<vmem>>, %arg10: memref<32x128xbf16, #tpu.memory_space<vmem>>, %arg11: memref<1x128xf32, #tpu.memory_space<vmem>>, %arg12: memref<128x32xbf16, #tpu.memory_space<vmem>>, %arg13: memref<1x32xf32, #tpu.memory_space<vmem>>, %arg14: memref<1x8x32xf32, #tpu.memory_space<vmem>>) attributes {dimension_semantics = [#tpu.dimension_semantics<parallel>], iteration_bounds = array<i64: 2>, scalar_prefetch = 0 : i64, scratch_operands = 0 : i64, tpu.core_type = #tpu.core_type<tc>, window_params = [{transform_indices = @transform_0, window_bounds = array<i64: 1, 8, 32>}, {pipeline_mode = #tpu.pipeline_mode<synchronous>, transform_indices = @transform_1, window_bounds = array<i64: 1, 32>}, {pipeline_mode = #tpu.pipeline_mode<synchronous>, transform_indices = @transform_2, window_bounds = array<i64: 1, 32>}, {pipeline_mode = #tpu.pipeline_mode<synchronous>, transform_indices = @transform_3, window_bounds = array<i64: 32, 96>}, {pipeline_mode = #tpu.pipeline_mode<synchronous>, transform_indices = @transform_4, window_bounds = array<i64: 1, 96>}, {pipeline_mode = #tpu.pipeline_mode<synchronous>, transform_indices = @transform_5, window_bounds = array<i64: 32, 32>}, {pipeline_mode = #tpu.pipeline_mode<synchronous>, transform_indices = @transform_6, window_bounds = array<i64: 1, 32>}, {pipeline_mode = #tpu.pipeline_mode<synchronous>, transform_indices = @transform_7, window_bounds = array<i64: 1, 32>}, {pipeline_mode = #tpu.pipeline_mode<synchronous>, transform_indices = @transform_8, window_bounds = array<i64: 1, 32>}, {pipeline_mode = #tpu.pipeline_mode<synchronous>, transform_indices = @transform_9, window_bounds = array<i64: 32, 128>}, {pipeline_mode = #tpu.pipeline_mode<synchronous>, transform_indices = @transform_10, window_bounds = array<i64: 1, 128>}, {pipeline_mode = #tpu.pipeline_mode<synchronous>, transform_indices = @transform_11, window_bounds = array<i64: 128, 32>}, {pipeline_mode = #tpu.pipeline_mode<synchronous>, transform_indices = @transform_12, window_bounds = array<i64: 1, 32>}, {transform_indices = @transform_13, window_bounds = array<i64: 1, 8, 32>}]} {
    %c0 = arith.constant 0 : index
    %c0_0 = arith.constant 0 : index
    %c0_1 = arith.constant 0 : index
    %0 = vector.load %arg1[%c0, %c0_0, %c0_1] : memref<1x8x32xf32, #tpu.memory_space<vmem>>, vector<1x8x32xf32>
    %1 = vector.shape_cast %0 : vector<1x8x32xf32> to vector<8x32xf32>
    %c0_2 = arith.constant 0 : index
    %c0_3 = arith.constant 0 : index
    %2 = vector.load %arg2[%c0_2, %c0_3] : memref<1x32xf32, #tpu.memory_space<vmem>>, vector<1x32xf32>
    %c0_4 = arith.constant 0 : index
    %c0_5 = arith.constant 0 : index
    %3 = vector.load %arg3[%c0_4, %c0_5] : memref<1x32xf32, #tpu.memory_space<vmem>>, vector<1x32xf32>
    %cst = arith.constant dense<0.000000e+00> : vector<8xf32>
    %4 = vector.multi_reduction <add>, %1, %cst [1] : vector<8x32xf32> to vector<8xf32>
    %5 = vector.shape_cast %4 : vector<8xf32> to vector<8x1xf32>
    %cst_6 = arith.constant 3.200000e+01 : f32
    %6 = vector.broadcast %cst_6 : f32 to vector<8x1xf32>
    %7 = arith.divf %5, %6 : vector<8x1xf32>
    %8 = arith.mulf %1, %1 : vector<8x32xf32>
    %cst_7 = arith.constant dense<0.000000e+00> : vector<8xf32>
    %9 = vector.multi_reduction <add>, %8, %cst_7 [1] : vector<8x32xf32> to vector<8xf32>
    %10 = vector.shape_cast %9 : vector<8xf32> to vector<8x1xf32>
    %cst_8 = arith.constant 3.200000e+01 : f32
    %11 = vector.broadcast %cst_8 : f32 to vector<8x1xf32>
    %12 = arith.divf %10, %11 : vector<8x1xf32>
    %13 = arith.mulf %7, %7 : vector<8x1xf32>
    %14 = arith.subf %12, %13 : vector<8x1xf32>
    %cst_9 = arith.constant 0.000000e+00 : f32
    %15 = vector.broadcast %cst_9 : f32 to vector<8x1xf32>
    %16 = arith.maximumf %14, %15 : vector<8x1xf32>
    %17 = vector.broadcast %7 : vector<8x1xf32> to vector<8x32xf32>
    %18 = arith.subf %1, %17 : vector<8x32xf32>
    %cst_10 = arith.constant 9.99999974E-6 : f32
    %19 = vector.broadcast %cst_10 : f32 to vector<8x1xf32>
    %20 = arith.addf %16, %19 : vector<8x1xf32>
    %21 = math.rsqrt %20 : vector<8x1xf32>
    %22 = vector.broadcast %21 : vector<8x1xf32> to vector<8x32xf32>
    %23 = arith.mulf %18, %22 : vector<8x32xf32>
    %24 = vector.broadcast %2 : vector<1x32xf32> to vector<8x32xf32>
    %25 = arith.mulf %23, %24 : vector<8x32xf32>
    %26 = vector.broadcast %3 : vector<1x32xf32> to vector<8x32xf32>
    %27 = arith.addf %25, %26 : vector<8x32xf32>
    %28 = arith.truncf %27 : vector<8x32xf32> to vector<8x32xbf16>
    %c0_11 = arith.constant 0 : index
    %c0_12 = arith.constant 0 : index
    %29 = vector.load %arg4[%c0_11, %c0_12] : memref<32x96xbf16, #tpu.memory_space<vmem>>, vector<32x96xbf16>
    %cst_13 = arith.constant dense<0.000000e+00> : vector<8x96xf32>
    %30 = tpu.matmul %28, %29, %cst_13 {dimension_numbers = #tpu.dot_dimension_numbers<[1], [0], [0], [1], [0, 0, 1, 1], [], []>} : vector<8x32xbf16>, vector<32x96xbf16>, vector<8x96xf32> -> vector<8x96xf32>
    %c0_14 = arith.constant 0 : index
    %c0_15 = arith.constant 0 : index
    %31 = vector.load %arg5[%c0_14, %c0_15] : memref<1x96xf32, #tpu.memory_space<vmem>>, vector<1x96xf32>
    %32 = vector.broadcast %31 : vector<1x96xf32> to vector<8x96xf32>
    %33 = arith.addf %30, %32 : vector<8x96xf32>
    %34 = vector.extract_strided_slice %33 {offsets = [0, 0], sizes = [8, 32], strides = [1, 1]} : vector<8x96xf32> to vector<8x32xf32>
    %cst_16 = arith.constant 0.353553385 : f32
    %35 = vector.broadcast %cst_16 : f32 to vector<8x32xf32>
    %36 = arith.mulf %34, %35 : vector<8x32xf32>
    %37 = vector.extract_strided_slice %33 {offsets = [0, 32], sizes = [8, 32], strides = [1, 1]} : vector<8x96xf32> to vector<8x32xf32>
    %38 = vector.extract_strided_slice %33 {offsets = [0, 64], sizes = [8, 32], strides = [1, 1]} : vector<8x96xf32> to vector<8x32xf32>
    %39 = arith.truncf %36 : vector<8x32xf32> to vector<8x32xbf16>
    %40 = vector.shape_cast %39 : vector<8x32xbf16> to vector<1x8x4x8xbf16>
    %41 = tpu.transpose %40, [0, 2, 1, 3] : vector<1x8x4x8xbf16> -> vector<1x4x8x8xbf16>
    %42 = vector.shape_cast %41 : vector<1x4x8x8xbf16> to vector<4x8x8xbf16>
    %43 = arith.truncf %37 : vector<8x32xf32> to vector<8x32xbf16>
    %44 = vector.shape_cast %43 : vector<8x32xbf16> to vector<1x8x4x8xbf16>
    %45 = tpu.transpose %44, [0, 2, 1, 3] : vector<1x8x4x8xbf16> -> vector<1x4x8x8xbf16>
    %46 = vector.shape_cast %45 : vector<1x4x8x8xbf16> to vector<4x8x8xbf16>
    %47 = arith.truncf %38 : vector<8x32xf32> to vector<8x32xbf16>
    %48 = vector.shape_cast %47 : vector<8x32xbf16> to vector<1x8x4x8xbf16>
    %49 = tpu.transpose %48, [0, 2, 1, 3] : vector<1x8x4x8xbf16> -> vector<1x4x8x8xbf16>
    %50 = vector.shape_cast %49 : vector<1x4x8x8xbf16> to vector<4x8x8xbf16>
    "tpu.trace_start"() <{level = 10 : i32, message = "nqd,nkd->nqk"}> : () -> ()
    %cst_17 = arith.constant dense<0.000000e+00> : vector<4x8x8xf32>
    %51 = tpu.matmul %42, %46, %cst_17 {dimension_numbers = #tpu.dot_dimension_numbers<[2], [2], [1], [1], [0, 0, 0, 1, 1, 1], [0], [0]>} : vector<4x8x8xbf16>, vector<4x8x8xbf16>, vector<4x8x8xf32> -> vector<4x8x8xf32>
    "tpu.trace_stop"() : () -> ()
    %cst_18 = arith.constant dense<0xFF800000> : vector<4x8xf32>
    %52 = vector.multi_reduction <maximumf>, %51, %cst_18 [2] : vector<4x8x8xf32> to vector<4x8xf32>
    %53 = vector.shape_cast %52 : vector<4x8xf32> to vector<4x8x1xf32>
    %54 = vector.broadcast %53 : vector<4x8x1xf32> to vector<4x8x8xf32>
    %55 = arith.subf %51, %54 : vector<4x8x8xf32>
    %56 = math.exp %55 : vector<4x8x8xf32>
    %cst_19 = arith.constant dense<0.000000e+00> : vector<4x8xf32>
    %57 = vector.multi_reduction <add>, %56, %cst_19 [2] : vector<4x8x8xf32> to vector<4x8xf32>
    %58 = vector.shape_cast %57 : vector<4x8xf32> to vector<4x8x1xf32>
    %59 = tpu.reciprocal %58 {approx = true} : vector<4x8x1xf32> -> vector<4x8x1xf32>
    %60 = vector.broadcast %59 : vector<4x8x1xf32> to vector<4x8x8xf32>
    %61 = arith.mulf %56, %60 : vector<4x8x8xf32>
    %62 = arith.truncf %61 : vector<4x8x8xf32> to vector<4x8x8xbf16>
    "tpu.trace_start"() <{level = 10 : i32, message = "nqk,nkd->nqd"}> : () -> ()
    %cst_20 = arith.constant dense<0.000000e+00> : vector<4x8x8xf32>
    %63 = tpu.matmul %62, %50, %cst_20 {dimension_numbers = #tpu.dot_dimension_numbers<[2], [1], [1], [2], [0, 0, 0, 1, 1, 2], [0], [0]>} : vector<4x8x8xbf16>, vector<4x8x8xbf16>, vector<4x8x8xf32> -> vector<4x8x8xf32>
    "tpu.trace_stop"() : () -> ()
    %64 = arith.truncf %63 : vector<4x8x8xf32> to vector<4x8x8xbf16>
    %65 = vector.shape_cast %64 : vector<4x8x8xbf16> to vector<1x4x8x8xbf16>
    %66 = tpu.transpose %65, [0, 2, 1, 3] : vector<1x4x8x8xbf16> -> vector<1x8x4x8xbf16>
    %67 = vector.shape_cast %66 : vector<1x8x4x8xbf16> to vector<8x32xbf16>
    %c0_21 = arith.constant 0 : index
    %c0_22 = arith.constant 0 : index
    %68 = vector.load %arg6[%c0_21, %c0_22] : memref<32x32xbf16, #tpu.memory_space<vmem>>, vector<32x32xbf16>
    %cst_23 = arith.constant dense<0.000000e+00> : vector<8x32xf32>
    %69 = tpu.matmul %67, %68, %cst_23 {dimension_numbers = #tpu.dot_dimension_numbers<[1], [0], [0], [1], [0, 0, 1, 1], [], []>} : vector<8x32xbf16>, vector<32x32xbf16>, vector<8x32xf32> -> vector<8x32xf32>
    %c0_24 = arith.constant 0 : index
    %c0_25 = arith.constant 0 : index
    %70 = vector.load %arg7[%c0_24, %c0_25] : memref<1x32xf32, #tpu.memory_space<vmem>>, vector<1x32xf32>
    %71 = vector.broadcast %70 : vector<1x32xf32> to vector<8x32xf32>
    %72 = arith.addf %69, %71 : vector<8x32xf32>
    %73 = arith.addf %1, %72 : vector<8x32xf32>
    %c0_26 = arith.constant 0 : index
    %c0_27 = arith.constant 0 : index
    %74 = vector.load %arg8[%c0_26, %c0_27] : memref<1x32xf32, #tpu.memory_space<vmem>>, vector<1x32xf32>
    %c0_28 = arith.constant 0 : index
    %c0_29 = arith.constant 0 : index
    %75 = vector.load %arg9[%c0_28, %c0_29] : memref<1x32xf32, #tpu.memory_space<vmem>>, vector<1x32xf32>
    %cst_30 = arith.constant dense<0.000000e+00> : vector<8xf32>
    %76 = vector.multi_reduction <add>, %73, %cst_30 [1] : vector<8x32xf32> to vector<8xf32>
    %77 = vector.shape_cast %76 : vector<8xf32> to vector<8x1xf32>
    %cst_31 = arith.constant 3.200000e+01 : f32
    %78 = vector.broadcast %cst_31 : f32 to vector<8x1xf32>
    %79 = arith.divf %77, %78 : vector<8x1xf32>
    %80 = arith.mulf %73, %73 : vector<8x32xf32>
    %cst_32 = arith.constant dense<0.000000e+00> : vector<8xf32>
    %81 = vector.multi_reduction <add>, %80, %cst_32 [1] : vector<8x32xf32> to vector<8xf32>
    %82 = vector.shape_cast %81 : vector<8xf32> to vector<8x1xf32>
    %cst_33 = arith.constant 3.200000e+01 : f32
    %83 = vector.broadcast %cst_33 : f32 to vector<8x1xf32>
    %84 = arith.divf %82, %83 : vector<8x1xf32>
    %85 = arith.mulf %79, %79 : vector<8x1xf32>
    %86 = arith.subf %84, %85 : vector<8x1xf32>
    %cst_34 = arith.constant 0.000000e+00 : f32
    %87 = vector.broadcast %cst_34 : f32 to vector<8x1xf32>
    %88 = arith.maximumf %86, %87 : vector<8x1xf32>
    %89 = vector.broadcast %79 : vector<8x1xf32> to vector<8x32xf32>
    %90 = arith.subf %73, %89 : vector<8x32xf32>
    %cst_35 = arith.constant 9.99999974E-6 : f32
    %91 = vector.broadcast %cst_35 : f32 to vector<8x1xf32>
    %92 = arith.addf %88, %91 : vector<8x1xf32>
    %93 = math.rsqrt %92 : vector<8x1xf32>
    %94 = vector.broadcast %93 : vector<8x1xf32> to vector<8x32xf32>
    %95 = arith.mulf %90, %94 : vector<8x32xf32>
    %96 = vector.broadcast %74 : vector<1x32xf32> to vector<8x32xf32>
    %97 = arith.mulf %95, %96 : vector<8x32xf32>
    %98 = vector.broadcast %75 : vector<1x32xf32> to vector<8x32xf32>
    %99 = arith.addf %97, %98 : vector<8x32xf32>
    %100 = arith.truncf %99 : vector<8x32xf32> to vector<8x32xbf16>
    %c0_36 = arith.constant 0 : index
    %c0_37 = arith.constant 0 : index
    %101 = vector.load %arg10[%c0_36, %c0_37] : memref<32x128xbf16, #tpu.memory_space<vmem>>, vector<32x128xbf16>
    %cst_38 = arith.constant dense<0.000000e+00> : vector<8x128xf32>
    %102 = tpu.matmul %100, %101, %cst_38 {dimension_numbers = #tpu.dot_dimension_numbers<[1], [0], [0], [1], [0, 0, 1, 1], [], []>} : vector<8x32xbf16>, vector<32x128xbf16>, vector<8x128xf32> -> vector<8x128xf32>
    %c0_39 = arith.constant 0 : index
    %c0_40 = arith.constant 0 : index
    %103 = vector.load %arg11[%c0_39, %c0_40] : memref<1x128xf32, #tpu.memory_space<vmem>>, vector<1x128xf32>
    %104 = vector.broadcast %103 : vector<1x128xf32> to vector<8x128xf32>
    %105 = arith.addf %102, %104 : vector<8x128xf32>
    %cst_41 = arith.constant 5.000000e-01 : f32
    %106 = vector.broadcast %cst_41 : f32 to vector<8x128xf32>
    %107 = arith.mulf %106, %105 : vector<8x128xf32>
    %cst_42 = arith.constant 0.707106769 : f32
    %108 = vector.broadcast %cst_42 : f32 to vector<8x128xf32>
    %109 = arith.mulf %105, %108 : vector<8x128xf32>
    %110 = math.erf %109 : vector<8x128xf32>
    %cst_43 = arith.constant 1.000000e+00 : f32
    %111 = vector.broadcast %cst_43 : f32 to vector<8x128xf32>
    %112 = arith.addf %111, %110 : vector<8x128xf32>
    %113 = arith.mulf %107, %112 : vector<8x128xf32>
    %114 = arith.truncf %113 : vector<8x128xf32> to vector<8x128xbf16>
    %c0_44 = arith.constant 0 : index
    %c0_45 = arith.constant 0 : index
    %115 = vector.load %arg12[%c0_44, %c0_45] : memref<128x32xbf16, #tpu.memory_space<vmem>>, vector<128x32xbf16>
    %cst_46 = arith.constant dense<0.000000e+00> : vector<8x32xf32>
    %116 = tpu.matmul %114, %115, %cst_46 {dimension_numbers = #tpu.dot_dimension_numbers<[1], [0], [0], [1], [0, 0, 1, 1], [], []>} : vector<8x128xbf16>, vector<128x32xbf16>, vector<8x32xf32> -> vector<8x32xf32>
    %c0_47 = arith.constant 0 : index
    %c0_48 = arith.constant 0 : index
    %117 = vector.load %arg13[%c0_47, %c0_48] : memref<1x32xf32, #tpu.memory_space<vmem>>, vector<1x32xf32>
    %118 = vector.broadcast %117 : vector<1x32xf32> to vector<8x32xf32>
    %119 = arith.addf %116, %118 : vector<8x32xf32>
    %120 = arith.addf %73, %119 : vector<8x32xf32>
    %121 = vector.shape_cast %120 : vector<8x32xf32> to vector<1x8x32xf32>
    %c0_49 = arith.constant 0 : index
    %c0_50 = arith.constant 0 : index
    %c0_51 = arith.constant 0 : index
    %122 = vector.load %arg14[%c0_49, %c0_50, %c0_51] : memref<1x8x32xf32, #tpu.memory_space<vmem>>, vector<1x8x32xf32>
    tpu.vector_store %arg14[%c0_49, %c0_50, %c0_51], %121 {strides = array<i32>} : memref<1x8x32xf32, #tpu.memory_space<vmem>>, vector<1x8x32xf32>,
    return
  }
  func.func @transform_0(%arg0: i32) -> (i32, i32, i32) {
    %c0_i32 = arith.constant 0 : i32
    %c0_i32_0 = arith.constant 0 : i32
    %c0_i32_1 = arith.constant 0 : i32
    return %arg0, %c0_i32, %c0_i32_0 : i32, i32, i32
  }
  func.func @transform_1(%arg0: i32) -> (i32, i32) {
    %c0_i32 = arith.constant 0 : i32
    %c0_i32_0 = arith.constant 0 : i32
    %c0_i32_1 = arith.constant 0 : i32
    return %c0_i32, %c0_i32_0 : i32, i32
  }
  func.func @transform_2(%arg0: i32) -> (i32, i32) {
    %c0_i32 = arith.constant 0 : i32
    %c0_i32_0 = arith.constant 0 : i32
    %c0_i32_1 = arith.constant 0 : i32
    return %c0_i32, %c0_i32_0 : i32, i32
  }
  func.func @transform_3(%arg0: i32) -> (i32, i32) {
    %c0_i32 = arith.constant 0 : i32
    %c0_i32_0 = arith.constant 0 : i32
    %c0_i32_1 = arith.constant 0 : i32
    return %c0_i32, %c0_i32_0 : i32, i32
  }
  func.func @transform_4(%arg0: i32) -> (i32, i32) {
    %c0_i32 = arith.constant 0 : i32
    %c0_i32_0 = arith.constant 0 : i32
    %c0_i32_1 = arith.constant 0 : i32
    return %c0_i32, %c0_i32_0 : i32, i32
  }
  func.func @transform_5(%arg0: i32) -> (i32, i32) {
    %c0_i32 = arith.constant 0 : i32
    %c0_i32_0 = arith.constant 0 : i32
    %c0_i32_1 = arith.constant 0 : i32
    return %c0_i32, %c0_i32_0 : i32, i32
  }
  func.func @transform_6(%arg0: i32) -> (i32, i32) {
    %c0_i32 = arith.constant 0 : i32
    %c0_i32_0 = arith.constant 0 : i32
    %c0_i32_1 = arith.constant 0 : i32
    return %c0_i32, %c0_i32_0 : i32, i32
  }
  func.func @transform_7(%arg0: i32) -> (i32, i32) {
    %c0_i32 = arith.constant 0 : i32
    %c0_i32_0 = arith.constant 0 : i32
    %c0_i32_1 = arith.constant 0 : i32
    return %c0_i32, %c0_i32_0 : i32, i32
  }
  func.func @transform_8(%arg0: i32) -> (i32, i32) {
    %c0_i32 = arith.constant 0 : i32
    %c0_i32_0 = arith.constant 0 : i32
    %c0_i32_1 = arith.constant 0 : i32
    return %c0_i32, %c0_i32_0 : i32, i32
  }
  func.func @transform_9(%arg0: i32) -> (i32, i32) {
    %c0_i32 = arith.constant 0 : i32
    %c0_i32_0 = arith.constant 0 : i32
    %c0_i32_1 = arith.constant 0 : i32
    return %c0_i32, %c0_i32_0 : i32, i32
  }
  func.func @transform_10(%arg0: i32) -> (i32, i32) {
    %c0_i32 = arith.constant 0 : i32
    %c0_i32_0 = arith.constant 0 : i32
    %c0_i32_1 = arith.constant 0 : i32
    return %c0_i32, %c0_i32_0 : i32, i32
  }
  func.func @transform_11(%arg0: i32) -> (i32, i32) {
    %c0_i32 = arith.constant 0 : i32
    %c0_i32_0 = arith.constant 0 : i32
    %c0_i32_1 = arith.constant 0 : i32
    return %c0_i32, %c0_i32_0 : i32, i32
  }
  func.func @transform_12(%arg0: i32) -> (i32, i32) {
    %c0_i32 = arith.constant 0 : i32
    %c0_i32_0 = arith.constant 0 : i32
    %c0_i32_1 = arith.constant 0 : i32
    return %c0_i32, %c0_i32_0 : i32, i32
  }
  func.func @transform_13(%arg0: i32) -> (i32, i32, i32) {
    %c0_i32 = arith.constant 0 : i32
    %c0_i32_0 = arith.constant 0 : i32
    %c0_i32_1 = arith.constant 0 : i32
    return %arg0, %c0_i32, %c0_i32_0 : i32, i32, i32
  }
}

module attributes {stable_mosaic.version = 11 : i64} {
  func.func @_transformer_block_kernel(%arg0: i32, %arg1: memref<1x8x32xf32, #tpu.memory_space<vmem>>, %arg2: memref<1x32xf32, #tpu.memory_space<vmem>>, %arg3: memref<1x32xf32, #tpu.memory_space<vmem>>, %arg4: memref<32x96xbf16, #tpu.memory_space<vmem>>, %arg5: memref<1x96xf32, #tpu.memory_space<vmem>>, %arg6: memref<32x32xbf16, #tpu.memory_space<vmem>>, %arg7: memref<1x32xf32, #tpu.memory_space<vmem>>, %arg8: memref<1x32xf32, #tpu.memory_space<vmem>>, %arg9: memref<1x32xf32, #tpu.memory_space<vmem>>, %arg10: memref<32x128xbf16, #tpu.memory_space<vmem>>, %arg11: memref<1x128xf32, #tpu.memory_space<vmem>>, %arg12: memref<128x32xbf16, #tpu.memory_space<vmem>>, %arg13: memref<1x32xf32, #tpu.memory_space<vmem>>, %arg14: memref<1x8x32xf32, #tpu.memory_space<vmem>>) attributes {dimension_semantics = [#tpu.dimension_semantics<parallel>], iteration_bounds = array<i64: 2>, scalar_prefetch = 0 : i64, scratch_operands = 0 : i64, tpu.core_type = #tpu.core_type<tc>, window_params = [{transform_indices = @transform_0, window_bounds = array<i64: 1, 8, 32>}, {pipeline_mode = #tpu.pipeline_mode<synchronous>, transform_indices = @transform_1, window_bounds = array<i64: 1, 32>}, {pipeline_mode = #tpu.pipeline_mode<synchronous>, transform_indices = @transform_2, window_bounds = array<i64: 1, 32>}, {pipeline_mode = #tpu.pipeline_mode<synchronous>, transform_indices = @transform_3, window_bounds = array<i64: 32, 96>}, {pipeline_mode = #tpu.pipeline_mode<synchronous>, transform_indices = @transform_4, window_bounds = array<i64: 1, 96>}, {pipeline_mode = #tpu.pipeline_mode<synchronous>, transform_indices = @transform_5, window_bounds = array<i64: 32, 32>}, {pipeline_mode = #tpu.pipeline_mode<synchronous>, transform_indices = @transform_6, window_bounds = array<i64: 1, 32>}, {pipeline_mode = #tpu.pipeline_mode<synchronous>, transform_indices = @transform_7, window_bounds = array<i64: 1, 32>}, {pipeline_mode = #tpu.pipeline_mode<synchronous>, transform_indices = @transform_8, window_bounds = array<i64: 1, 32>}, {pipeline_mode = #tpu.pipeline_mode<synchronous>, transform_indices = @transform_9, window_bounds = array<i64: 32, 128>}, {pipeline_mode = #tpu.pipeline_mode<synchronous>, transform_indices = @transform_10, window_bounds = array<i64: 1, 128>}, {pipeline_mode = #tpu.pipeline_mode<synchronous>, transform_indices = @transform_11, window_bounds = array<i64: 128, 32>}, {pipeline_mode = #tpu.pipeline_mode<synchronous>, transform_indices = @transform_12, window_bounds = array<i64: 1, 32>}, {transform_indices = @transform_13, window_bounds = array<i64: 1, 8, 32>}]} {
    %c0 = arith.constant 0 : index
    %c0_0 = arith.constant 0 : index
    %c0_1 = arith.constant 0 : index
    %0 = vector.load %arg1[%c0, %c0_0, %c0_1] : memref<1x8x32xf32, #tpu.memory_space<vmem>>, vector<1x8x32xf32>
    %1 = vector.shape_cast %0 : vector<1x8x32xf32> to vector<8x32xf32>
    %c0_2 = arith.constant 0 : index
    %c0_3 = arith.constant 0 : index
    %2 = vector.load %arg2[%c0_2, %c0_3] : memref<1x32xf32, #tpu.memory_space<vmem>>, vector<1x32xf32>
    %c0_4 = arith.constant 0 : index
    %c0_5 = arith.constant 0 : index
    %3 = vector.load %arg3[%c0_4, %c0_5] : memref<1x32xf32, #tpu.memory_space<vmem>>, vector<1x32xf32>
    %cst = arith.constant dense<0.000000e+00> : vector<8xf32>
    %4 = vector.multi_reduction <add>, %1, %cst [1] : vector<8x32xf32> to vector<8xf32>
    %5 = vector.shape_cast %4 : vector<8xf32> to vector<8x1xf32>
    %cst_6 = arith.constant 3.200000e+01 : f32
    %6 = vector.broadcast %cst_6 : f32 to vector<8x1xf32>
    %7 = arith.divf %5, %6 : vector<8x1xf32>
    %8 = arith.mulf %1, %1 : vector<8x32xf32>
    %cst_7 = arith.constant dense<0.000000e+00> : vector<8xf32>
    %9 = vector.multi_reduction <add>, %8, %cst_7 [1] : vector<8x32xf32> to vector<8xf32>
    %10 = vector.shape_cast %9 : vector<8xf32> to vector<8x1xf32>
    %cst_8 = arith.constant 3.200000e+01 : f32
    %11 = vector.broadcast %cst_8 : f32 to vector<8x1xf32>
    %12 = arith.divf %10, %11 : vector<8x1xf32>
    %13 = arith.mulf %7, %7 : vector<8x1xf32>
    %14 = arith.subf %12, %13 : vector<8x1xf32>
    %cst_9 = arith.constant 0.000000e+00 : f32
    %15 = vector.broadcast %cst_9 : f32 to vector<8x1xf32>
    %16 = arith.maximumf %14, %15 : vector<8x1xf32>
    %17 = vector.broadcast %7 : vector<8x1xf32> to vector<8x32xf32>
    %18 = arith.subf %1, %17 : vector<8x32xf32>
    %cst_10 = arith.constant 9.99999974E-6 : f32
    %19 = vector.broadcast %cst_10 : f32 to vector<8x1xf32>
    %20 = arith.addf %16, %19 : vector<8x1xf32>
    %21 = math.rsqrt %20 : vector<8x1xf32>
    %22 = vector.broadcast %21 : vector<8x1xf32> to vector<8x32xf32>
    %23 = arith.mulf %18, %22 : vector<8x32xf32>
    %24 = vector.broadcast %2 : vector<1x32xf32> to vector<8x32xf32>
    %25 = arith.mulf %23, %24 : vector<8x32xf32>
    %26 = vector.broadcast %3 : vector<1x32xf32> to vector<8x32xf32>
    %27 = arith.addf %25, %26 : vector<8x32xf32>
    %28 = arith.truncf %27 : vector<8x32xf32> to vector<8x32xbf16>
    %c0_11 = arith.constant 0 : index
    %c0_12 = arith.constant 0 : index
    %29 = vector.load %arg4[%c0_11, %c0_12] : memref<32x96xbf16, #tpu.memory_space<vmem>>, vector<32x96xbf16>
    %cst_13 = arith.constant dense<0.000000e+00> : vector<8x96xf32>
    %30 = tpu.matmul %28, %29, %cst_13 {dimension_numbers = #tpu.dot_dimension_numbers<[1], [0], [0], [1], [0, 0, 1, 1], [], []>} : vector<8x32xbf16>, vector<32x96xbf16>, vector<8x96xf32> -> vector<8x96xf32>
    %c0_14 = arith.constant 0 : index
    %c0_15 = arith.constant 0 : index
    %31 = vector.load %arg5[%c0_14, %c0_15] : memref<1x96xf32, #tpu.memory_space<vmem>>, vector<1x96xf32>
    %32 = vector.broadcast %31 : vector<1x96xf32> to vector<8x96xf32>
    %33 = arith.addf %30, %32 : vector<8x96xf32>
    %34 = vector.extract_strided_slice %33 {offsets = [0, 0], sizes = [8, 32], strides = [1, 1]} : vector<8x96xf32> to vector<8x32xf32>
    %cst_16 = arith.constant 0.353553385 : f32
    %35 = vector.broadcast %cst_16 : f32 to vector<8x32xf32>
    %36 = arith.mulf %34, %35 : vector<8x32xf32>
    %37 = vector.extract_strided_slice %33 {offsets = [0, 32], sizes = [8, 32], strides = [1, 1]} : vector<8x96xf32> to vector<8x32xf32>
    %38 = vector.extract_strided_slice %33 {offsets = [0, 64], sizes = [8, 32], strides = [1, 1]} : vector<8x96xf32> to vector<8x32xf32>
    %39 = arith.truncf %36 : vector<8x32xf32> to vector<8x32xbf16>
    %40 = vector.shape_cast %39 : vector<8x32xbf16> to vector<1x8x32xbf16>
    %41 = arith.truncf %37 : vector<8x32xf32> to vector<8x32xbf16>
    %42 = vector.shape_cast %41 : vector<8x32xbf16> to vector<1x8x32xbf16>
    %43 = arith.truncf %38 : vector<8x32xf32> to vector<8x32xbf16>
    %44 = vector.shape_cast %43 : vector<8x32xbf16> to vector<1x8x32xbf16>
    %45 = vector.extract_strided_slice %40 {offsets = [0, 0, 0], sizes = [1, 8, 8], strides = [1, 1, 1]} : vector<1x8x32xbf16> to vector<1x8x8xbf16>
    %46 = vector.extract_strided_slice %42 {offsets = [0, 0, 0], sizes = [1, 8, 8], strides = [1, 1, 1]} : vector<1x8x32xbf16> to vector<1x8x8xbf16>
    "tpu.trace_start"() <{level = 10 : i32, message = "bqd,bkd->bqk"}> : () -> ()
    %cst_17 = arith.constant dense<0.000000e+00> : vector<1x8x8xf32>
    %47 = tpu.matmul %45, %46, %cst_17 {dimension_numbers = #tpu.dot_dimension_numbers<[2], [2], [1], [1], [0, 0, 0, 1, 1, 1], [0], [0]>} : vector<1x8x8xbf16>, vector<1x8x8xbf16>, vector<1x8x8xf32> -> vector<1x8x8xf32>
    "tpu.trace_stop"() : () -> ()
    %cst_18 = arith.constant dense<0xFF800000> : vector<1x8xf32>
    %48 = vector.multi_reduction <maximumf>, %47, %cst_18 [2] : vector<1x8x8xf32> to vector<1x8xf32>
    %49 = vector.shape_cast %48 : vector<1x8xf32> to vector<1x8x1xf32>
    %50 = vector.broadcast %49 : vector<1x8x1xf32> to vector<1x8x8xf32>
    %51 = arith.subf %47, %50 : vector<1x8x8xf32>
    %52 = math.exp %51 : vector<1x8x8xf32>
    %cst_19 = arith.constant dense<0.000000e+00> : vector<1x8xf32>
    %53 = vector.multi_reduction <add>, %52, %cst_19 [2] : vector<1x8x8xf32> to vector<1x8xf32>
    %54 = vector.shape_cast %53 : vector<1x8xf32> to vector<1x8x1xf32>
    %55 = tpu.reciprocal %54 {approx = true} : vector<1x8x1xf32> -> vector<1x8x1xf32>
    %56 = vector.broadcast %55 : vector<1x8x1xf32> to vector<1x8x8xf32>
    %57 = arith.mulf %52, %56 : vector<1x8x8xf32>
    %58 = arith.truncf %57 : vector<1x8x8xf32> to vector<1x8x8xbf16>
    %59 = vector.extract_strided_slice %44 {offsets = [0, 0, 0], sizes = [1, 8, 8], strides = [1, 1, 1]} : vector<1x8x32xbf16> to vector<1x8x8xbf16>
    "tpu.trace_start"() <{level = 10 : i32, message = "bqk,bkd->bqd"}> : () -> ()
    %cst_20 = arith.constant dense<0.000000e+00> : vector<1x8x8xf32>
    %60 = tpu.matmul %58, %59, %cst_20 {dimension_numbers = #tpu.dot_dimension_numbers<[2], [1], [1], [2], [0, 0, 0, 1, 1, 2], [0], [0]>} : vector<1x8x8xbf16>, vector<1x8x8xbf16>, vector<1x8x8xf32> -> vector<1x8x8xf32>
    "tpu.trace_stop"() : () -> ()
    %61 = vector.extract_strided_slice %40 {offsets = [0, 0, 8], sizes = [1, 8, 8], strides = [1, 1, 1]} : vector<1x8x32xbf16> to vector<1x8x8xbf16>
    %62 = vector.extract_strided_slice %42 {offsets = [0, 0, 8], sizes = [1, 8, 8], strides = [1, 1, 1]} : vector<1x8x32xbf16> to vector<1x8x8xbf16>
    "tpu.trace_start"() <{level = 10 : i32, message = "bqd,bkd->bqk"}> : () -> ()
    %cst_21 = arith.constant dense<0.000000e+00> : vector<1x8x8xf32>
    %63 = tpu.matmul %61, %62, %cst_21 {dimension_numbers = #tpu.dot_dimension_numbers<[2], [2], [1], [1], [0, 0, 0, 1, 1, 1], [0], [0]>} : vector<1x8x8xbf16>, vector<1x8x8xbf16>, vector<1x8x8xf32> -> vector<1x8x8xf32>
    "tpu.trace_stop"() : () -> ()
    %cst_22 = arith.constant dense<0xFF800000> : vector<1x8xf32>
    %64 = vector.multi_reduction <maximumf>, %63, %cst_22 [2] : vector<1x8x8xf32> to vector<1x8xf32>
    %65 = vector.shape_cast %64 : vector<1x8xf32> to vector<1x8x1xf32>
    %66 = vector.broadcast %65 : vector<1x8x1xf32> to vector<1x8x8xf32>
    %67 = arith.subf %63, %66 : vector<1x8x8xf32>
    %68 = math.exp %67 : vector<1x8x8xf32>
    %cst_23 = arith.constant dense<0.000000e+00> : vector<1x8xf32>
    %69 = vector.multi_reduction <add>, %68, %cst_23 [2] : vector<1x8x8xf32> to vector<1x8xf32>
    %70 = vector.shape_cast %69 : vector<1x8xf32> to vector<1x8x1xf32>
    %71 = tpu.reciprocal %70 {approx = true} : vector<1x8x1xf32> -> vector<1x8x1xf32>
    %72 = vector.broadcast %71 : vector<1x8x1xf32> to vector<1x8x8xf32>
    %73 = arith.mulf %68, %72 : vector<1x8x8xf32>
    %74 = arith.truncf %73 : vector<1x8x8xf32> to vector<1x8x8xbf16>
    %75 = vector.extract_strided_slice %44 {offsets = [0, 0, 8], sizes = [1, 8, 8], strides = [1, 1, 1]} : vector<1x8x32xbf16> to vector<1x8x8xbf16>
    "tpu.trace_start"() <{level = 10 : i32, message = "bqk,bkd->bqd"}> : () -> ()
    %cst_24 = arith.constant dense<0.000000e+00> : vector<1x8x8xf32>
    %76 = tpu.matmul %74, %75, %cst_24 {dimension_numbers = #tpu.dot_dimension_numbers<[2], [1], [1], [2], [0, 0, 0, 1, 1, 2], [0], [0]>} : vector<1x8x8xbf16>, vector<1x8x8xbf16>, vector<1x8x8xf32> -> vector<1x8x8xf32>
    "tpu.trace_stop"() : () -> ()
    %77 = vector.extract_strided_slice %40 {offsets = [0, 0, 16], sizes = [1, 8, 8], strides = [1, 1, 1]} : vector<1x8x32xbf16> to vector<1x8x8xbf16>
    %78 = vector.extract_strided_slice %42 {offsets = [0, 0, 16], sizes = [1, 8, 8], strides = [1, 1, 1]} : vector<1x8x32xbf16> to vector<1x8x8xbf16>
    "tpu.trace_start"() <{level = 10 : i32, message = "bqd,bkd->bqk"}> : () -> ()
    %cst_25 = arith.constant dense<0.000000e+00> : vector<1x8x8xf32>
    %79 = tpu.matmul %77, %78, %cst_25 {dimension_numbers = #tpu.dot_dimension_numbers<[2], [2], [1], [1], [0, 0, 0, 1, 1, 1], [0], [0]>} : vector<1x8x8xbf16>, vector<1x8x8xbf16>, vector<1x8x8xf32> -> vector<1x8x8xf32>
    "tpu.trace_stop"() : () -> ()
    %cst_26 = arith.constant dense<0xFF800000> : vector<1x8xf32>
    %80 = vector.multi_reduction <maximumf>, %79, %cst_26 [2] : vector<1x8x8xf32> to vector<1x8xf32>
    %81 = vector.shape_cast %80 : vector<1x8xf32> to vector<1x8x1xf32>
    %82 = vector.broadcast %81 : vector<1x8x1xf32> to vector<1x8x8xf32>
    %83 = arith.subf %79, %82 : vector<1x8x8xf32>
    %84 = math.exp %83 : vector<1x8x8xf32>
    %cst_27 = arith.constant dense<0.000000e+00> : vector<1x8xf32>
    %85 = vector.multi_reduction <add>, %84, %cst_27 [2] : vector<1x8x8xf32> to vector<1x8xf32>
    %86 = vector.shape_cast %85 : vector<1x8xf32> to vector<1x8x1xf32>
    %87 = tpu.reciprocal %86 {approx = true} : vector<1x8x1xf32> -> vector<1x8x1xf32>
    %88 = vector.broadcast %87 : vector<1x8x1xf32> to vector<1x8x8xf32>
    %89 = arith.mulf %84, %88 : vector<1x8x8xf32>
    %90 = arith.truncf %89 : vector<1x8x8xf32> to vector<1x8x8xbf16>
    %91 = vector.extract_strided_slice %44 {offsets = [0, 0, 16], sizes = [1, 8, 8], strides = [1, 1, 1]} : vector<1x8x32xbf16> to vector<1x8x8xbf16>
    "tpu.trace_start"() <{level = 10 : i32, message = "bqk,bkd->bqd"}> : () -> ()
    %cst_28 = arith.constant dense<0.000000e+00> : vector<1x8x8xf32>
    %92 = tpu.matmul %90, %91, %cst_28 {dimension_numbers = #tpu.dot_dimension_numbers<[2], [1], [1], [2], [0, 0, 0, 1, 1, 2], [0], [0]>} : vector<1x8x8xbf16>, vector<1x8x8xbf16>, vector<1x8x8xf32> -> vector<1x8x8xf32>
    "tpu.trace_stop"() : () -> ()
    %93 = vector.extract_strided_slice %40 {offsets = [0, 0, 24], sizes = [1, 8, 8], strides = [1, 1, 1]} : vector<1x8x32xbf16> to vector<1x8x8xbf16>
    %94 = vector.extract_strided_slice %42 {offsets = [0, 0, 24], sizes = [1, 8, 8], strides = [1, 1, 1]} : vector<1x8x32xbf16> to vector<1x8x8xbf16>
    "tpu.trace_start"() <{level = 10 : i32, message = "bqd,bkd->bqk"}> : () -> ()
    %cst_29 = arith.constant dense<0.000000e+00> : vector<1x8x8xf32>
    %95 = tpu.matmul %93, %94, %cst_29 {dimension_numbers = #tpu.dot_dimension_numbers<[2], [2], [1], [1], [0, 0, 0, 1, 1, 1], [0], [0]>} : vector<1x8x8xbf16>, vector<1x8x8xbf16>, vector<1x8x8xf32> -> vector<1x8x8xf32>
    "tpu.trace_stop"() : () -> ()
    %cst_30 = arith.constant dense<0xFF800000> : vector<1x8xf32>
    %96 = vector.multi_reduction <maximumf>, %95, %cst_30 [2] : vector<1x8x8xf32> to vector<1x8xf32>
    %97 = vector.shape_cast %96 : vector<1x8xf32> to vector<1x8x1xf32>
    %98 = vector.broadcast %97 : vector<1x8x1xf32> to vector<1x8x8xf32>
    %99 = arith.subf %95, %98 : vector<1x8x8xf32>
    %100 = math.exp %99 : vector<1x8x8xf32>
    %cst_31 = arith.constant dense<0.000000e+00> : vector<1x8xf32>
    %101 = vector.multi_reduction <add>, %100, %cst_31 [2] : vector<1x8x8xf32> to vector<1x8xf32>
    %102 = vector.shape_cast %101 : vector<1x8xf32> to vector<1x8x1xf32>
    %103 = tpu.reciprocal %102 {approx = true} : vector<1x8x1xf32> -> vector<1x8x1xf32>
    %104 = vector.broadcast %103 : vector<1x8x1xf32> to vector<1x8x8xf32>
    %105 = arith.mulf %100, %104 : vector<1x8x8xf32>
    %106 = arith.truncf %105 : vector<1x8x8xf32> to vector<1x8x8xbf16>
    %107 = vector.extract_strided_slice %44 {offsets = [0, 0, 24], sizes = [1, 8, 8], strides = [1, 1, 1]} : vector<1x8x32xbf16> to vector<1x8x8xbf16>
    "tpu.trace_start"() <{level = 10 : i32, message = "bqk,bkd->bqd"}> : () -> ()
    %cst_32 = arith.constant dense<0.000000e+00> : vector<1x8x8xf32>
    %108 = tpu.matmul %106, %107, %cst_32 {dimension_numbers = #tpu.dot_dimension_numbers<[2], [1], [1], [2], [0, 0, 0, 1, 1, 2], [0], [0]>} : vector<1x8x8xbf16>, vector<1x8x8xbf16>, vector<1x8x8xf32> -> vector<1x8x8xf32>
    "tpu.trace_stop"() : () -> ()
    %109 = tpu.concatenate %60, %76, %92, %108 in 2 : vector<1x8x8xf32>, vector<1x8x8xf32>, vector<1x8x8xf32>, vector<1x8x8xf32> -> vector<1x8x32xf32>
    %110 = vector.shape_cast %109 : vector<1x8x32xf32> to vector<8x32xf32>
    %111 = arith.truncf %110 : vector<8x32xf32> to vector<8x32xbf16>
    %c0_33 = arith.constant 0 : index
    %c0_34 = arith.constant 0 : index
    %112 = vector.load %arg6[%c0_33, %c0_34] : memref<32x32xbf16, #tpu.memory_space<vmem>>, vector<32x32xbf16>
    %cst_35 = arith.constant dense<0.000000e+00> : vector<8x32xf32>
    %113 = tpu.matmul %111, %112, %cst_35 {dimension_numbers = #tpu.dot_dimension_numbers<[1], [0], [0], [1], [0, 0, 1, 1], [], []>} : vector<8x32xbf16>, vector<32x32xbf16>, vector<8x32xf32> -> vector<8x32xf32>
    %c0_36 = arith.constant 0 : index
    %c0_37 = arith.constant 0 : index
    %114 = vector.load %arg7[%c0_36, %c0_37] : memref<1x32xf32, #tpu.memory_space<vmem>>, vector<1x32xf32>
    %115 = vector.broadcast %114 : vector<1x32xf32> to vector<8x32xf32>
    %116 = arith.addf %113, %115 : vector<8x32xf32>
    %117 = arith.addf %1, %116 : vector<8x32xf32>
    %c0_38 = arith.constant 0 : index
    %c0_39 = arith.constant 0 : index
    %118 = vector.load %arg8[%c0_38, %c0_39] : memref<1x32xf32, #tpu.memory_space<vmem>>, vector<1x32xf32>
    %c0_40 = arith.constant 0 : index
    %c0_41 = arith.constant 0 : index
    %119 = vector.load %arg9[%c0_40, %c0_41] : memref<1x32xf32, #tpu.memory_space<vmem>>, vector<1x32xf32>
    %cst_42 = arith.constant dense<0.000000e+00> : vector<8xf32>
    %120 = vector.multi_reduction <add>, %117, %cst_42 [1] : vector<8x32xf32> to vector<8xf32>
    %121 = vector.shape_cast %120 : vector<8xf32> to vector<8x1xf32>
    %cst_43 = arith.constant 3.200000e+01 : f32
    %122 = vector.broadcast %cst_43 : f32 to vector<8x1xf32>
    %123 = arith.divf %121, %122 : vector<8x1xf32>
    %124 = arith.mulf %117, %117 : vector<8x32xf32>
    %cst_44 = arith.constant dense<0.000000e+00> : vector<8xf32>
    %125 = vector.multi_reduction <add>, %124, %cst_44 [1] : vector<8x32xf32> to vector<8xf32>
    %126 = vector.shape_cast %125 : vector<8xf32> to vector<8x1xf32>
    %cst_45 = arith.constant 3.200000e+01 : f32
    %127 = vector.broadcast %cst_45 : f32 to vector<8x1xf32>
    %128 = arith.divf %126, %127 : vector<8x1xf32>
    %129 = arith.mulf %123, %123 : vector<8x1xf32>
    %130 = arith.subf %128, %129 : vector<8x1xf32>
    %cst_46 = arith.constant 0.000000e+00 : f32
    %131 = vector.broadcast %cst_46 : f32 to vector<8x1xf32>
    %132 = arith.maximumf %130, %131 : vector<8x1xf32>
    %133 = vector.broadcast %123 : vector<8x1xf32> to vector<8x32xf32>
    %134 = arith.subf %117, %133 : vector<8x32xf32>
    %cst_47 = arith.constant 9.99999974E-6 : f32
    %135 = vector.broadcast %cst_47 : f32 to vector<8x1xf32>
    %136 = arith.addf %132, %135 : vector<8x1xf32>
    %137 = math.rsqrt %136 : vector<8x1xf32>
    %138 = vector.broadcast %137 : vector<8x1xf32> to vector<8x32xf32>
    %139 = arith.mulf %134, %138 : vector<8x32xf32>
    %140 = vector.broadcast %118 : vector<1x32xf32> to vector<8x32xf32>
    %141 = arith.mulf %139, %140 : vector<8x32xf32>
    %142 = vector.broadcast %119 : vector<1x32xf32> to vector<8x32xf32>
    %143 = arith.addf %141, %142 : vector<8x32xf32>
    %144 = arith.truncf %143 : vector<8x32xf32> to vector<8x32xbf16>
    %c0_48 = arith.constant 0 : index
    %c0_49 = arith.constant 0 : index
    %145 = vector.load %arg10[%c0_48, %c0_49] : memref<32x128xbf16, #tpu.memory_space<vmem>>, vector<32x128xbf16>
    %cst_50 = arith.constant dense<0.000000e+00> : vector<8x128xf32>
    %146 = tpu.matmul %144, %145, %cst_50 {dimension_numbers = #tpu.dot_dimension_numbers<[1], [0], [0], [1], [0, 0, 1, 1], [], []>} : vector<8x32xbf16>, vector<32x128xbf16>, vector<8x128xf32> -> vector<8x128xf32>
    %c0_51 = arith.constant 0 : index
    %c0_52 = arith.constant 0 : index
    %147 = vector.load %arg11[%c0_51, %c0_52] : memref<1x128xf32, #tpu.memory_space<vmem>>, vector<1x128xf32>
    %148 = vector.broadcast %147 : vector<1x128xf32> to vector<8x128xf32>
    %149 = arith.addf %146, %148 : vector<8x128xf32>
    %cst_53 = arith.constant 5.000000e-01 : f32
    %150 = vector.broadcast %cst_53 : f32 to vector<8x128xf32>
    %151 = arith.mulf %150, %149 : vector<8x128xf32>
    %cst_54 = arith.constant 0.707106769 : f32
    %152 = vector.broadcast %cst_54 : f32 to vector<8x128xf32>
    %153 = arith.mulf %149, %152 : vector<8x128xf32>
    %154 = math.erf %153 : vector<8x128xf32>
    %cst_55 = arith.constant 1.000000e+00 : f32
    %155 = vector.broadcast %cst_55 : f32 to vector<8x128xf32>
    %156 = arith.addf %155, %154 : vector<8x128xf32>
    %157 = arith.mulf %151, %156 : vector<8x128xf32>
    %158 = arith.truncf %157 : vector<8x128xf32> to vector<8x128xbf16>
    %c0_56 = arith.constant 0 : index
    %c0_57 = arith.constant 0 : index
    %159 = vector.load %arg12[%c0_56, %c0_57] : memref<128x32xbf16, #tpu.memory_space<vmem>>, vector<128x32xbf16>
    %cst_58 = arith.constant dense<0.000000e+00> : vector<8x32xf32>
    %160 = tpu.matmul %158, %159, %cst_58 {dimension_numbers = #tpu.dot_dimension_numbers<[1], [0], [0], [1], [0, 0, 1, 1], [], []>} : vector<8x128xbf16>, vector<128x32xbf16>, vector<8x32xf32> -> vector<8x32xf32>
    %c0_59 = arith.constant 0 : index
    %c0_60 = arith.constant 0 : index
    %161 = vector.load %arg13[%c0_59, %c0_60] : memref<1x32xf32, #tpu.memory_space<vmem>>, vector<1x32xf32>
    %162 = vector.broadcast %161 : vector<1x32xf32> to vector<8x32xf32>
    %163 = arith.addf %160, %162 : vector<8x32xf32>
    %164 = arith.addf %117, %163 : vector<8x32xf32>
    %165 = vector.shape_cast %164 : vector<8x32xf32> to vector<1x8x32xf32>
    %c0_61 = arith.constant 0 : index
    %c0_62 = arith.constant 0 : index
    %c0_63 = arith.constant 0 : index
    %166 = vector.load %arg14[%c0_61, %c0_62, %c0_63] : memref<1x8x32xf32, #tpu.memory_space<vmem>>, vector<1x8x32xf32>
    tpu.vector_store %arg14[%c0_61, %c0_62, %c0_63], %165 {strides = array<i32>} : memref<1x8x32xf32, #tpu.memory_space<vmem>>, vector<1x8x32xf32>,
    return
  }
  func.func @transform_0(%arg0: i32) -> (i32, i32, i32) {
    %c0_i32 = arith.constant 0 : i32
    %c0_i32_0 = arith.constant 0 : i32
    %c0_i32_1 = arith.constant 0 : i32
    return %arg0, %c0_i32, %c0_i32_0 : i32, i32, i32
  }
  func.func @transform_1(%arg0: i32) -> (i32, i32) {
    %c0_i32 = arith.constant 0 : i32
    %c0_i32_0 = arith.constant 0 : i32
    %c0_i32_1 = arith.constant 0 : i32
    return %c0_i32, %c0_i32_0 : i32, i32
  }
  func.func @transform_2(%arg0: i32) -> (i32, i32) {
    %c0_i32 = arith.constant 0 : i32
    %c0_i32_0 = arith.constant 0 : i32
    %c0_i32_1 = arith.constant 0 : i32
    return %c0_i32, %c0_i32_0 : i32, i32
  }
  func.func @transform_3(%arg0: i32) -> (i32, i32) {
    %c0_i32 = arith.constant 0 : i32
    %c0_i32_0 = arith.constant 0 : i32
    %c0_i32_1 = arith.constant 0 : i32
    return %c0_i32, %c0_i32_0 : i32, i32
  }
  func.func @transform_4(%arg0: i32) -> (i32, i32) {
    %c0_i32 = arith.constant 0 : i32
    %c0_i32_0 = arith.constant 0 : i32
    %c0_i32_1 = arith.constant 0 : i32
    return %c0_i32, %c0_i32_0 : i32, i32
  }
  func.func @transform_5(%arg0: i32) -> (i32, i32) {
    %c0_i32 = arith.constant 0 : i32
    %c0_i32_0 = arith.constant 0 : i32
    %c0_i32_1 = arith.constant 0 : i32
    return %c0_i32, %c0_i32_0 : i32, i32
  }
  func.func @transform_6(%arg0: i32) -> (i32, i32) {
    %c0_i32 = arith.constant 0 : i32
    %c0_i32_0 = arith.constant 0 : i32
    %c0_i32_1 = arith.constant 0 : i32
    return %c0_i32, %c0_i32_0 : i32, i32
  }
  func.func @transform_7(%arg0: i32) -> (i32, i32) {
    %c0_i32 = arith.constant 0 : i32
    %c0_i32_0 = arith.constant 0 : i32
    %c0_i32_1 = arith.constant 0 : i32
    return %c0_i32, %c0_i32_0 : i32, i32
  }
  func.func @transform_8(%arg0: i32) -> (i32, i32) {
    %c0_i32 = arith.constant 0 : i32
    %c0_i32_0 = arith.constant 0 : i32
    %c0_i32_1 = arith.constant 0 : i32
    return %c0_i32, %c0_i32_0 : i32, i32
  }
  func.func @transform_9(%arg0: i32) -> (i32, i32) {
    %c0_i32 = arith.constant 0 : i32
    %c0_i32_0 = arith.constant 0 : i32
    %c0_i32_1 = arith.constant 0 : i32
    return %c0_i32, %c0_i32_0 : i32, i32
  }
  func.func @transform_10(%arg0: i32) -> (i32, i32) {
    %c0_i32 = arith.constant 0 : i32
    %c0_i32_0 = arith.constant 0 : i32
    %c0_i32_1 = arith.constant 0 : i32
    return %c0_i32, %c0_i32_0 : i32, i32
  }
  func.func @transform_11(%arg0: i32) -> (i32, i32) {
    %c0_i32 = arith.constant 0 : i32
    %c0_i32_0 = arith.constant 0 : i32
    %c0_i32_1 = arith.constant 0 : i32
    return %c0_i32, %c0_i32_0 : i32, i32
  }
  func.func @transform_12(%arg0: i32) -> (i32, i32) {
    %c0_i32 = arith.constant 0 : i32
    %c0_i32_0 = arith.constant 0 : i32
    %c0_i32_1 = arith.constant 0 : i32
    return %c0_i32, %c0_i32_0 : i32, i32
  }
  func.func @transform_13(%arg0: i32) -> (i32, i32, i32) {
    %c0_i32 = arith.constant 0 : i32
    %c0_i32_0 = arith.constant 0 : i32
    %c0_i32_1 = arith.constant 0 : i32
    return %arg0, %c0_i32, %c0_i32_0 : i32, i32, i32
  }
}

module attributes {stable_mosaic.version = 11 : i64} {
  func.func @_transformer_block_kernel(%arg0: i32, %arg1: memref<1x8x32xf32, #tpu.memory_space<vmem>>, %arg2: memref<1x32xf32, #tpu.memory_space<vmem>>, %arg3: memref<1x32xf32, #tpu.memory_space<vmem>>, %arg4: memref<32x96xbf16, #tpu.memory_space<vmem>>, %arg5: memref<1x96xf32, #tpu.memory_space<vmem>>, %arg6: memref<32x32xbf16, #tpu.memory_space<vmem>>, %arg7: memref<1x32xf32, #tpu.memory_space<vmem>>, %arg8: memref<1x32xf32, #tpu.memory_space<vmem>>, %arg9: memref<1x32xf32, #tpu.memory_space<vmem>>, %arg10: memref<32x128xbf16, #tpu.memory_space<vmem>>, %arg11: memref<1x128xf32, #tpu.memory_space<vmem>>, %arg12: memref<128x32xbf16, #tpu.memory_space<vmem>>, %arg13: memref<1x32xf32, #tpu.memory_space<vmem>>, %arg14: memref<1x8x32xf32, #tpu.memory_space<vmem>>) attributes {dimension_semantics = [#tpu.dimension_semantics<parallel>], iteration_bounds = array<i64: 2>, scalar_prefetch = 0 : i64, scratch_operands = 0 : i64, tpu.core_type = #tpu.core_type<tc>, window_params = [{transform_indices = @transform_0, window_bounds = array<i64: 1, 8, 32>}, {pipeline_mode = #tpu.pipeline_mode<synchronous>, transform_indices = @transform_1, window_bounds = array<i64: 1, 32>}, {pipeline_mode = #tpu.pipeline_mode<synchronous>, transform_indices = @transform_2, window_bounds = array<i64: 1, 32>}, {pipeline_mode = #tpu.pipeline_mode<synchronous>, transform_indices = @transform_3, window_bounds = array<i64: 32, 96>}, {pipeline_mode = #tpu.pipeline_mode<synchronous>, transform_indices = @transform_4, window_bounds = array<i64: 1, 96>}, {pipeline_mode = #tpu.pipeline_mode<synchronous>, transform_indices = @transform_5, window_bounds = array<i64: 32, 32>}, {pipeline_mode = #tpu.pipeline_mode<synchronous>, transform_indices = @transform_6, window_bounds = array<i64: 1, 32>}, {pipeline_mode = #tpu.pipeline_mode<synchronous>, transform_indices = @transform_7, window_bounds = array<i64: 1, 32>}, {pipeline_mode = #tpu.pipeline_mode<synchronous>, transform_indices = @transform_8, window_bounds = array<i64: 1, 32>}, {pipeline_mode = #tpu.pipeline_mode<synchronous>, transform_indices = @transform_9, window_bounds = array<i64: 32, 128>}, {pipeline_mode = #tpu.pipeline_mode<synchronous>, transform_indices = @transform_10, window_bounds = array<i64: 1, 128>}, {pipeline_mode = #tpu.pipeline_mode<synchronous>, transform_indices = @transform_11, window_bounds = array<i64: 128, 32>}, {pipeline_mode = #tpu.pipeline_mode<synchronous>, transform_indices = @transform_12, window_bounds = array<i64: 1, 32>}, {transform_indices = @transform_13, window_bounds = array<i64: 1, 8, 32>}]} {
    %c0 = arith.constant 0 : index
    %c0_0 = arith.constant 0 : index
    %c0_1 = arith.constant 0 : index
    %0 = vector.load %arg1[%c0, %c0_0, %c0_1] : memref<1x8x32xf32, #tpu.memory_space<vmem>>, vector<1x8x32xf32>
    %1 = vector.shape_cast %0 : vector<1x8x32xf32> to vector<8x32xf32>
    %c0_2 = arith.constant 0 : index
    %c0_3 = arith.constant 0 : index
    %2 = vector.load %arg2[%c0_2, %c0_3] : memref<1x32xf32, #tpu.memory_space<vmem>>, vector<1x32xf32>
    %c0_4 = arith.constant 0 : index
    %c0_5 = arith.constant 0 : index
    %3 = vector.load %arg3[%c0_4, %c0_5] : memref<1x32xf32, #tpu.memory_space<vmem>>, vector<1x32xf32>
    %cst = arith.constant dense<0.000000e+00> : vector<8xf32>
    %4 = vector.multi_reduction <add>, %1, %cst [1] : vector<8x32xf32> to vector<8xf32>
    %5 = vector.shape_cast %4 : vector<8xf32> to vector<8x1xf32>
    %cst_6 = arith.constant 3.200000e+01 : f32
    %6 = vector.broadcast %cst_6 : f32 to vector<8x1xf32>
    %7 = arith.divf %5, %6 : vector<8x1xf32>
    %8 = arith.mulf %1, %1 : vector<8x32xf32>
    %cst_7 = arith.constant dense<0.000000e+00> : vector<8xf32>
    %9 = vector.multi_reduction <add>, %8, %cst_7 [1] : vector<8x32xf32> to vector<8xf32>
    %10 = vector.shape_cast %9 : vector<8xf32> to vector<8x1xf32>
    %cst_8 = arith.constant 3.200000e+01 : f32
    %11 = vector.broadcast %cst_8 : f32 to vector<8x1xf32>
    %12 = arith.divf %10, %11 : vector<8x1xf32>
    %13 = arith.mulf %7, %7 : vector<8x1xf32>
    %14 = arith.subf %12, %13 : vector<8x1xf32>
    %cst_9 = arith.constant 0.000000e+00 : f32
    %15 = vector.broadcast %cst_9 : f32 to vector<8x1xf32>
    %16 = arith.maximumf %14, %15 : vector<8x1xf32>
    %17 = vector.broadcast %7 : vector<8x1xf32> to vector<8x32xf32>
    %18 = arith.subf %1, %17 : vector<8x32xf32>
    %cst_10 = arith.constant 9.99999974E-6 : f32
    %19 = vector.broadcast %cst_10 : f32 to vector<8x1xf32>
    %20 = arith.addf %16, %19 : vector<8x1xf32>
    %21 = math.rsqrt %20 : vector<8x1xf32>
    %22 = vector.broadcast %21 : vector<8x1xf32> to vector<8x32xf32>
    %23 = arith.mulf %18, %22 : vector<8x32xf32>
    %24 = vector.broadcast %2 : vector<1x32xf32> to vector<8x32xf32>
    %25 = arith.mulf %23, %24 : vector<8x32xf32>
    %26 = vector.broadcast %3 : vector<1x32xf32> to vector<8x32xf32>
    %27 = arith.addf %25, %26 : vector<8x32xf32>
    %28 = arith.truncf %27 : vector<8x32xf32> to vector<8x32xbf16>
    %c0_11 = arith.constant 0 : index
    %c0_12 = arith.constant 0 : index
    %29 = vector.load %arg4[%c0_11, %c0_12] : memref<32x96xbf16, #tpu.memory_space<vmem>>, vector<32x96xbf16>
    %cst_13 = arith.constant dense<0.000000e+00> : vector<8x96xf32>
    %30 = tpu.matmul %28, %29, %cst_13 {dimension_numbers = #tpu.dot_dimension_numbers<[1], [0], [0], [1], [0, 0, 1, 1], [], []>} : vector<8x32xbf16>, vector<32x96xbf16>, vector<8x96xf32> -> vector<8x96xf32>
    %c0_14 = arith.constant 0 : index
    %c0_15 = arith.constant 0 : index
    %31 = vector.load %arg5[%c0_14, %c0_15] : memref<1x96xf32, #tpu.memory_space<vmem>>, vector<1x96xf32>
    %32 = vector.broadcast %31 : vector<1x96xf32> to vector<8x96xf32>
    %33 = arith.addf %30, %32 : vector<8x96xf32>
    %34 = vector.extract_strided_slice %33 {offsets = [0, 0], sizes = [8, 32], strides = [1, 1]} : vector<8x96xf32> to vector<8x32xf32>
    %cst_16 = arith.constant 0.353553385 : f32
    %35 = vector.broadcast %cst_16 : f32 to vector<8x32xf32>
    %36 = arith.mulf %34, %35 : vector<8x32xf32>
    %37 = vector.extract_strided_slice %33 {offsets = [0, 32], sizes = [8, 32], strides = [1, 1]} : vector<8x96xf32> to vector<8x32xf32>
    %38 = vector.extract_strided_slice %33 {offsets = [0, 64], sizes = [8, 32], strides = [1, 1]} : vector<8x96xf32> to vector<8x32xf32>
    %39 = arith.truncf %36 : vector<8x32xf32> to vector<8x32xbf16>
    %40 = vector.shape_cast %39 : vector<8x32xbf16> to vector<1x8x32xbf16>
    %41 = arith.truncf %37 : vector<8x32xf32> to vector<8x32xbf16>
    %42 = vector.shape_cast %41 : vector<8x32xbf16> to vector<1x8x32xbf16>
    %43 = arith.truncf %38 : vector<8x32xf32> to vector<8x32xbf16>
    %44 = vector.shape_cast %43 : vector<8x32xbf16> to vector<1x8x32xbf16>
    %45 = vector.extract_strided_slice %40 {offsets = [0, 0, 0], sizes = [1, 8, 8], strides = [1, 1, 1]} : vector<1x8x32xbf16> to vector<1x8x8xbf16>
    %46 = vector.extract_strided_slice %42 {offsets = [0, 0, 0], sizes = [1, 8, 8], strides = [1, 1, 1]} : vector<1x8x32xbf16> to vector<1x8x8xbf16>
    "tpu.trace_start"() <{level = 10 : i32, message = "bqd,bkd->bqk"}> : () -> ()
    %cst_17 = arith.constant dense<0.000000e+00> : vector<1x8x8xf32>
    %47 = tpu.matmul %45, %46, %cst_17 {dimension_numbers = #tpu.dot_dimension_numbers<[2], [2], [1], [1], [0, 0, 0, 1, 1, 1], [0], [0]>} : vector<1x8x8xbf16>, vector<1x8x8xbf16>, vector<1x8x8xf32> -> vector<1x8x8xf32>
    "tpu.trace_stop"() : () -> ()
    %cst_18 = arith.constant dense<0xFF800000> : vector<1x8xf32>
    %48 = vector.multi_reduction <maximumf>, %47, %cst_18 [2] : vector<1x8x8xf32> to vector<1x8xf32>
    %49 = vector.shape_cast %48 : vector<1x8xf32> to vector<1x8x1xf32>
    %50 = vector.broadcast %49 : vector<1x8x1xf32> to vector<1x8x8xf32>
    %51 = arith.subf %47, %50 : vector<1x8x8xf32>
    %52 = math.exp %51 : vector<1x8x8xf32>
    %cst_19 = arith.constant dense<0.000000e+00> : vector<1x8xf32>
    %53 = vector.multi_reduction <add>, %52, %cst_19 [2] : vector<1x8x8xf32> to vector<1x8xf32>
    %54 = vector.shape_cast %53 : vector<1x8xf32> to vector<1x8x1xf32>
    %55 = tpu.reciprocal %54 {approx = true} : vector<1x8x1xf32> -> vector<1x8x1xf32>
    %56 = vector.broadcast %55 : vector<1x8x1xf32> to vector<1x8x8xf32>
    %57 = arith.mulf %52, %56 : vector<1x8x8xf32>
    %58 = arith.truncf %57 : vector<1x8x8xf32> to vector<1x8x8xbf16>
    %59 = vector.extract_strided_slice %44 {offsets = [0, 0, 0], sizes = [1, 8, 8], strides = [1, 1, 1]} : vector<1x8x32xbf16> to vector<1x8x8xbf16>
    "tpu.trace_start"() <{level = 10 : i32, message = "bqk,bkd->bqd"}> : () -> ()
    %cst_20 = arith.constant dense<0.000000e+00> : vector<1x8x8xf32>
    %60 = tpu.matmul %58, %59, %cst_20 {dimension_numbers = #tpu.dot_dimension_numbers<[2], [1], [1], [2], [0, 0, 0, 1, 1, 2], [0], [0]>} : vector<1x8x8xbf16>, vector<1x8x8xbf16>, vector<1x8x8xf32> -> vector<1x8x8xf32>
    "tpu.trace_stop"() : () -> ()
    %61 = vector.extract_strided_slice %40 {offsets = [0, 0, 8], sizes = [1, 8, 8], strides = [1, 1, 1]} : vector<1x8x32xbf16> to vector<1x8x8xbf16>
    %62 = vector.extract_strided_slice %42 {offsets = [0, 0, 8], sizes = [1, 8, 8], strides = [1, 1, 1]} : vector<1x8x32xbf16> to vector<1x8x8xbf16>
    "tpu.trace_start"() <{level = 10 : i32, message = "bqd,bkd->bqk"}> : () -> ()
    %cst_21 = arith.constant dense<0.000000e+00> : vector<1x8x8xf32>
    %63 = tpu.matmul %61, %62, %cst_21 {dimension_numbers = #tpu.dot_dimension_numbers<[2], [2], [1], [1], [0, 0, 0, 1, 1, 1], [0], [0]>} : vector<1x8x8xbf16>, vector<1x8x8xbf16>, vector<1x8x8xf32> -> vector<1x8x8xf32>
    "tpu.trace_stop"() : () -> ()
    %cst_22 = arith.constant dense<0xFF800000> : vector<1x8xf32>
    %64 = vector.multi_reduction <maximumf>, %63, %cst_22 [2] : vector<1x8x8xf32> to vector<1x8xf32>
    %65 = vector.shape_cast %64 : vector<1x8xf32> to vector<1x8x1xf32>
    %66 = vector.broadcast %65 : vector<1x8x1xf32> to vector<1x8x8xf32>
    %67 = arith.subf %63, %66 : vector<1x8x8xf32>
    %68 = math.exp %67 : vector<1x8x8xf32>
    %cst_23 = arith.constant dense<0.000000e+00> : vector<1x8xf32>
    %69 = vector.multi_reduction <add>, %68, %cst_23 [2] : vector<1x8x8xf32> to vector<1x8xf32>
    %70 = vector.shape_cast %69 : vector<1x8xf32> to vector<1x8x1xf32>
    %71 = tpu.reciprocal %70 {approx = true} : vector<1x8x1xf32> -> vector<1x8x1xf32>
    %72 = vector.broadcast %71 : vector<1x8x1xf32> to vector<1x8x8xf32>
    %73 = arith.mulf %68, %72 : vector<1x8x8xf32>
    %74 = arith.truncf %73 : vector<1x8x8xf32> to vector<1x8x8xbf16>
    %75 = vector.extract_strided_slice %44 {offsets = [0, 0, 8], sizes = [1, 8, 8], strides = [1, 1, 1]} : vector<1x8x32xbf16> to vector<1x8x8xbf16>
    "tpu.trace_start"() <{level = 10 : i32, message = "bqk,bkd->bqd"}> : () -> ()
    %cst_24 = arith.constant dense<0.000000e+00> : vector<1x8x8xf32>
    %76 = tpu.matmul %74, %75, %cst_24 {dimension_numbers = #tpu.dot_dimension_numbers<[2], [1], [1], [2], [0, 0, 0, 1, 1, 2], [0], [0]>} : vector<1x8x8xbf16>, vector<1x8x8xbf16>, vector<1x8x8xf32> -> vector<1x8x8xf32>
    "tpu.trace_stop"() : () -> ()
    %77 = vector.extract_strided_slice %40 {offsets = [0, 0, 16], sizes = [1, 8, 8], strides = [1, 1, 1]} : vector<1x8x32xbf16> to vector<1x8x8xbf16>
    %78 = vector.extract_strided_slice %42 {offsets = [0, 0, 16], sizes = [1, 8, 8], strides = [1, 1, 1]} : vector<1x8x32xbf16> to vector<1x8x8xbf16>
    "tpu.trace_start"() <{level = 10 : i32, message = "bqd,bkd->bqk"}> : () -> ()
    %cst_25 = arith.constant dense<0.000000e+00> : vector<1x8x8xf32>
    %79 = tpu.matmul %77, %78, %cst_25 {dimension_numbers = #tpu.dot_dimension_numbers<[2], [2], [1], [1], [0, 0, 0, 1, 1, 1], [0], [0]>} : vector<1x8x8xbf16>, vector<1x8x8xbf16>, vector<1x8x8xf32> -> vector<1x8x8xf32>
    "tpu.trace_stop"() : () -> ()
    %cst_26 = arith.constant dense<0xFF800000> : vector<1x8xf32>
    %80 = vector.multi_reduction <maximumf>, %79, %cst_26 [2] : vector<1x8x8xf32> to vector<1x8xf32>
    %81 = vector.shape_cast %80 : vector<1x8xf32> to vector<1x8x1xf32>
    %82 = vector.broadcast %81 : vector<1x8x1xf32> to vector<1x8x8xf32>
    %83 = arith.subf %79, %82 : vector<1x8x8xf32>
    %84 = math.exp %83 : vector<1x8x8xf32>
    %cst_27 = arith.constant dense<0.000000e+00> : vector<1x8xf32>
    %85 = vector.multi_reduction <add>, %84, %cst_27 [2] : vector<1x8x8xf32> to vector<1x8xf32>
    %86 = vector.shape_cast %85 : vector<1x8xf32> to vector<1x8x1xf32>
    %87 = tpu.reciprocal %86 {approx = true} : vector<1x8x1xf32> -> vector<1x8x1xf32>
    %88 = vector.broadcast %87 : vector<1x8x1xf32> to vector<1x8x8xf32>
    %89 = arith.mulf %84, %88 : vector<1x8x8xf32>
    %90 = arith.truncf %89 : vector<1x8x8xf32> to vector<1x8x8xbf16>
    %91 = vector.extract_strided_slice %44 {offsets = [0, 0, 16], sizes = [1, 8, 8], strides = [1, 1, 1]} : vector<1x8x32xbf16> to vector<1x8x8xbf16>
    "tpu.trace_start"() <{level = 10 : i32, message = "bqk,bkd->bqd"}> : () -> ()
    %cst_28 = arith.constant dense<0.000000e+00> : vector<1x8x8xf32>
    %92 = tpu.matmul %90, %91, %cst_28 {dimension_numbers = #tpu.dot_dimension_numbers<[2], [1], [1], [2], [0, 0, 0, 1, 1, 2], [0], [0]>} : vector<1x8x8xbf16>, vector<1x8x8xbf16>, vector<1x8x8xf32> -> vector<1x8x8xf32>
    "tpu.trace_stop"() : () -> ()
    %93 = vector.extract_strided_slice %40 {offsets = [0, 0, 24], sizes = [1, 8, 8], strides = [1, 1, 1]} : vector<1x8x32xbf16> to vector<1x8x8xbf16>
    %94 = vector.extract_strided_slice %42 {offsets = [0, 0, 24], sizes = [1, 8, 8], strides = [1, 1, 1]} : vector<1x8x32xbf16> to vector<1x8x8xbf16>
    "tpu.trace_start"() <{level = 10 : i32, message = "bqd,bkd->bqk"}> : () -> ()
    %cst_29 = arith.constant dense<0.000000e+00> : vector<1x8x8xf32>
    %95 = tpu.matmul %93, %94, %cst_29 {dimension_numbers = #tpu.dot_dimension_numbers<[2], [2], [1], [1], [0, 0, 0, 1, 1, 1], [0], [0]>} : vector<1x8x8xbf16>, vector<1x8x8xbf16>, vector<1x8x8xf32> -> vector<1x8x8xf32>
    "tpu.trace_stop"() : () -> ()
    %cst_30 = arith.constant dense<0xFF800000> : vector<1x8xf32>
    %96 = vector.multi_reduction <maximumf>, %95, %cst_30 [2] : vector<1x8x8xf32> to vector<1x8xf32>
    %97 = vector.shape_cast %96 : vector<1x8xf32> to vector<1x8x1xf32>
    %98 = vector.broadcast %97 : vector<1x8x1xf32> to vector<1x8x8xf32>
    %99 = arith.subf %95, %98 : vector<1x8x8xf32>
    %100 = math.exp %99 : vector<1x8x8xf32>
    %cst_31 = arith.constant dense<0.000000e+00> : vector<1x8xf32>
    %101 = vector.multi_reduction <add>, %100, %cst_31 [2] : vector<1x8x8xf32> to vector<1x8xf32>
    %102 = vector.shape_cast %101 : vector<1x8xf32> to vector<1x8x1xf32>
    %103 = tpu.reciprocal %102 {approx = true} : vector<1x8x1xf32> -> vector<1x8x1xf32>
    %104 = vector.broadcast %103 : vector<1x8x1xf32> to vector<1x8x8xf32>
    %105 = arith.mulf %100, %104 : vector<1x8x8xf32>
    %106 = arith.truncf %105 : vector<1x8x8xf32> to vector<1x8x8xbf16>
    %107 = vector.extract_strided_slice %44 {offsets = [0, 0, 24], sizes = [1, 8, 8], strides = [1, 1, 1]} : vector<1x8x32xbf16> to vector<1x8x8xbf16>
    "tpu.trace_start"() <{level = 10 : i32, message = "bqk,bkd->bqd"}> : () -> ()
    %cst_32 = arith.constant dense<0.000000e+00> : vector<1x8x8xf32>
    %108 = tpu.matmul %106, %107, %cst_32 {dimension_numbers = #tpu.dot_dimension_numbers<[2], [1], [1], [2], [0, 0, 0, 1, 1, 2], [0], [0]>} : vector<1x8x8xbf16>, vector<1x8x8xbf16>, vector<1x8x8xf32> -> vector<1x8x8xf32>
    "tpu.trace_stop"() : () -> ()
    %109 = tpu.concatenate %60, %76, %92, %108 in 2 : vector<1x8x8xf32>, vector<1x8x8xf32>, vector<1x8x8xf32>, vector<1x8x8xf32> -> vector<1x8x32xf32>
    %110 = vector.shape_cast %109 : vector<1x8x32xf32> to vector<8x32xf32>
    %111 = arith.truncf %110 : vector<8x32xf32> to vector<8x32xbf16>
    %c0_33 = arith.constant 0 : index
    %c0_34 = arith.constant 0 : index
    %112 = vector.load %arg6[%c0_33, %c0_34] : memref<32x32xbf16, #tpu.memory_space<vmem>>, vector<32x32xbf16>
    %cst_35 = arith.constant dense<0.000000e+00> : vector<8x32xf32>
    %113 = tpu.matmul %111, %112, %cst_35 {dimension_numbers = #tpu.dot_dimension_numbers<[1], [0], [0], [1], [0, 0, 1, 1], [], []>} : vector<8x32xbf16>, vector<32x32xbf16>, vector<8x32xf32> -> vector<8x32xf32>
    %c0_36 = arith.constant 0 : index
    %c0_37 = arith.constant 0 : index
    %114 = vector.load %arg7[%c0_36, %c0_37] : memref<1x32xf32, #tpu.memory_space<vmem>>, vector<1x32xf32>
    %115 = vector.broadcast %114 : vector<1x32xf32> to vector<8x32xf32>
    %116 = arith.addf %113, %115 : vector<8x32xf32>
    %117 = arith.addf %1, %116 : vector<8x32xf32>
    %c0_38 = arith.constant 0 : index
    %c0_39 = arith.constant 0 : index
    %118 = vector.load %arg8[%c0_38, %c0_39] : memref<1x32xf32, #tpu.memory_space<vmem>>, vector<1x32xf32>
    %c0_40 = arith.constant 0 : index
    %c0_41 = arith.constant 0 : index
    %119 = vector.load %arg9[%c0_40, %c0_41] : memref<1x32xf32, #tpu.memory_space<vmem>>, vector<1x32xf32>
    %cst_42 = arith.constant dense<0.000000e+00> : vector<8xf32>
    %120 = vector.multi_reduction <add>, %117, %cst_42 [1] : vector<8x32xf32> to vector<8xf32>
    %121 = vector.shape_cast %120 : vector<8xf32> to vector<8x1xf32>
    %cst_43 = arith.constant 3.200000e+01 : f32
    %122 = vector.broadcast %cst_43 : f32 to vector<8x1xf32>
    %123 = arith.divf %121, %122 : vector<8x1xf32>
    %124 = arith.mulf %117, %117 : vector<8x32xf32>
    %cst_44 = arith.constant dense<0.000000e+00> : vector<8xf32>
    %125 = vector.multi_reduction <add>, %124, %cst_44 [1] : vector<8x32xf32> to vector<8xf32>
    %126 = vector.shape_cast %125 : vector<8xf32> to vector<8x1xf32>
    %cst_45 = arith.constant 3.200000e+01 : f32
    %127 = vector.broadcast %cst_45 : f32 to vector<8x1xf32>
    %128 = arith.divf %126, %127 : vector<8x1xf32>
    %129 = arith.mulf %123, %123 : vector<8x1xf32>
    %130 = arith.subf %128, %129 : vector<8x1xf32>
    %cst_46 = arith.constant 0.000000e+00 : f32
    %131 = vector.broadcast %cst_46 : f32 to vector<8x1xf32>
    %132 = arith.maximumf %130, %131 : vector<8x1xf32>
    %133 = vector.broadcast %123 : vector<8x1xf32> to vector<8x32xf32>
    %134 = arith.subf %117, %133 : vector<8x32xf32>
    %cst_47 = arith.constant 9.99999974E-6 : f32
    %135 = vector.broadcast %cst_47 : f32 to vector<8x1xf32>
    %136 = arith.addf %132, %135 : vector<8x1xf32>
    %137 = math.rsqrt %136 : vector<8x1xf32>
    %138 = vector.broadcast %137 : vector<8x1xf32> to vector<8x32xf32>
    %139 = arith.mulf %134, %138 : vector<8x32xf32>
    %140 = vector.broadcast %118 : vector<1x32xf32> to vector<8x32xf32>
    %141 = arith.mulf %139, %140 : vector<8x32xf32>
    %142 = vector.broadcast %119 : vector<1x32xf32> to vector<8x32xf32>
    %143 = arith.addf %141, %142 : vector<8x32xf32>
    %144 = arith.truncf %143 : vector<8x32xf32> to vector<8x32xbf16>
    %c0_48 = arith.constant 0 : index
    %c0_49 = arith.constant 0 : index
    %145 = vector.load %arg10[%c0_48, %c0_49] : memref<32x128xbf16, #tpu.memory_space<vmem>>, vector<32x128xbf16>
    %cst_50 = arith.constant dense<0.000000e+00> : vector<8x128xf32>
    %146 = tpu.matmul %144, %145, %cst_50 {dimension_numbers = #tpu.dot_dimension_numbers<[1], [0], [0], [1], [0, 0, 1, 1], [], []>} : vector<8x32xbf16>, vector<32x128xbf16>, vector<8x128xf32> -> vector<8x128xf32>
    %c0_51 = arith.constant 0 : index
    %c0_52 = arith.constant 0 : index
    %147 = vector.load %arg11[%c0_51, %c0_52] : memref<1x128xf32, #tpu.memory_space<vmem>>, vector<1x128xf32>
    %148 = vector.broadcast %147 : vector<1x128xf32> to vector<8x128xf32>
    %149 = arith.addf %146, %148 : vector<8x128xf32>
    %cst_53 = arith.constant 5.000000e-01 : f32
    %150 = vector.broadcast %cst_53 : f32 to vector<8x128xf32>
    %151 = arith.mulf %150, %149 : vector<8x128xf32>
    %cst_54 = arith.constant 0.707106769 : f32
    %152 = vector.broadcast %cst_54 : f32 to vector<8x128xf32>
    %153 = arith.mulf %149, %152 : vector<8x128xf32>
    %154 = math.erf %153 : vector<8x128xf32>
    %cst_55 = arith.constant 1.000000e+00 : f32
    %155 = vector.broadcast %cst_55 : f32 to vector<8x128xf32>
    %156 = arith.addf %155, %154 : vector<8x128xf32>
    %157 = arith.mulf %151, %156 : vector<8x128xf32>
    %158 = arith.truncf %157 : vector<8x128xf32> to vector<8x128xbf16>
    %c0_56 = arith.constant 0 : index
    %c0_57 = arith.constant 0 : index
    %159 = vector.load %arg12[%c0_56, %c0_57] : memref<128x32xbf16, #tpu.memory_space<vmem>>, vector<128x32xbf16>
    %cst_58 = arith.constant dense<0.000000e+00> : vector<8x32xf32>
    %160 = tpu.matmul %158, %159, %cst_58 {dimension_numbers = #tpu.dot_dimension_numbers<[1], [0], [0], [1], [0, 0, 1, 1], [], []>} : vector<8x128xbf16>, vector<128x32xbf16>, vector<8x32xf32> -> vector<8x32xf32>
    %c0_59 = arith.constant 0 : index
    %c0_60 = arith.constant 0 : index
    %161 = vector.load %arg13[%c0_59, %c0_60] : memref<1x32xf32, #tpu.memory_space<vmem>>, vector<1x32xf32>
    %162 = vector.broadcast %161 : vector<1x32xf32> to vector<8x32xf32>
    %163 = arith.addf %160, %162 : vector<8x32xf32>
    %164 = arith.addf %117, %163 : vector<8x32xf32>
    %165 = vector.shape_cast %164 : vector<8x32xf32> to vector<1x8x32xf32>
    %c0_61 = arith.constant 0 : index
    %c0_62 = arith.constant 0 : index
    %c0_63 = arith.constant 0 : index
    %166 = vector.load %arg14[%c0_61, %c0_62, %c0_63] : memref<1x8x32xf32, #tpu.memory_space<vmem>>, vector<1x8x32xf32>
    tpu.vector_store %arg14[%c0_61, %c0_62, %c0_63], %165 {strides = array<i32>} : memref<1x8x32xf32, #tpu.memory_space<vmem>>, vector<1x8x32xf32>,
    return
  }
  func.func @transform_0(%arg0: i32) -> (i32, i32, i32) {
    %c0_i32 = arith.constant 0 : i32
    %c0_i32_0 = arith.constant 0 : i32
    %c0_i32_1 = arith.constant 0 : i32
    return %arg0, %c0_i32, %c0_i32_0 : i32, i32, i32
  }
  func.func @transform_1(%arg0: i32) -> (i32, i32) {
    %c0_i32 = arith.constant 0 : i32
    %c0_i32_0 = arith.constant 0 : i32
    %c0_i32_1 = arith.constant 0 : i32
    return %c0_i32, %c0_i32_0 : i32, i32
  }
  func.func @transform_2(%arg0: i32) -> (i32, i32) {
    %c0_i32 = arith.constant 0 : i32
    %c0_i32_0 = arith.constant 0 : i32
    %c0_i32_1 = arith.constant 0 : i32
    return %c0_i32, %c0_i32_0 : i32, i32
  }
  func.func @transform_3(%arg0: i32) -> (i32, i32) {
    %c0_i32 = arith.constant 0 : i32
    %c0_i32_0 = arith.constant 0 : i32
    %c0_i32_1 = arith.constant 0 : i32
    return %c0_i32, %c0_i32_0 : i32, i32
  }
  func.func @transform_4(%arg0: i32) -> (i32, i32) {
    %c0_i32 = arith.constant 0 : i32
    %c0_i32_0 = arith.constant 0 : i32
    %c0_i32_1 = arith.constant 0 : i32
    return %c0_i32, %c0_i32_0 : i32, i32
  }
  func.func @transform_5(%arg0: i32) -> (i32, i32) {
    %c0_i32 = arith.constant 0 : i32
    %c0_i32_0 = arith.constant 0 : i32
    %c0_i32_1 = arith.constant 0 : i32
    return %c0_i32, %c0_i32_0 : i32, i32
  }
  func.func @transform_6(%arg0: i32) -> (i32, i32) {
    %c0_i32 = arith.constant 0 : i32
    %c0_i32_0 = arith.constant 0 : i32
    %c0_i32_1 = arith.constant 0 : i32
    return %c0_i32, %c0_i32_0 : i32, i32
  }
  func.func @transform_7(%arg0: i32) -> (i32, i32) {
    %c0_i32 = arith.constant 0 : i32
    %c0_i32_0 = arith.constant 0 : i32
    %c0_i32_1 = arith.constant 0 : i32
    return %c0_i32, %c0_i32_0 : i32, i32
  }
  func.func @transform_8(%arg0: i32) -> (i32, i32) {
    %c0_i32 = arith.constant 0 : i32
    %c0_i32_0 = arith.constant 0 : i32
    %c0_i32_1 = arith.constant 0 : i32
    return %c0_i32, %c0_i32_0 : i32, i32
  }
  func.func @transform_9(%arg0: i32) -> (i32, i32) {
    %c0_i32 = arith.constant 0 : i32
    %c0_i32_0 = arith.constant 0 : i32
    %c0_i32_1 = arith.constant 0 : i32
    return %c0_i32, %c0_i32_0 : i32, i32
  }
  func.func @transform_10(%arg0: i32) -> (i32, i32) {
    %c0_i32 = arith.constant 0 : i32
    %c0_i32_0 = arith.constant 0 : i32
    %c0_i32_1 = arith.constant 0 : i32
    return %c0_i32, %c0_i32_0 : i32, i32
  }
  func.func @transform_11(%arg0: i32) -> (i32, i32) {
    %c0_i32 = arith.constant 0 : i32
    %c0_i32_0 = arith.constant 0 : i32
    %c0_i32_1 = arith.constant 0 : i32
    return %c0_i32, %c0_i32_0 : i32, i32
  }
  func.func @transform_12(%arg0: i32) -> (i32, i32) {
    %c0_i32 = arith.constant 0 : i32
    %c0_i32_0 = arith.constant 0 : i32
    %c0_i32_1 = arith.constant 0 : i32
    return %c0_i32, %c0_i32_0 : i32, i32
  }
  func.func @transform_13(%arg0: i32) -> (i32, i32, i32) {
    %c0_i32 = arith.constant 0 : i32
    %c0_i32_0 = arith.constant 0 : i32
    %c0_i32_1 = arith.constant 0 : i32
    return %arg0, %c0_i32, %c0_i32_0 : i32, i32, i32
  }
}

</mosaic_0001>

<bundles_post_ra>
// kernel: tpu_custom_call.1
= control target key start
LH: loop header
LB: loop body
LE: loop exit
PB: predicated region body
PF: predicated region fallthrough
CT: control target
= control target key end

     0   :  { %s2795_s0 = inlined_call_operand.vmem [shape: f32[2,8,32], index: 0, kind: input, shape index: {}]   ;;  %s2796_s1 = inlined_call_operand.vmem [shape: f32[1,32], index: 1, kind: input, shape index: {}]   ;;  %s2797_s2 = inlined_call_operand.vmem [shape: f32[1,32], index: 2, kind: input, shape index: {}]   ;;  %s2798_s3 = inlined_call_operand.vmem [shape: bf16[32,96], index: 3, kind: input, shape index: {}]   ;;  %s2799_s4 = inlined_call_operand.vmem [shape: f32[1,96], index: 4, kind: input, shape index: {}]   ;;  %s2800_s5 = inlined_call_operand.vmem [shape: bf16[32,32], index: 5, kind: input, shape index: {}]   ;;  %s2801_s6 = inlined_call_operand.vmem [shape: f32[1,32], index: 6, kind: input, shape index: {}]   ;;  %s2802_s7 = inlined_call_operand.vmem [shape: f32[1,32], index: 7, kind: input, shape index: {}]   ;;  %s2803_s8 = inlined_call_operand.vmem [shape: f32[1,32], index: 8, kind: input, shape index: {}]   ;;  %s2804_s9 = inlined_call_operand.vmem [shape: bf16[32,128], index: 9, kind: input, shape index: {}]   ;;  %s2805_s10 = inlined_call_operand.vmem [shape: f32[1,128], index: 10, kind: input, shape index: {}]   ;;  %s2806_s11 = inlined_call_operand.vmem [shape: bf16[128,32], index: 11, kind: input, shape index: {}]   ;;  %s2807_s12 = inlined_call_operand.vmem [shape: f32[1,32], index: 12, kind: input, shape index: {}]   ;;  %s2808_s13 = inlined_call_operand.hbm [shape: f32[2,8,32], index: 13, kind: output, shape index: {}]  }
   0x1   :  { %2809 = sst [smem:[#allocation5_spill]] %s2795_s0 }
   0x2   :  { %2810 = sst [smem:[#allocation6_spill]] %s2796_s1 }
   0x3   :  { %2811 = sst [smem:[#allocation7_spill]] %s2797_s2 }
   0x4   :  { %18 = vsyncpa [#allocation3], 0 }
   0x5   :  { %20 = vsyncpa [#allocation3 + $0x1], 0  ;;  %s2412_s25 = smov 0   ;;  %s2414_s26 = smov 0  }
   0x6   :  { %s2416_s27 = smov 0   ;;  %s2418_s28 = smov 0  }
   0x7 LB: > { %s2433_s29 = sadd.s32 4294967295, %s2326_s28   ;;  %s2009_s30 = sadd.s32 4294967294, %s2326_s28   ;;  %s2326_s28 = sphi %s2418_s28, %s2820_s28   ;;  %s2322_s27 = sphi %s2416_s27, %s2819_s27   ;;  %s2318_s26 = sphi %s2414_s26, %s2818_s26   ;;  %s2314_s25 = sphi %s2412_s25, %s2817_s25  }
   0x8   : > { %s2437_s14 = sadd.s32 1, %s2326_s28   ;;  %s311_s15 = sadd.s32 1, %s2322_s27 }
   0x9   : > { %s308_s16 = ssub.s32 %s2326_s28, %s2437_s14  ;;  %p321_p0 = scmp.ne.s32.totalorder %s2322_s27, %s2318_s26 }
   0xa   : > { %p309_p1 = scmp.eq.s32.totalorder %s308_s16, 0  ;;  %p322_p2 = scmp.eq.s32.totalorder %s2433_s29, 1 }
   0xb   : > { %p327_p3 = scmp.ne.s32.totalorder %s2318_s26, %s2314_s25  ;;  %p328_p4 = scmp.eq.s32.totalorder %s2009_s30, 1 }
   0xc   : > { %s2448_s17 = scalar_select %p309_p1, %s2322_s27, %s311_s15  }
   0xd   : > { %p2450_p5 = por %p322_p2, %p321_p0  ;;  %p2454_p6 = por %p328_p4, %p327_p3 }
   0xe   : > { %p2012_p7 = scmp.ge.s32.totalorder %s2326_s28, 1  ;;  %p389_p8 = scmp.lt.s32.totalorder %s2326_s28, 3 }
  0x10   : > { %p390_p9 = pnand %p2012_p7, %p389_p8 }
  0x11   : > { %p432_p10 = scmp.lt.s32.totalorder (!%p390_p9), %s2433_s29, 1  ;;  %s2814_s0 = sld [smem:[#allocation5_spill]] (!%p390_p9) }
  0x12   : > { %393 = sbr.rel (%p390_p9) target bundleno = 2374 (0x946), region = 72  ;;  %s2815_s1 = sld [smem:[#allocation6_spill]] (!%p390_p9) }
  0x13   : > { %s2816_s2 = sld [smem:[#allocation7_spill]] (!%p390_p9)  ;;  %s2330_s16 = smov (!%p390_p9), 104  }
  0x14   : > { %s2333_s22 = smov (!%p390_p9), 96   ;;  %s2337_s23 = smov (!%p390_p9), 64  }
  0x17   : > { %s433_s20 = scalar_select %p432_p10, %s2433_s29, 1  ;;  %vm440_vm0 = vcmask 261120   ;;  %v2230_v4 = vld [vmem:[%s2798_s3 + $0x8] sm:$0xff]   ;;  %v2328_v5 = vmov 0.0   ;;  %vm2329_vm1 = vmmov 0   ;;  %v2231_v6 = vld [vmem:[%s2798_s3] sm:$0xff]   ;;  %v551_v37 = vlaneseq }
  0x18   : > { %2086 = vmatprep.subr.bf16.mxu0 %v2328_v5  ;;  %2090 = vmatprep.mubr.msk.bf16.mxu0 %vm2329_vm1, %v2328_v5  ;;  %v2015_v17 = vld [vmem:[%s2815_s1] ss:$0 sm:$0xff]  ;;  %v2334_v35 = vmov 1983009808   ;;  %v2335_v39 = vmov 1934713408  }
  0x19   : > { %s2014_s21 = sshll.u32 %s433_s20, 3  ;;  %2087 = vmatpush3.bf16.msra.mxu0 %v2230_v4  ;;  %2106 = vmatprep.subr.bf16.mxu1 %v2328_v5  ;;  %v2016_v19 = vld [vmem:[%s2816_s2] ss:$0 sm:$0xff]  ;;  %s2331_s20 = smov 120   ;;  %v549_v36 = vunpack.c.l.s4 %v2334_v35  ;;  %v566_v40 = vunpack.c.l.s4 %v2335_v39  ;;  %v552_v42 = vshrl.u32 %v551_v37, 7  ;;  %v2336_v58 = vmov 0  }
  0x1a   : > { %s435_s24 = scalar_lea.vmem %s2814_s0, %s2014_s21  ;;  %2088 = vmatprep.subr.bf16.mxu0 %v2328_v5  ;;  %2108 = vmatprep.mubr.msk.bf16.mxu1 %vm2329_vm1, %v2328_v5  ;;  %v2017_v23 = vld [vmem:[%s2799_s4] ss:$0 sm:$0xff]  ;;  %s2332_s21 = smov 112   ;;  %vm1057_vm2 = vcmask 64512   ;;  %vm1293_vm3 = vcmask 1043456   ;;  %vm1646_vm4 = vcmask 130048  }
  0x1b   : > { %v2465_v0 = vld [vmem:[%s435_s24] sm:$0xff]  ;;  %v550_v41 = vunpack.c.0.s8 %v549_v36  ;;  %v567_v44 = vunpack.c.0.s8 %v566_v40  ;;  %vm1649_vm5 = vcmask 195584  }
  0x1c   : > { %v441_v1 = vsel %vm440_vm0, %v2465_v0, 0.0  ;;  %v446_v2 = vmul.f32 %v2465_v0, %v2465_v0 }
  0x1d   : > { %442 = vadd.xlane.f32.xlu0 %v441_v1  ;;  %2089 = vmatpush3.bf16.msra.mxu0 %v2231_v6  ;;  %v2519_v45 = vsub.s32 %v550_v41, %v552_v42  ;;  %v2522_v48 = vsub.s32 %v567_v44, %v552_v42 }
  0x1e   : > { %v447_v3 = vsel %vm440_vm0, %v446_v2, 0.0  ;;  %2094 = vmatprep.subr.bf16.mxu0 %v2328_v5 }
  0x21   : > { %448 = vadd.xlane.f32.xlu0 %v447_v3 }
  0xa6   : > { %v443_v7 = vpop.xlane.xlu0 %442 }
  0xa7   : > { %v445_v8 = vmul.f32 0.03125, %v443_v7 }
  0xa9   : > { %v451_v10 = vmul.f32 %v445_v8, %v445_v8  ;;  %v454_v15 = vsub.f32 %v2465_v0, %v445_v8 }
  0xaa   : > { %v449_v9 = vpop.xlane.xlu0 %448 }
  0xab   : > { %v450_v11 = vmul.f32 0.03125, %v449_v9 }
  0xad   : > { %v452_v12 = vsub.f32 %v450_v11, %v451_v10 }
  0xaf   : > { %v453_v13 = vmax.f32 %v452_v12, 0.0 }
  0xb1   : > { %v455_v14 = vadd.f32 1e-05, %v453_v13 }
  0xb3   : > { %2244 = vrsqrt.f32 %v455_v14 }
  0xc0   : > { %v2245_v16 = vpop.eup %2244 }
  0xc1   : > { %v457_v18 = vmul.f32 %v2245_v16, %v454_v15 }
  0xc3   : > { %v464_v20 = vmul.f32 %v2015_v17, %v457_v18 }
  0xc5   : > { %v471_v21 = vadd.f32 %v2016_v19, %v464_v20 }
  0xc7   : > { %v472_v22 = vpack.c.bf16 %v471_v21, %v471_v21 }
  0xc9   : > { %2091 = vmatmul.mubr.msk.bf16.vlgmr.msra.gmra.mxu0 %vm440_vm0, %v472_v22 }
  0xca   : > { %2096 = vmatprep.mubr.msk.bf16.mxu0 %vm2329_vm1, %v2328_v5 }
 0x189   : > { %v533_v24 = vpop.f32.mrf.mxu0 }
 0x18a   : > { %v534_v25 = vadd.f32 %v2017_v23, %v533_v24 }
 0x18b   : > { %v2092_v26 = vpop.f32.mrf.mxu0 }
 0x18c   : > { %v539_v27 = vmul.f32 0.35355338, %v534_v25  ;;  %v2499_v28 = vpack.c.bf16 %v534_v25, %v534_v25 }
 0x18d   : > { %v536_v29 = vpop.f32.mrf.mxu0 }
 0x18e   : > { %715 = vrot.lane.b32.xlu0 %v2499_v28, %s2330_s16  ;;  %711 = vrot.lane.b32.xlu1 %v2499_v28, %s2331_s20  ;;  %v2503_v31 = vpack.c.bf16 %v539_v27, %v539_v27 }
 0x18f   : > { %v2093_v30 = vpop.f32.mrf.mxu0 }
 0x192   : > { %713 = vrot.lane.b32.xlu1 %v2499_v28, %s2332_s21  ;;  %546 = vrot.lane.b32.xlu0 %v2503_v31, %s2330_s16  ;;  %s429_s16 = sand.u32 1, %s2318_s26  }
 0x196   : > { %717 = vrot.lane.b32.xlu1 %v2499_v28, %s2333_s22 }
 0x200   : > { %v2508_v32 = vpop.permute.xlu1 %711  ;;  %v2514_v34 = vpop.permute.xlu0 %715 }
 0x201   : > { %719 = vrot.lane.b32.xlu1 %v2508_v32, %s2333_s22 }
 0x204   : > { %v2511_v33 = vpop.permute.xlu1 %713  ;;  %v547_v56 = vpop.permute.xlu0 %546 }
 0x205   : > { %721 = vrot.lane.b32.xlu1 %v2511_v33, %s2333_s22  ;;  %v596_v63 = vrot.slane %v547_v56, %v2519_v45 }
 0x208   : > { %v718_v38 = vpop.permute.xlu1 %717 }
 0x209   : > { %723 = vrot.lane.b32.xlu1 %v2514_v34, %s2333_s22  ;;  %v732_v47 = vrot.slane %v718_v38, %v2519_v45  ;;  %v554_v38 = vrot.slane %v2503_v31, %v2519_v45  ;;  %s2340_s22 = smov 24  }
 0x20d   : > { %542 = vrot.lane.b32.xlu1 %v2503_v31, %s2331_s20  ;;  %s2338_s20 = smov 8  }
 0x211   : > { %544 = vrot.lane.b32.xlu1 %v2503_v31, %s2332_s21  ;;  %s2339_s21 = smov 16  }
 0x273   : > { %v720_v43 = vpop.permute.xlu1 %719 }
 0x274   : > { %v766_v57 = vrot.slane %v720_v43, %v2519_v45 }
 0x277   : > { %v722_v46 = vpop.permute.xlu1 %721 }
 0x278   : > { %v740_v49 = vrot.slane %v722_v46, %v2519_v45 }
 0x27a   : > { %v741_v50 = vcombine.low %v732_v47, %v740_v49  ;;  %v742_v51 = vcombine.high %v732_v47, %v740_v49 }
 0x27b   : > { %v724_v52 = vpop.permute.xlu1 %723 }
 0x27c   : > { %v749_v53 = vrot.slane %v741_v50, %v2522_v48  ;;  %v756_v54 = vrot.slane %v742_v51, %v2522_v48  ;;  %v774_v55 = vrot.slane %v724_v52, %v2519_v45 }
 0x27e   : > { %v757_v59 = vcombine.high %v749_v53, %v2336_v58  ;;  %v775_v60 = vcombine.low %v766_v57, %v774_v55  ;;  %v776_v61 = vcombine.high %v766_v57, %v774_v55  ;;  %v758_v1 = vcombine.high %v756_v54, %v2336_v58 }
 0x27f   : > { %v543_v62 = vpop.permute.xlu1 %542  ;;  %v797_v6 = vshrl.u32 %v749_v53, 16  ;;  %v813_v8 = vshrl.u32 %v756_v54, 16 }
 0x280   : > { %v588_v2 = vrot.slane %v543_v62, %v2519_v45  ;;  %v783_v3 = vrot.slane %v775_v60, %v2522_v48  ;;  %v790_v4 = vrot.slane %v776_v61, %v2522_v48  ;;  %v805_v7 = vshrl.u32 %v757_v59, 16 }
 0x281   : > { %v821_v14 = vshrl.u32 %v758_v1, 16 }
 0x282   : > { %v597_v9 = vcombine.low %v588_v2, %v596_v63  ;;  %v791_v10 = vcombine.high %v783_v3, %v2336_v58  ;;  %v792_v11 = vcombine.high %v790_v4, %v2336_v58  ;;  %v795_v12 = vpack.i.b16 %v783_v3, %v749_v53 }
 0x283   : > { %v798_v13 = vshrl.u32 %v783_v3, 16  ;;  %v811_v15 = vpack.i.b16 %v790_v4, %v756_v54  ;;  %v814_v16 = vshrl.u32 %v790_v4, 16  ;;  %v598_v17 = vcombine.high %v588_v2, %v596_v63  ;;  %v545_v26 = vpop.permute.xlu1 %544 }
 0x284   : > { %v803_v19 = vpack.i.b16 %v791_v10, %v757_v59  ;;  %v806_v20 = vshrl.u32 %v791_v10, 16  ;;  %v819_v21 = vpack.i.b16 %v792_v11, %v758_v1  ;;  %v822_v23 = vshrl.u32 %v792_v11, 16 }
 0x285   : > { %v799_v18 = vpack.i.b16 %v798_v13, %v797_v6  ;;  %v815_v22 = vpack.i.b16 %v814_v16, %v813_v8  ;;  %v825_v24 = vcombine.low %v795_v12, %v811_v15  ;;  %v605_v25 = vrot.slane %v597_v9, %v2522_v48 }
 0x286   : > { %v807_v27 = vpack.i.b16 %v806_v20, %v805_v7  ;;  %v833_v29 = vcombine.low %v803_v19, %v819_v21  ;;  %v823_v30 = vpack.i.b16 %v822_v23, %v821_v14  ;;  %v612_v36 = vrot.slane %v598_v17, %v2522_v48 }
 0x287   : > { %v850_v35 = vcombine.low %v799_v18, %v815_v22  ;;  %v832_v37 = vrot.slane %v825_v24, %v2519_v45  ;;  %v562_v39 = vrot.slane %v545_v26, %v2519_v45  ;;  %v613_v42 = vcombine.high %v605_v25, %v2336_v58 }
 0x288   : > { %v840_v40 = vrot.slane %v833_v29, %v2519_v45  ;;  %v858_v41 = vcombine.low %v807_v27, %v823_v30  ;;  %v614_v47 = vcombine.high %v612_v36, %v2336_v58  ;;  %v620_v51 = vshrl.u32 %v605_v25, 16 }
 0x289   : > { %v563_v43 = vcombine.low %v554_v38, %v562_v39  ;;  %v564_v44 = vcombine.high %v554_v38, %v562_v39  ;;  %v857_v49 = vrot.slane %v850_v35, %v2519_v45  ;;  %v628_v53 = vshrl.u32 %v613_v42, 16 }
 0x28a   : > { %v841_v46 = vcombine.low %v832_v37, %v840_v40  ;;  %v865_v50 = vrot.slane %v858_v41, %v2519_v45  ;;  %v636_v54 = vshrl.u32 %v612_v36, 16  ;;  %v644_v62 = vshrl.u32 %v614_v47, 16 }
 0x28b   : > { %v571_v52 = vrot.slane %v563_v43, %v2522_v48  ;;  %v578_v31 = vrot.slane %v564_v44, %v2522_v48 }
 0x28c   : > { %v848_v55 = vrot.slane %v841_v46, %v2522_v48  ;;  %v866_v56 = vcombine.low %v857_v49, %v865_v50 }
 0x28d   : > { %v579_v57 = vcombine.high %v571_v52, %v2336_v58  ;;  %v580_v59 = vcombine.high %v578_v31, %v2336_v58  ;;  %v617_v60 = vpack.i.b16 %v605_v25, %v571_v52  ;;  %v619_v61 = vshrl.u32 %v571_v52, 16 }
 0x28e   : > { %v633_v63 = vpack.i.b16 %v612_v36, %v578_v31  ;;  %v635_v1 = vshrl.u32 %v578_v31, 16  ;;  %v873_v2 = vrot.slane %v866_v56, %v2522_v48  ;;  %v849_v14 = vcombine.high %v848_v55, %v2336_v58 }
 0x28f   : > { %v621_v3 = vpack.i.b16 %v620_v51, %v619_v61  ;;  %v625_v4 = vpack.i.b16 %v613_v42, %v579_v57  ;;  %v627_v6 = vshrl.u32 %v579_v57, 16  ;;  %v641_v7 = vpack.i.b16 %v614_v47, %v580_v59 }
 0x290   : > { %v637_v8 = vpack.i.b16 %v636_v54, %v635_v1  ;;  %v643_v9 = vshrl.u32 %v580_v59, 16  ;;  %v647_v10 = vcombine.low %v617_v60, %v633_v63  ;;  %v877_v11 = vpack.i.b16 %v873_v2, %v848_v55 }
 0x291   : > { %v629_v12 = vpack.i.b16 %v628_v53, %v627_v6  ;;  %v655_v13 = vcombine.low %v625_v4, %v641_v7  ;;  %v874_v15 = vcombine.high %v873_v2, %v2336_v58  ;;  %v879_v27 = vshrl.u32 %v873_v2, 16 }
 0x292   : > { %v645_v16 = vpack.i.b16 %v644_v62, %v643_v9  ;;  %v672_v17 = vcombine.low %v621_v3, %v637_v8  ;;  %v1062_v18 = vsel %vm1057_vm2, %v877_v11, 0  ;;  %v654_v19 = vrot.slane %v647_v10, %v2519_v45 }
 0x293   : > { %v662_v20 = vrot.slane %v655_v13, %v2519_v45  ;;  %2095 = vmatpush3.bf16.xpose.msra.mxu0 %v1062_v18  ;;  %v883_v21 = vpack.i.b16 %v874_v15, %v849_v14  ;;  %v878_v35 = vshrl.u32 %v848_v55, 16  ;;  %v885_v41 = vshrl.u32 %v874_v15, 16 }
 0x294   : > { %v680_v22 = vcombine.low %v629_v12, %v645_v16  ;;  %2100 = vmatprep.subr.bf16.mxu0 %v2328_v5  ;;  %v679_v25 = vrot.slane %v672_v17, %v2519_v45  ;;  %v884_v44 = vshrl.u32 %v849_v14, 16 }
 0x295   : > { %v663_v23 = vcombine.low %v654_v19, %v662_v20  ;;  %v1154_v24 = vsel %vm1057_vm2, %v883_v21, 0  ;;  %v880_v37 = vpack.i.b16 %v879_v27, %v878_v35 }
 0x296   : > { %v687_v26 = vrot.slane %v680_v22, %v2519_v45  ;;  %2107 = vmatpush3.bf16.xpose.msra.mxu1 %v1154_v24  ;;  %v886_v49 = vpack.i.b16 %v885_v41, %v884_v44 }
 0x297   : > { %2118 = vmatprep.subr.bf16.mxu1 %v2328_v5  ;;  %v670_v30 = vrot.slane %v663_v23, %v2522_v48  ;;  %v1108_v42 = vsel %vm1057_vm2, %v880_v37, 0 }
 0x298   : > { %v688_v29 = vcombine.low %v679_v25, %v687_v26  ;;  %v1200_v51 = vsel %vm1057_vm2, %v886_v49, 0 }
 0x299   : > { %v671_v39 = vcombine.high %v670_v30, %v2336_v58  ;;  %v700_v47 = vshrl.u32 %v670_v30, 16 }
 0x29a   : > { %v695_v36 = vrot.slane %v688_v29, %v2522_v48 }
 0x29b   : > { %v706_v31 = vshrl.u32 %v671_v39, 16 }
 0x29c   : > { %v699_v38 = vpack.i.b16 %v695_v36, %v670_v30  ;;  %v696_v40 = vcombine.high %v695_v36, %v2336_v58  ;;  %v701_v46 = vshrl.u32 %v695_v36, 16 }
 0x29e   : > { %2097 = vmatmul.mubr.msk.bf16.vlgmr.msra.gmra.mxu0 %vm1057_vm2, %v699_v38  ;;  %v705_v43 = vpack.i.b16 %v696_v40, %v671_v39  ;;  %v702_v50 = vpack.i.b16 %v701_v46, %v700_v47  ;;  %v707_v52 = vshrl.u32 %v696_v40, 16 }
 0x29f   : > { %2101 = vmatpush3.bf16.xpose.msra.mxu0 %v1108_v42  ;;  %2102 = vmatprep.mubr.msk.bf16.mxu0 %vm2329_vm1, %v2328_v5 }
 0x2a0   : > { %2109 = vmatmul.mubr.msk.bf16.vlgmr.msra.gmra.mxu1 %vm1057_vm2, %v705_v43  ;;  %2112 = vmatprep.subr.bf16.mxu0 %v2328_v5  ;;  %v708_v53 = vpack.i.b16 %v707_v52, %v706_v31 }
 0x2a1   : > { %2120 = vmatprep.mubr.msk.bf16.mxu1 %vm2329_vm1, %v2328_v5 }
 0x2a6   : > { %2103 = vmatmul.mubr.msk.bf16.vlgmr.msra.gmra.mxu0 %vm1057_vm2, %v702_v50 }
 0x2a7   : > { %2113 = vmatpush3.bf16.xpose.msra.mxu0 %v1200_v51  ;;  %2114 = vmatprep.mubr.msk.bf16.mxu0 %vm2329_vm1, %v2328_v5 }
 0x2a8   : > { %2124 = vmatprep.subr.bf16.mxu0 %v2328_v5 }
 0x2ae   : > { %2115 = vmatmul.mubr.msk.bf16.vlgmr.msra.gmra.mxu0 %vm1057_vm2, %v708_v53 }
 0x2af   : > { %2126 = vmatprep.mubr.msk.bf16.mxu0 %vm2329_vm1, %v2328_v5 }
 0x35e   : > { %v1098_v54 = vpop.f32.mrf.mxu0 }
 0x35f   : > { %v1242_v55 = vsel %vm1057_vm2, %v1098_v54, -inf }
 0x360   : > { %v1190_v56 = vpop.f32.mrf.mxu1  ;;  %1243 = vmax.xlane.f32.xlu1 %v1242_v55  ;;  %v2098_v57 = vpop.f32.mrf.mxu0 }
 0x361   : > { %v1248_v59 = vsel %vm1057_vm2, %v1190_v56, -inf }
 0x362   : > { %1249 = vmax.xlane.f32.xlu0 %v1248_v59  ;;  %v1101_v60 = vpop.f32.mrf.mxu0  ;;  %v2110_v61 = vpop.f32.mrf.mxu1 }
 0x364   : > { %v2099_v62 = vpop.f32.mrf.mxu0  ;;  %v1193_v63 = vpop.f32.mrf.mxu1 }
 0x366   : > { %v1144_v1 = vpop.f32.mrf.mxu0  ;;  %v2111_v2 = vpop.f32.mrf.mxu1 }
 0x367   : > { %v1245_v3 = vsel %vm1057_vm2, %v1144_v1, -inf }
 0x368   : > { %1246 = vmax.xlane.f32.xlu0 %v1245_v3  ;;  %v2104_v4 = vpop.f32.mrf.mxu0 }
 0x36a   : > { %v1147_v6 = vpop.f32.mrf.mxu0 }
 0x36c   : > { %v2105_v7 = vpop.f32.mrf.mxu0 }
 0x36e   : > { %v1236_v8 = vpop.f32.mrf.mxu0 }
 0x36f   : > { %v1251_v9 = vsel %vm1057_vm2, %v1236_v8, -inf }
 0x370   : > { %1252 = vmax.xlane.f32.xlu1 %v1251_v9  ;;  %v2116_v10 = vpop.f32.mrf.mxu0 }
 0x372   : > { %v1239_v11 = vpop.f32.mrf.mxu0 }
 0x374   : > { %v2117_v12 = vpop.f32.mrf.mxu0 }
 0x37e   : > { %887 = vrot.lane.b32.xlu0 %v2499_v28, %s2337_s23 }
 0x381   : > { %889 = vrot.lane.b32.xlu1 %v2508_v32, %s2337_s23 }
 0x3e9   : > { %v1244_v13 = vpop.xlane.xlu1 %1243 }
 0x3ea   : > { %v1254_v14 = vsub.f32 %v1098_v54, %v1244_v13 }
 0x3eb   : > { %v1250_v16 = vpop.xlane.xlu0 %1249 }
 0x3ec   : > { %v1258_v15 = vmul.f32 1.442695, %v1254_v14  ;;  %v1256_v25 = vsub.f32 %v1190_v56, %v1250_v16 }
 0x3ee   : > { %2246 = vpow2.f32 %v1258_v15  ;;  %v1262_v26 = vmul.f32 1.442695, %v1256_v25 }
 0x3f1   : > { %v1247_v17 = vpop.xlane.xlu0 %1246 }
 0x3f2   : > { %v1255_v18 = vsub.f32 %v1144_v1, %v1247_v17 }
 0x3f4   : > { %v1260_v19 = vmul.f32 1.442695, %v1255_v18 }
 0x3f5   : > { %v888_v35 = vpop.permute.xlu0 %887 }
 0x3f6   : > { %2248 = vpow2.f32 %v1260_v19  ;;  %v902_v46 = vrot.slane %v888_v35, %v2519_v45 }
 0x3f9   : > { %v1253_v32 = vpop.xlane.xlu1 %1252 }
 0x3fa   : > { %v1257_v23 = vsub.f32 %v1236_v8, %v1253_v32 }
 0x3fb   : > { %v2590_v20 = vpop.eup %2246 }
 0x3fc   : > { %v1266_v21 = vsel %vm1057_vm2, %v2590_v20, 0.0  ;;  %v1264_v24 = vmul.f32 1.442695, %v1257_v23 }
 0x3fd   : > { %1267 = vadd.xlane.f32.xlu0 %v1266_v21  ;;  %v890_v36 = vpop.permute.xlu1 %889 }
 0x3fe   : > { %2250 = vpow2.f32 %v1264_v24  ;;  %v936_v39 = vrot.slane %v890_v36, %v2519_v45 }
 0x3ff   : > { %2252 = vpow2.f32 %v1262_v26 }
 0x403   : > { %v2594_v22 = vpop.eup %2248 }
 0x404   : > { %v1269_v28 = vsel %vm1057_vm2, %v2594_v22, 0.0 }
 0x405   : > { %1270 = vadd.xlane.f32.xlu1 %v1269_v28 }
 0x40b   : > { %v2600_v27 = vpop.eup %2250 }
 0x40c   : > { %v1275_v29 = vsel %vm1057_vm2, %v2600_v27, 0.0  ;;  %v2604_v30 = vpop.eup %2252 }
 0x413   : > { %893 = vrot.lane.b32.xlu0 %v2514_v34, %s2337_s23  ;;  %v1272_v34 = vsel %vm1057_vm2, %v2604_v30, 0.0 }
 0x416   : > { %891 = vrot.lane.b32.xlu1 %v2511_v33, %s2337_s23  ;;  %s2049_s23 = sshll.u32 %s2433_s29, 7  ;;  %s1937_s29 = scalar_lea.sflag [#allocation3], %s429_s16 }
 0x417   : > { %s2753_s1 = scalar_lea.hbm %s2808_s13, %s2049_s23 }
 0x432   : > { %1276 = vadd.xlane.f32.xlu0 %v1275_v29 }
 0x43a   : > { %1273 = vadd.xlane.f32.xlu1 %v1272_v34 }
 0x486   : > { %v1268_v33 = vpop.xlane.xlu0 %1267 }
 0x487   : > { %2254 = vrcp.f32 %v1268_v33 }
 0x48a   : > { %v894_v37 = vpop.permute.xlu0 %893 }
 0x48b   : > { %v944_v38 = vrot.slane %v894_v37, %v2519_v45 }
 0x48d   : > { %v945_v40 = vcombine.low %v936_v39, %v944_v38  ;;  %v946_v42 = vcombine.high %v936_v39, %v944_v38 }
 0x48e   : > { %v1271_v41 = vpop.xlane.xlu1 %1270 }
 0x48f   : > { %v953_v43 = vrot.slane %v945_v40, %v2522_v48  ;;  %v960_v49 = vrot.slane %v946_v42, %v2522_v48  ;;  %2256 = vrcp.f32 %v1271_v41 }
 0x491   : > { %v961_v52 = vcombine.high %v953_v43, %v2336_v58  ;;  %v962_v54 = vcombine.high %v960_v49, %v2336_v58  ;;  %v968_v55 = vshrl.u32 %v953_v43, 16  ;;  %v984_v62 = vshrl.u32 %v960_v49, 16 }
 0x492   : > { %v892_v44 = vpop.permute.xlu1 %891 }
 0x493   : > { %v910_v47 = vrot.slane %v892_v44, %v2519_v45  ;;  %v976_v61 = vshrl.u32 %v961_v52, 16  ;;  %v992_v7 = vshrl.u32 %v962_v54, 16 }
 0x494   : > { %v2255_v32 = vpop.eup %2254 }
 0x495   : > { %v911_v50 = vcombine.low %v902_v46, %v910_v47  ;;  %v912_v51 = vcombine.high %v902_v46, %v910_v47  ;;  %v1282_v29 = vmul.f32 %v2255_v32, %v2590_v20 }
 0x497   : > { %v919_v31 = vrot.slane %v911_v50, %v2522_v48  ;;  %v926_v53 = vrot.slane %v912_v51, %v2522_v48  ;;  %v1286_v44 = vpack.c.bf16 %v1282_v29, %v1282_v29 }
 0x499   : > { %v927_v56 = vcombine.high %v919_v31, %v2336_v58  ;;  %v928_v57 = vcombine.high %v926_v53, %v2336_v58  ;;  %v965_v59 = vpack.i.b16 %v953_v43, %v919_v31  ;;  %v967_v60 = vshrl.u32 %v919_v31, 16 }
 0x49a   : > { %v981_v63 = vpack.i.b16 %v960_v49, %v926_v53  ;;  %v983_v1 = vshrl.u32 %v926_v53, 16 }
 0x49b   : > { %v969_v2 = vpack.i.b16 %v968_v55, %v967_v60  ;;  %v973_v3 = vpack.i.b16 %v961_v52, %v927_v56  ;;  %v975_v4 = vshrl.u32 %v927_v56, 16  ;;  %v989_v6 = vpack.i.b16 %v962_v54, %v928_v57  ;;  %v2232_v56 = vld [vmem:[%s2800_s5 + $0x8] sm:$0xff]  }
 0x49c   : > { %v985_v8 = vpack.i.b16 %v984_v62, %v983_v1  ;;  %v991_v9 = vshrl.u32 %v928_v57, 16  ;;  %v995_v10 = vcombine.low %v965_v59, %v981_v63  ;;  %v2257_v24 = vpop.eup %2256 }
 0x49d   : > { %v977_v11 = vpack.i.b16 %v976_v61, %v975_v4  ;;  %v1003_v12 = vcombine.low %v973_v3, %v989_v6  ;;  %v1283_v37 = vmul.f32 %v2257_v24, %v2594_v22 }
 0x49e   : > { %v993_v13 = vpack.i.b16 %v992_v7, %v991_v9  ;;  %v1020_v14 = vcombine.low %v969_v2, %v985_v8  ;;  %v1002_v15 = vrot.slane %v995_v10, %v2519_v45 }
 0x49f   : > { %v1010_v16 = vrot.slane %v1003_v12, %v2519_v45  ;;  %v1287_v47 = vpack.c.bf16 %v1283_v37, %v1283_v37 }
 0x4a0   : > { %v1028_v17 = vcombine.low %v977_v11, %v993_v13  ;;  %v1027_v19 = vrot.slane %v1020_v14, %v2519_v45 }
 0x4a1   : > { %v1011_v18 = vcombine.low %v1002_v15, %v1010_v16 }
 0x4a2   : > { %v1035_v21 = vrot.slane %v1028_v17, %v2519_v45 }
 0x4a3   : > { %v1018_v28 = vrot.slane %v1011_v18, %v2522_v48 }
 0x4a4   : > { %v1036_v23 = vcombine.low %v1027_v19, %v1035_v21 }
 0x4a5   : > { %v1019_v25 = vcombine.high %v1018_v28, %v2336_v58  ;;  %v1048_v35 = vshrl.u32 %v1018_v28, 16 }
 0x4a6   : > { %v1043_v26 = vrot.slane %v1036_v23, %v2522_v48 }
 0x4a7   : > { %v1054_v38 = vshrl.u32 %v1019_v25, 16 }
 0x4a8   : > { %v1047_v34 = vpack.i.b16 %v1043_v26, %v1018_v28  ;;  %v1049_v33 = vshrl.u32 %v1043_v26, 16  ;;  %v1044_v36 = vcombine.high %v1043_v26, %v2336_v58 }
 0x4aa   : > { %v1295_v39 = vsel %vm1293_vm3, %v1047_v34, 0  ;;  %v1050_v40 = vpack.i.b16 %v1049_v33, %v1048_v35  ;;  %v1053_v41 = vpack.i.b16 %v1044_v36, %v1019_v25  ;;  %v1055_v42 = vshrl.u32 %v1044_v36, 16 }
 0x4ab   : > { %2119 = vmatpush3.bf16.msra.mxu1 %v1295_v39 }
 0x4ac   : > { %v1341_v43 = vsel %vm1293_vm3, %v1050_v40, 0  ;;  %2130 = vmatprep.subr.bf16.mxu1 %v2328_v5  ;;  %v1056_v20 = vpack.i.b16 %v1055_v42, %v1054_v38  ;;  %v1387_v46 = vsel %vm1293_vm3, %v1053_v41, 0 }
 0x4ad   : > { %2125 = vmatpush3.bf16.msra.mxu0 %v1341_v43 }
 0x4ae   : > { %2121 = vmatmul.mubr.msk.bf16.vlgmr.msra.gmra.mxu1 %vm1057_vm2, %v1286_v44  ;;  %2136 = vmatprep.subr.bf16.mxu0 %v2328_v5  ;;  %v1433_v22 = vsel %vm1293_vm3, %v1056_v20, 0 }
 0x4af   : > { %2131 = vmatpush3.bf16.msra.mxu1 %v1387_v46  ;;  %2132 = vmatprep.mubr.msk.bf16.mxu1 %vm2329_vm1, %v2328_v5 }
 0x4b0   : > { %2127 = vmatmul.mubr.msk.bf16.vlgmr.msra.gmra.mxu0 %vm1057_vm2, %v1287_v47  ;;  %2142 = vmatprep.subr.bf16.mxu1 %v2328_v5 }
 0x4b1   : > { %2137 = vmatpush3.bf16.msra.mxu0 %v1433_v22  ;;  %2138 = vmatprep.mubr.msk.bf16.mxu0 %vm2329_vm1, %v2328_v5 }
 0x4b2   : > { %2150 = vmatprep.subr.bf16.mxu0 %v2328_v5 }
 0x4bb   : > { %v1277_v49 = vpop.xlane.xlu0 %1276 }
 0x4bc   : > { %2258 = vrcp.f32 %v1277_v49 }
 0x4c3   : > { %v1274_v50 = vpop.xlane.xlu1 %1273 }
 0x4c4   : > { %2260 = vrcp.f32 %v1274_v50 }
 0x4c9   : > { %v2259_v51 = vpop.eup %2258 }
 0x4ca   : > { %v1285_v52 = vmul.f32 %v2259_v51, %v2600_v27 }
 0x4cc   : > { %v1289_v31 = vpack.c.bf16 %v1285_v52, %v1285_v52 }
 0x4ce   : > { %2139 = vmatmul.mubr.msk.bf16.vlgmr.msra.gmra.mxu0 %vm1057_vm2, %v1289_v31 }
 0x4cf   : > { %2154 = vmatprep.mubr.msk.bf16.mxu0 %vm2329_vm1, %v2328_v5 }
 0x4d1   : > { %v2261_v53 = vpop.eup %2260 }
 0x4d2   : > { %v1284_v54 = vmul.f32 %v2261_v53, %v2604_v30 }
 0x4d4   : > { %v1288_v55 = vpack.c.bf16 %v1284_v54, %v1284_v54 }
 0x4d6   : > { %2133 = vmatmul.mubr.msk.bf16.vlgmr.msra.gmra.mxu1 %vm1057_vm2, %v1288_v55  ;;  %v2233_v55 = vld [vmem:[%s2800_s5] sm:$0xff]  }
 0x4d7   : > { %2146 = vmatprep.mubr.msk.bf16.mxu1 %vm2329_vm1, %v2328_v5  ;;  %2143 = vmatpush3.bf16.msra.mxu1 %v2232_v56 }
 0x4d8   : > { %2144 = vmatprep.subr.bf16.mxu1 %v2328_v5 }
 0x4db   : > { %2145 = vmatpush3.bf16.msra.mxu1 %v2233_v55 }
 0x4dc   : > { %2158 = vmatprep.subr.bf16.mxu1 %v2328_v5 }
 0x56e   : > { %v1331_v27 = vpop.f32.mrf.mxu1 }
 0x56f   : > { %v1475_v11 = vpack.c.bf16 %v1331_v27, %v1331_v27 }
 0x570   : > { %v2122_v57 = vpop.f32.mrf.mxu1  ;;  %v1377_v59 = vpop.f32.mrf.mxu0 }
 0x571   : > { %v1509_v2 = vpack.c.bf16 %v1377_v59, %v1377_v59  ;;  %v1482_v17 = vrot.slane %v1475_v11, %v2519_v45 }
 0x572   : > { %v1334_v60 = vpop.f32.mrf.mxu1  ;;  %v2128_v61 = vpop.f32.mrf.mxu0 }
 0x573   : > { %v1516_v8 = vrot.slane %v1509_v2, %v2519_v45 }
 0x574   : > { %v2123_v62 = vpop.f32.mrf.mxu1  ;;  %v1380_v30 = vpop.f32.mrf.mxu0 }
 0x576   : > { %v2129_v63 = vpop.f32.mrf.mxu0 }
 0x58e   : > { %v1469_v1 = vpop.f32.mrf.mxu0 }
 0x58f   : > { %v1517_v3 = vpack.c.bf16 %v1469_v1, %v1469_v1 }
 0x590   : > { %v2140_v4 = vpop.f32.mrf.mxu0 }
 0x591   : > { %v1524_v6 = vrot.slane %v1517_v3, %v2519_v45 }
 0x592   : > { %v1472_v7 = vpop.f32.mrf.mxu0 }
 0x593   : > { %v1525_v10 = vcombine.low %v1516_v8, %v1524_v6  ;;  %v1526_v13 = vcombine.high %v1516_v8, %v1524_v6 }
 0x594   : > { %v2141_v9 = vpop.f32.mrf.mxu0 }
 0x595   : > { %v1533_v16 = vrot.slane %v1525_v10, %v2522_v48  ;;  %v1540_v21 = vrot.slane %v1526_v13, %v2522_v48  ;;  %v2029_v13 = vld [vmem:[%s2801_s6] ss:$0 sm:$0xff] }
 0x596   : > { %v1423_v12 = vpop.f32.mrf.mxu1 }
 0x597   : > { %v1483_v14 = vpack.c.bf16 %v1423_v12, %v1423_v12  ;;  %v1541_v24 = vcombine.high %v1533_v16, %v2336_v58  ;;  %v1542_v29 = vcombine.high %v1540_v21, %v2336_v58  ;;  %v1548_v34 = vshrl.u32 %v1533_v16, 16 }
 0x598   : > { %v2134_v15 = vpop.f32.mrf.mxu1  ;;  %v1564_v39 = vshrl.u32 %v1540_v21, 16 }
 0x599   : > { %v1490_v18 = vrot.slane %v1483_v14, %v2519_v45  ;;  %v1556_v38 = vshrl.u32 %v1541_v24, 16  ;;  %v1572_v46 = vshrl.u32 %v1542_v29, 16 }
 0x59a   : > { %v1426_v19 = vpop.f32.mrf.mxu1 }
 0x59b   : > { %v1491_v28 = vcombine.low %v1482_v17, %v1490_v18  ;;  %v1492_v32 = vcombine.high %v1482_v17, %v1490_v18 }
 0x59c   : > { %v2135_v23 = vpop.f32.mrf.mxu1 }
 0x59d   : > { %v1499_v25 = vrot.slane %v1491_v28, %v2522_v48  ;;  %v1506_v26 = vrot.slane %v1492_v32, %v2522_v48  ;;  %v2234_v23 = vld [vmem:[%s2804_s9 + $0x8] sm:$0xff]  }
 0x59e   : > { %2151 = vmatpush3.bf16.msra.mxu0 %v2234_v23 }
 0x59f   : > { %v1507_v35 = vcombine.high %v1499_v25, %v2336_v58  ;;  %v1508_v33 = vcombine.high %v1506_v26, %v2336_v58  ;;  %v1545_v36 = vpack.i.b16 %v1533_v16, %v1499_v25  ;;  %v1547_v37 = vshrl.u32 %v1499_v25, 16  ;;  %2152 = vmatprep.subr.bf16.mxu0 %v2328_v5  ;;  %v2237_v25 = vld [vmem:[%s2806_s11 + $0x30] sm:$0xff]  }
 0x5a0   : > { %v1561_v40 = vpack.i.b16 %v1540_v21, %v1506_v26  ;;  %v1563_v41 = vshrl.u32 %v1506_v26, 16 }
 0x5a1   : > { %v1549_v42 = vpack.i.b16 %v1548_v34, %v1547_v37  ;;  %v1553_v43 = vpack.i.b16 %v1541_v24, %v1507_v35  ;;  %v1555_v44 = vshrl.u32 %v1507_v35, 16  ;;  %v1569_v20 = vpack.i.b16 %v1542_v29, %v1508_v33  ;;  %v2236_v24 = vld [vmem:[%s2806_s11 + $0x38] sm:$0xff]  }
 0x5a2   : > { %v1565_v47 = vpack.i.b16 %v1564_v39, %v1563_v41  ;;  %v1571_v22 = vshrl.u32 %v1508_v33, 16  ;;  %v1575_v49 = vcombine.low %v1545_v36, %v1561_v40  ;;  %v2033_v41 = vld [vmem:[%s2802_s7] ss:$0 sm:$0xff] }
 0x5a3   : > { %v1557_v50 = vpack.i.b16 %v1556_v38, %v1555_v44  ;;  %v1583_v51 = vcombine.low %v1553_v43, %v1569_v20  ;;  %v2034_v43 = vld [vmem:[%s2803_s8] ss:$0 sm:$0xff] }
 0x5a4   : > { %v1573_v52 = vpack.i.b16 %v1572_v46, %v1571_v22  ;;  %v1600_v31 = vcombine.low %v1549_v42, %v1565_v47  ;;  %v1582_v53 = vrot.slane %v1575_v49, %v2519_v45  ;;  %v2238_v47 = vld [vmem:[%s2806_s11 + $0x28] sm:$0xff]   ;;  %v2239_v22 = vld [vmem:[%s2806_s11 + $0x20] sm:$0xff]   ;;  %v2240_v49 = vld [vmem:[%s2806_s11 + $0x18] sm:$0xff]  }
 0x5a5   : > { %v1590_v54 = vrot.slane %v1583_v51, %v2519_v45  ;;  %v2242_v51 = vld [vmem:[%s2806_s11 + $0x8] sm:$0xff]  }
 0x5a6   : > { %v1608_v56 = vcombine.low %v1557_v50, %v1573_v52  ;;  %v1607_v57 = vrot.slane %v1600_v31, %v2519_v45  ;;  %v2241_v50 = vld [vmem:[%s2806_s11 + $0x10] sm:$0xff]   ;;  %v2243_v52 = vld [vmem:[%s2806_s11] sm:$0xff]  }
 0x5a7   : > { %v1591_v27 = vcombine.low %v1582_v53, %v1590_v54  ;;  %v2035_v31 = vld [vmem:[%s2805_s10] ss:$0 sm:$0xff] }
 0x5a8   : > { %v1615_v59 = vrot.slane %v1608_v56, %v2519_v45 }
 0x5a9   : > { %v1598_v60 = vrot.slane %v1591_v27, %v2522_v48 }
 0x5aa   : > { %v1616_v61 = vcombine.low %v1607_v57, %v1615_v59 }
 0x5ab   : > { %v1628_v30 = vshrl.u32 %v1598_v60, 16  ;;  %v1599_v1 = vcombine.high %v1598_v60, %v2336_v58 }
 0x5ac   : > { %v1623_v62 = vrot.slane %v1616_v61, %v2522_v48 }
 0x5ad   : > { %v1634_v45 = vshrl.u32 %v1599_v1, 16 }
 0x5ae   : > { %v1629_v63 = vshrl.u32 %v1623_v62, 16  ;;  %v1624_v2 = vcombine.high %v1623_v62, %v2336_v58  ;;  %v1627_v3 = vpack.i.b16 %v1623_v62, %v1598_v60 }
 0x5b0   : > { %v1630_v4 = vpack.i.b16 %v1629_v63, %v1628_v30  ;;  %v1633_v6 = vpack.i.b16 %v1624_v2, %v1599_v1  ;;  %v1635_v7 = vshrl.u32 %v1624_v2, 16  ;;  %v2039_v30 = vld [vmem:[%s2807_s12] ss:$0 sm:$0xff] }
 0x5b2   : > { %1637 = vrot.lane.b32.xlu0 %v1630_v4, %s2338_s20  ;;  %1639 = vrot.lane.b32.xlu1 %v1633_v6, %s2339_s21  ;;  %v1636_v8 = vpack.i.b16 %v1635_v7, %v1634_v45  ;;  %s2013_s20 = sshll.u32 %s429_s16, 3  ;;  %s2341_s21 = smov [#allocation2]  }
 0x5b3   : > { %s431_s24 = scalar_lea.vmem [#allocation2], %s2013_s20 }
 0x5b4   : > { %s1950_s30 = sshll.u32 %s431_s24, 4  ;;  %s2755_s30 = int_to_ptr.vmem [resolvable:$true] %s1950_s30 }
 0x5b5   : > { %s2266_s20 = scalar_lea.vmem %s2755_s30, 128 }
 0x5b6   : > { %1641 = vrot.lane.b32.xlu1 %v1636_v8, %s2340_s22  ;;  %p2267_p11 = scmp.ne.s32.totalorder %s2755_s30, %s2266_s20  ;;  %s2270_s22 = sshll.u32 %s2341_s21, 4  ;;  %s2271_s22 = int_to_ptr.vmem [resolvable:$false] %s2270_s22 }
 0x5b7   : > { %s2272_s0 = scalar_lea.vmem %s2271_s22, 256  ;;  %p2273_p0 = scmp.lt.s32.totalorder %s2755_s30, %s2271_s22 }
 0x5b8   : > { %p2268_p12 = pnand %p2267_p11, %p2450_p5  ;;  %p2274_p1 = scmp.lt.s32.totalorder %s2272_s0, %s2266_s20 }
 0x5ba   : > { %p2269_p13 = pneg %p2268_p12  ;;  %p2275_p2 = por %p2274_p1, %p2273_p0 }
 0x5bc   : > { %p2276_p3 = pnand %p2275_p2, %p2269_p13 }
 0x624   : > { %v1638_v9 = vpop.permute.xlu0 %1637  ;;  %v1640_v48 = vpop.permute.xlu1 %1639 }
 0x625   : > { %v1645_v10 = vsel %vm1057_vm2, %v1627_v3, %v1638_v9 }
 0x626   : > { %v1648_v11 = vsel %vm1646_vm4, %v1645_v10, %v1640_v48 }
 0x628   : > { %v1642_v58 = vpop.permute.xlu1 %1641 }
 0x629   : > { %v1651_v12 = vsel %vm1649_vm5, %v1648_v11, %v1642_v58 }
 0x62a   : > { %2147 = vmatmul.mubr.msk.bf16.vlgmr.msra.gmra.mxu1 %vm440_vm0, %v1651_v12 }
 0x62b   : > { %2174 = vmatprep.mubr.msk.bf16.mxu1 %vm2329_vm1, %v2328_v5  ;;  %2159 = vmatpush3.bf16.msra.mxu1 %v2236_v24 }
 0x62c   : > { %2160 = vmatprep.subr.bf16.mxu1 %v2328_v5 }
 0x62f   : > { %2161 = vmatpush3.bf16.msra.mxu1 %v2237_v25 }
 0x630   : > { %2162 = vmatprep.subr.bf16.mxu1 %v2328_v5 }
 0x633   : > { %2163 = vmatpush3.bf16.msra.mxu1 %v2238_v47 }
 0x634   : > { %2164 = vmatprep.subr.bf16.mxu1 %v2328_v5 }
 0x637   : > { %2165 = vmatpush3.bf16.msra.mxu1 %v2239_v22 }
 0x638   : > { %2166 = vmatprep.subr.bf16.mxu1 %v2328_v5 }
 0x63b   : > { %2167 = vmatpush3.bf16.msra.mxu1 %v2240_v49 }
 0x63c   : > { %2168 = vmatprep.subr.bf16.mxu1 %v2328_v5 }
 0x63f   : > { %2169 = vmatpush3.bf16.msra.mxu1 %v2241_v50 }
 0x640   : > { %2170 = vmatprep.subr.bf16.mxu1 %v2328_v5 }
 0x643   : > { %2171 = vmatpush3.bf16.msra.mxu1 %v2242_v51 }
 0x644   : > { %2172 = vmatprep.subr.bf16.mxu1 %v2328_v5 }
 0x647   : > { %2173 = vmatpush3.bf16.msra.mxu1 %v2243_v52 }
 0x6ea   : > { %v1711_v14 = vpop.f32.mrf.mxu1 }
 0x6eb   : > { %v1712_v15 = vadd.f32 %v2029_v13, %v1711_v14 }
 0x6ec   : > { %v2148_v16 = vpop.f32.mrf.mxu1 }
 0x6ed   : > { %v2688_v17 = vadd.f32 %v1712_v15, %v2465_v0  ;;  %v2235_v0 = vld [vmem:[%s2804_s9] sm:$0xff]  }
 0x6ee   : > { %v1714_v18 = vpop.f32.mrf.mxu1  ;;  %2153 = vmatpush3.bf16.msra.mxu0 %v2235_v0 }
 0x6ef   : > { %v1720_v19 = vsel %vm440_vm0, %v2688_v17, 0.0  ;;  %v1724_v21 = vmul.f32 %v2688_v17, %v2688_v17 }
 0x6f0   : > { %1721 = vadd.xlane.f32.xlu0 %v1720_v19  ;;  %v2149_v28 = vpop.f32.mrf.mxu1 }
 0x6f1   : > { %v1725_v32 = vsel %vm440_vm0, %v1724_v21, 0.0 }
 0x6f2   : > { %1726 = vadd.xlane.f32.xlu1 %v1725_v32 }
 0x779   : > { %v1722_v26 = vpop.xlane.xlu0 %1721 }
 0x77a   : > { %v1723_v29 = vmul.f32 0.03125, %v1722_v26 }
 0x77b   : > { %v1727_v34 = vpop.xlane.xlu1 %1726 }
 0x77c   : > { %v1729_v35 = vmul.f32 %v1723_v29, %v1723_v29  ;;  %v1728_v33 = vmul.f32 0.03125, %v1727_v34  ;;  %v1732_v39 = vsub.f32 %v2688_v17, %v1723_v29 }
 0x77e   : > { %v1730_v36 = vsub.f32 %v1728_v33, %v1729_v35 }
 0x780   : > { %v1731_v37 = vmax.f32 %v1730_v36, 0.0 }
 0x782   : > { %v1733_v38 = vadd.f32 1e-05, %v1731_v37 }
 0x784   : > { %2262 = vrsqrt.f32 %v1733_v38 }
 0x791   : > { %v2263_v40 = vpop.eup %2262 }
 0x792   : > { %v1735_v42 = vmul.f32 %v2263_v40, %v1732_v39 }
 0x794   : > { %v1742_v44 = vmul.f32 %v2033_v41, %v1735_v42 }
 0x796   : > { %v1749_v20 = vadd.f32 %v2034_v43, %v1742_v44 }
 0x798   : > { %v1750_v46 = vpack.c.bf16 %v1749_v20, %v1749_v20 }
 0x79a   : > { %2155 = vmatmul.mubr.msk.bf16.vlgmr.msra.gmra.mxu0 %vm440_vm0, %v1750_v46 }
 0x85a   : > { %v1811_v53 = vpop.f32.mrf.mxu0 }
 0x85b   : > { %v1812_v54 = vadd.f32 %v2035_v31, %v1811_v53 }
 0x85c   : > { %v2156_v55 = vpop.f32.mrf.mxu0 }
 0x85d   : > { %v1818_v56 = vmul.f32 0.70710677, %v1812_v54  ;;  %v1817_v5 = vmul.f32 0.5, %v1812_v54 }
 0x85e   : > { %v1814_v27 = vpop.f32.mrf.mxu0 }
 0x85f   : > { %2264 = verf.f32 %v1818_v56 }
 0x860   : > { %v2157_v57 = vpop.f32.mrf.mxu0 }
 0x86c   : > { %v2265_v59 = vpop.eup %2264 }
 0x86d   : > { %v1820_v60 = vadd.f32 1.0, %v2265_v59 }
 0x86f   : > { %v1821_v61 = vmul.f32 %v1820_v60, %v1817_v5 }
 0x871   : > { %v1822_v62 = vpack.c.bf16 %v1821_v61, %v1821_v61 }
 0x873   : > { %2175 = vmatmul.mubr.bf16.vlgmr.msra.gmra.mxu1 %v1822_v62 }
 0x933   : > { %v1928_v63 = vpop.f32.mrf.mxu1 }
 0x934   : > { %v1929_v1 = vadd.f32 %v2039_v30, %v1928_v63 }
 0x935   : > { %v2176_v2 = vpop.f32.mrf.mxu1 }
 0x936   : > { %v1934_v3 = vadd.f32 %v1929_v1, %v2688_v17 }
 0x937   : > { %v1931_v4 = vpop.f32.mrf.mxu1 }
 0x938   : > { %1935 = vst.msk [vmem:[%s431_s24] sm:$0xff] %vm440_vm0, %v1934_v3 }
 0x939   : > { %v2177_v6 = vpop.f32.mrf.mxu1 }
 0x93a   : > { %2279 = shalt.err (!%p2276_p3)
}
 0x93b   : > { %s2280_s23 = scalar_lea.hbm %s2753_s1, 128  ;;  %s2284_s15 = scalar_lea.hbm %s2808_s13, 256 }
 0x93c   : > { %p2281_p4 = scmp.ne.s32.totalorder %s2753_s1, %s2280_s23  ;;  %p2285_p9 = scmp.lt.s32.totalorder %s2753_s1, %s2808_s13 }
 0x93d   : > { %p2286_p10 = scmp.lt.s32.totalorder %s2284_s15, %s2280_s23 }
 0x93e   : > { %p2282_p7 = pnand %p2281_p4, %p2450_p5 }
 0x93f   : > { %p2287_p11 = por %p2286_p10, %p2285_p9 }
 0x940   : > { %p2283_p8 = pneg %p2282_p7 }
 0x942   : > { %p2288_p12 = pnand %p2287_p11, %p2283_p8 }
 0x944   : > { %2291 = shalt.err (!%p2288_p12)
}
 0x945   : > { %2178 = dma.vmem_to_hbm [thread:$0]  (%p2450_p5), %s2755_s30, 128, %s2753_s1, %s1937_s29  }
 0x946 PF: > { %p2184_p13 = scmp.ge.s32.totalorder %s2326_s28, 2  ;;  %s1962_s20 = sand.u32 1, %s2314_s25  }
 0x947   : > { %s1963_s2 = scalar_lea.sflag [#allocation3], %s1962_s20 }
 0x948   : > { %p2181_p0 = pnand %p2184_p13, %p2454_p6 }
 0x94a   : > { %p2182_p1 = pneg %p2181_p0 }
 0x94c   : > { %2309 = dma.done.wait (%p2182_p1), %s1963_s2, 128  }
 0x94d   : > { %2311 = vsyncadd (%p2182_p1), %s1963_s2, 4294967168  ;;  %p23_p2 = scmp.ge.s32.totalorder %s2437_s14, 4   ;;  %s2817_s25 = smov %s2318_s26 }
 0x94e   : > { %s2818_s26 = smov %s2322_s27  ;;  %s2819_s27 = smov %s2448_s17 }
 0x94f   : > { %s2820_s28 = smov %s2437_s14  ;;  %25 = sbr.rel (!%p23_p2) target bundleno = 7 (0x7), region = 107 }
 0x954   :  { %1968 = vsyncpa [#allocation3], 1 }
 0x955   :  { %1970 = vsyncpa [#allocation3 + $0x1], 1 }

// kernel: tpu_custom_call.1
= control target key start
LH: loop header
LB: loop body
LE: loop exit
PB: predicated region body
PF: predicated region fallthrough
CT: control target
= control target key end

     0   :  { %s2795_s0 = inlined_call_operand.vmem [shape: f32[2,8,32], index: 0, kind: input, shape index: {}]   ;;  %s2796_s1 = inlined_call_operand.vmem [shape: f32[1,32], index: 1, kind: input, shape index: {}]   ;;  %s2797_s2 = inlined_call_operand.vmem [shape: f32[1,32], index: 2, kind: input, shape index: {}]   ;;  %s2798_s3 = inlined_call_operand.vmem [shape: bf16[32,96], index: 3, kind: input, shape index: {}]   ;;  %s2799_s4 = inlined_call_operand.vmem [shape: f32[1,96], index: 4, kind: input, shape index: {}]   ;;  %s2800_s5 = inlined_call_operand.vmem [shape: bf16[32,32], index: 5, kind: input, shape index: {}]   ;;  %s2801_s6 = inlined_call_operand.vmem [shape: f32[1,32], index: 6, kind: input, shape index: {}]   ;;  %s2802_s7 = inlined_call_operand.vmem [shape: f32[1,32], index: 7, kind: input, shape index: {}]   ;;  %s2803_s8 = inlined_call_operand.vmem [shape: f32[1,32], index: 8, kind: input, shape index: {}]   ;;  %s2804_s9 = inlined_call_operand.vmem [shape: bf16[32,128], index: 9, kind: input, shape index: {}]   ;;  %s2805_s10 = inlined_call_operand.vmem [shape: f32[1,128], index: 10, kind: input, shape index: {}]   ;;  %s2806_s11 = inlined_call_operand.vmem [shape: bf16[128,32], index: 11, kind: input, shape index: {}]   ;;  %s2807_s12 = inlined_call_operand.vmem [shape: f32[1,32], index: 12, kind: input, shape index: {}]   ;;  %s2808_s13 = inlined_call_operand.hbm [shape: f32[2,8,32], index: 13, kind: output, shape index: {}]  }
   0x1   :  { %2809 = sst [smem:[#allocation5_spill]] %s2795_s0 }
   0x2   :  { %2810 = sst [smem:[#allocation6_spill]] %s2796_s1 }
   0x3   :  { %2811 = sst [smem:[#allocation7_spill]] %s2797_s2 }
   0x4   :  { %18 = vsyncpa [#allocation3], 0 }
   0x5   :  { %20 = vsyncpa [#allocation3 + $0x1], 0  ;;  %s2412_s25 = smov 0   ;;  %s2414_s26 = smov 0  }
   0x6   :  { %s2416_s27 = smov 0   ;;  %s2418_s28 = smov 0  }
   0x7 LB: > { %s2433_s29 = sadd.s32 4294967295, %s2326_s28   ;;  %s2009_s30 = sadd.s32 4294967294, %s2326_s28   ;;  %s2326_s28 = sphi %s2418_s28, %s2820_s28   ;;  %s2322_s27 = sphi %s2416_s27, %s2819_s27   ;;  %s2318_s26 = sphi %s2414_s26, %s2818_s26   ;;  %s2314_s25 = sphi %s2412_s25, %s2817_s25  }
   0x8   : > { %s2437_s14 = sadd.s32 1, %s2326_s28   ;;  %s311_s15 = sadd.s32 1, %s2322_s27 }
   0x9   : > { %s308_s16 = ssub.s32 %s2326_s28, %s2437_s14  ;;  %p321_p0 = scmp.ne.s32.totalorder %s2322_s27, %s2318_s26 }
   0xa   : > { %p309_p1 = scmp.eq.s32.totalorder %s308_s16, 0  ;;  %p322_p2 = scmp.eq.s32.totalorder %s2433_s29, 1 }
   0xb   : > { %p327_p3 = scmp.ne.s32.totalorder %s2318_s26, %s2314_s25  ;;  %p328_p4 = scmp.eq.s32.totalorder %s2009_s30, 1 }
   0xc   : > { %s2448_s17 = scalar_select %p309_p1, %s2322_s27, %s311_s15  }
   0xd   : > { %p2450_p5 = por %p322_p2, %p321_p0  ;;  %p2454_p6 = por %p328_p4, %p327_p3 }
   0xe   : > { %p2012_p7 = scmp.ge.s32.totalorder %s2326_s28, 1  ;;  %p389_p8 = scmp.lt.s32.totalorder %s2326_s28, 3 }
  0x10   : > { %p390_p9 = pnand %p2012_p7, %p389_p8 }
  0x11   : > { %p432_p10 = scmp.lt.s32.totalorder (!%p390_p9), %s2433_s29, 1  ;;  %s2814_s0 = sld [smem:[#allocation5_spill]] (!%p390_p9) }
  0x12   : > { %393 = sbr.rel (%p390_p9) target bundleno = 2374 (0x946), region = 72  ;;  %s2815_s1 = sld [smem:[#allocation6_spill]] (!%p390_p9) }
  0x13   : > { %s2816_s2 = sld [smem:[#allocation7_spill]] (!%p390_p9)  ;;  %s2330_s16 = smov (!%p390_p9), 104  }
  0x14   : > { %s2333_s22 = smov (!%p390_p9), 96   ;;  %s2337_s23 = smov (!%p390_p9), 64  }
  0x17   : > { %s433_s20 = scalar_select %p432_p10, %s2433_s29, 1  ;;  %vm440_vm0 = vcmask 261120   ;;  %v2230_v4 = vld [vmem:[%s2798_s3 + $0x8] sm:$0xff]   ;;  %v2328_v5 = vmov 0.0   ;;  %vm2329_vm1 = vmmov 0   ;;  %v2231_v6 = vld [vmem:[%s2798_s3] sm:$0xff]   ;;  %v551_v37 = vlaneseq }
  0x18   : > { %2086 = vmatprep.subr.bf16.mxu0 %v2328_v5  ;;  %2090 = vmatprep.mubr.msk.bf16.mxu0 %vm2329_vm1, %v2328_v5  ;;  %v2015_v17 = vld [vmem:[%s2815_s1] ss:$0 sm:$0xff]  ;;  %v2334_v35 = vmov 1983009808   ;;  %v2335_v39 = vmov 1934713408  }
  0x19   : > { %s2014_s21 = sshll.u32 %s433_s20, 3  ;;  %2087 = vmatpush3.bf16.msra.mxu0 %v2230_v4  ;;  %2106 = vmatprep.subr.bf16.mxu1 %v2328_v5  ;;  %v2016_v19 = vld [vmem:[%s2816_s2] ss:$0 sm:$0xff]  ;;  %s2331_s20 = smov 120   ;;  %v549_v36 = vunpack.c.l.s4 %v2334_v35  ;;  %v566_v40 = vunpack.c.l.s4 %v2335_v39  ;;  %v552_v42 = vshrl.u32 %v551_v37, 7  ;;  %v2336_v58 = vmov 0  }
  0x1a   : > { %s435_s24 = scalar_lea.vmem %s2814_s0, %s2014_s21  ;;  %2088 = vmatprep.subr.bf16.mxu0 %v2328_v5  ;;  %2108 = vmatprep.mubr.msk.bf16.mxu1 %vm2329_vm1, %v2328_v5  ;;  %v2017_v23 = vld [vmem:[%s2799_s4] ss:$0 sm:$0xff]  ;;  %s2332_s21 = smov 112   ;;  %vm1057_vm2 = vcmask 64512   ;;  %vm1293_vm3 = vcmask 1043456   ;;  %vm1646_vm4 = vcmask 130048  }
  0x1b   : > { %v2465_v0 = vld [vmem:[%s435_s24] sm:$0xff]  ;;  %v550_v41 = vunpack.c.0.s8 %v549_v36  ;;  %v567_v44 = vunpack.c.0.s8 %v566_v40  ;;  %vm1649_vm5 = vcmask 195584  }
  0x1c   : > { %v441_v1 = vsel %vm440_vm0, %v2465_v0, 0.0  ;;  %v446_v2 = vmul.f32 %v2465_v0, %v2465_v0 }
  0x1d   : > { %442 = vadd.xlane.f32.xlu0 %v441_v1  ;;  %2089 = vmatpush3.bf16.msra.mxu0 %v2231_v6  ;;  %v2519_v45 = vsub.s32 %v550_v41, %v552_v42  ;;  %v2522_v48 = vsub.s32 %v567_v44, %v552_v42 }
  0x1e   : > { %v447_v3 = vsel %vm440_vm0, %v446_v2, 0.0  ;;  %2094 = vmatprep.subr.bf16.mxu0 %v2328_v5 }
  0x21   : > { %448 = vadd.xlane.f32.xlu0 %v447_v3 }
  0xa6   : > { %v443_v7 = vpop.xlane.xlu0 %442 }
  0xa7   : > { %v445_v8 = vmul.f32 0.03125, %v443_v7 }
  0xa9   : > { %v451_v10 = vmul.f32 %v445_v8, %v445_v8  ;;  %v454_v15 = vsub.f32 %v2465_v0, %v445_v8 }
  0xaa   : > { %v449_v9 = vpop.xlane.xlu0 %448 }
  0xab   : > { %v450_v11 = vmul.f32 0.03125, %v449_v9 }
  0xad   : > { %v452_v12 = vsub.f32 %v450_v11, %v451_v10 }
  0xaf   : > { %v453_v13 = vmax.f32 %v452_v12, 0.0 }
  0xb1   : > { %v455_v14 = vadd.f32 1e-05, %v453_v13 }
  0xb3   : > { %2244 = vrsqrt.f32 %v455_v14 }
  0xc0   : > { %v2245_v16 = vpop.eup %2244 }
  0xc1   : > { %v457_v18 = vmul.f32 %v2245_v16, %v454_v15 }
  0xc3   : > { %v464_v20 = vmul.f32 %v2015_v17, %v457_v18 }
  0xc5   : > { %v471_v21 = vadd.f32 %v2016_v19, %v464_v20 }
  0xc7   : > { %v472_v22 = vpack.c.bf16 %v471_v21, %v471_v21 }
  0xc9   : > { %2091 = vmatmul.mubr.msk.bf16.vlgmr.msra.gmra.mxu0 %vm440_vm0, %v472_v22 }
  0xca   : > { %2096 = vmatprep.mubr.msk.bf16.mxu0 %vm2329_vm1, %v2328_v5 }
 0x189   : > { %v533_v24 = vpop.f32.mrf.mxu0 }
 0x18a   : > { %v534_v25 = vadd.f32 %v2017_v23, %v533_v24 }
 0x18b   : > { %v2092_v26 = vpop.f32.mrf.mxu0 }
 0x18c   : > { %v539_v27 = vmul.f32 0.35355338, %v534_v25  ;;  %v2499_v28 = vpack.c.bf16 %v534_v25, %v534_v25 }
 0x18d   : > { %v536_v29 = vpop.f32.mrf.mxu0 }
 0x18e   : > { %715 = vrot.lane.b32.xlu0 %v2499_v28, %s2330_s16  ;;  %711 = vrot.lane.b32.xlu1 %v2499_v28, %s2331_s20  ;;  %v2503_v31 = vpack.c.bf16 %v539_v27, %v539_v27 }
 0x18f   : > { %v2093_v30 = vpop.f32.mrf.mxu0 }
 0x192   : > { %713 = vrot.lane.b32.xlu1 %v2499_v28, %s2332_s21  ;;  %546 = vrot.lane.b32.xlu0 %v2503_v31, %s2330_s16  ;;  %s429_s16 = sand.u32 1, %s2318_s26  }
 0x196   : > { %717 = vrot.lane.b32.xlu1 %v2499_v28, %s2333_s22 }
 0x200   : > { %v2508_v32 = vpop.permute.xlu1 %711  ;;  %v2514_v34 = vpop.permute.xlu0 %715 }
 0x201   : > { %719 = vrot.lane.b32.xlu1 %v2508_v32, %s2333_s22 }
 0x204   : > { %v2511_v33 = vpop.permute.xlu1 %713  ;;  %v547_v56 = vpop.permute.xlu0 %546 }
 0x205   : > { %721 = vrot.lane.b32.xlu1 %v2511_v33, %s2333_s22  ;;  %v596_v63 = vrot.slane %v547_v56, %v2519_v45 }
 0x208   : > { %v718_v38 = vpop.permute.xlu1 %717 }
 0x209   : > { %723 = vrot.lane.b32.xlu1 %v2514_v34, %s2333_s22  ;;  %v732_v47 = vrot.slane %v718_v38, %v2519_v45  ;;  %v554_v38 = vrot.slane %v2503_v31, %v2519_v45  ;;  %s2340_s22 = smov 24  }
 0x20d   : > { %542 = vrot.lane.b32.xlu1 %v2503_v31, %s2331_s20  ;;  %s2338_s20 = smov 8  }
 0x211   : > { %544 = vrot.lane.b32.xlu1 %v2503_v31, %s2332_s21  ;;  %s2339_s21 = smov 16  }
 0x273   : > { %v720_v43 = vpop.permute.xlu1 %719 }
 0x274   : > { %v766_v57 = vrot.slane %v720_v43, %v2519_v45 }
 0x277   : > { %v722_v46 = vpop.permute.xlu1 %721 }
 0x278   : > { %v740_v49 = vrot.slane %v722_v46, %v2519_v45 }
 0x27a   : > { %v741_v50 = vcombine.low %v732_v47, %v740_v49  ;;  %v742_v51 = vcombine.high %v732_v47, %v740_v49 }
 0x27b   : > { %v724_v52 = vpop.permute.xlu1 %723 }
 0x27c   : > { %v749_v53 = vrot.slane %v741_v50, %v2522_v48  ;;  %v756_v54 = vrot.slane %v742_v51, %v2522_v48  ;;  %v774_v55 = vrot.slane %v724_v52, %v2519_v45 }
 0x27e   : > { %v757_v59 = vcombine.high %v749_v53, %v2336_v58  ;;  %v775_v60 = vcombine.low %v766_v57, %v774_v55  ;;  %v776_v61 = vcombine.high %v766_v57, %v774_v55  ;;  %v758_v1 = vcombine.high %v756_v54, %v2336_v58 }
 0x27f   : > { %v543_v62 = vpop.permute.xlu1 %542  ;;  %v797_v6 = vshrl.u32 %v749_v53, 16  ;;  %v813_v8 = vshrl.u32 %v756_v54, 16 }
 0x280   : > { %v588_v2 = vrot.slane %v543_v62, %v2519_v45  ;;  %v783_v3 = vrot.slane %v775_v60, %v2522_v48  ;;  %v790_v4 = vrot.slane %v776_v61, %v2522_v48  ;;  %v805_v7 = vshrl.u32 %v757_v59, 16 }
 0x281   : > { %v821_v14 = vshrl.u32 %v758_v1, 16 }
 0x282   : > { %v597_v9 = vcombine.low %v588_v2, %v596_v63  ;;  %v791_v10 = vcombine.high %v783_v3, %v2336_v58  ;;  %v792_v11 = vcombine.high %v790_v4, %v2336_v58  ;;  %v795_v12 = vpack.i.b16 %v783_v3, %v749_v53 }
 0x283   : > { %v798_v13 = vshrl.u32 %v783_v3, 16  ;;  %v811_v15 = vpack.i.b16 %v790_v4, %v756_v54  ;;  %v814_v16 = vshrl.u32 %v790_v4, 16  ;;  %v598_v17 = vcombine.high %v588_v2, %v596_v63  ;;  %v545_v26 = vpop.permute.xlu1 %544 }
 0x284   : > { %v803_v19 = vpack.i.b16 %v791_v10, %v757_v59  ;;  %v806_v20 = vshrl.u32 %v791_v10, 16  ;;  %v819_v21 = vpack.i.b16 %v792_v11, %v758_v1  ;;  %v822_v23 = vshrl.u32 %v792_v11, 16 }
 0x285   : > { %v799_v18 = vpack.i.b16 %v798_v13, %v797_v6  ;;  %v815_v22 = vpack.i.b16 %v814_v16, %v813_v8  ;;  %v825_v24 = vcombine.low %v795_v12, %v811_v15  ;;  %v605_v25 = vrot.slane %v597_v9, %v2522_v48 }
 0x286   : > { %v807_v27 = vpack.i.b16 %v806_v20, %v805_v7  ;;  %v833_v29 = vcombine.low %v803_v19, %v819_v21  ;;  %v823_v30 = vpack.i.b16 %v822_v23, %v821_v14  ;;  %v612_v36 = vrot.slane %v598_v17, %v2522_v48 }
 0x287   : > { %v850_v35 = vcombine.low %v799_v18, %v815_v22  ;;  %v832_v37 = vrot.slane %v825_v24, %v2519_v45  ;;  %v562_v39 = vrot.slane %v545_v26, %v2519_v45  ;;  %v613_v42 = vcombine.high %v605_v25, %v2336_v58 }
 0x288   : > { %v840_v40 = vrot.slane %v833_v29, %v2519_v45  ;;  %v858_v41 = vcombine.low %v807_v27, %v823_v30  ;;  %v614_v47 = vcombine.high %v612_v36, %v2336_v58  ;;  %v620_v51 = vshrl.u32 %v605_v25, 16 }
 0x289   : > { %v563_v43 = vcombine.low %v554_v38, %v562_v39  ;;  %v564_v44 = vcombine.high %v554_v38, %v562_v39  ;;  %v857_v49 = vrot.slane %v850_v35, %v2519_v45  ;;  %v628_v53 = vshrl.u32 %v613_v42, 16 }
 0x28a   : > { %v841_v46 = vcombine.low %v832_v37, %v840_v40  ;;  %v865_v50 = vrot.slane %v858_v41, %v2519_v45  ;;  %v636_v54 = vshrl.u32 %v612_v36, 16  ;;  %v644_v62 = vshrl.u32 %v614_v47, 16 }
 0x28b   : > { %v571_v52 = vrot.slane %v563_v43, %v2522_v48  ;;  %v578_v31 = vrot.slane %v564_v44, %v2522_v48 }
 0x28c   : > { %v848_v55 = vrot.slane %v841_v46, %v2522_v48  ;;  %v866_v56 = vcombine.low %v857_v49, %v865_v50 }
 0x28d   : > { %v579_v57 = vcombine.high %v571_v52, %v2336_v58  ;;  %v580_v59 = vcombine.high %v578_v31, %v2336_v58  ;;  %v617_v60 = vpack.i.b16 %v605_v25, %v571_v52  ;;  %v619_v61 = vshrl.u32 %v571_v52, 16 }
 0x28e   : > { %v633_v63 = vpack.i.b16 %v612_v36, %v578_v31  ;;  %v635_v1 = vshrl.u32 %v578_v31, 16  ;;  %v873_v2 = vrot.slane %v866_v56, %v2522_v48  ;;  %v849_v14 = vcombine.high %v848_v55, %v2336_v58 }
 0x28f   : > { %v621_v3 = vpack.i.b16 %v620_v51, %v619_v61  ;;  %v625_v4 = vpack.i.b16 %v613_v42, %v579_v57  ;;  %v627_v6 = vshrl.u32 %v579_v57, 16  ;;  %v641_v7 = vpack.i.b16 %v614_v47, %v580_v59 }
 0x290   : > { %v637_v8 = vpack.i.b16 %v636_v54, %v635_v1  ;;  %v643_v9 = vshrl.u32 %v580_v59, 16  ;;  %v647_v10 = vcombine.low %v617_v60, %v633_v63  ;;  %v877_v11 = vpack.i.b16 %v873_v2, %v848_v55 }
 0x291   : > { %v629_v12 = vpack.i.b16 %v628_v53, %v627_v6  ;;  %v655_v13 = vcombine.low %v625_v4, %v641_v7  ;;  %v874_v15 = vcombine.high %v873_v2, %v2336_v58  ;;  %v879_v27 = vshrl.u32 %v873_v2, 16 }
 0x292   : > { %v645_v16 = vpack.i.b16 %v644_v62, %v643_v9  ;;  %v672_v17 = vcombine.low %v621_v3, %v637_v8  ;;  %v1062_v18 = vsel %vm1057_vm2, %v877_v11, 0  ;;  %v654_v19 = vrot.slane %v647_v10, %v2519_v45 }
 0x293   : > { %v662_v20 = vrot.slane %v655_v13, %v2519_v45  ;;  %2095 = vmatpush3.bf16.xpose.msra.mxu0 %v1062_v18  ;;  %v883_v21 = vpack.i.b16 %v874_v15, %v849_v14  ;;  %v878_v35 = vshrl.u32 %v848_v55, 16  ;;  %v885_v41 = vshrl.u32 %v874_v15, 16 }
 0x294   : > { %v680_v22 = vcombine.low %v629_v12, %v645_v16  ;;  %2100 = vmatprep.subr.bf16.mxu0 %v2328_v5  ;;  %v679_v25 = vrot.slane %v672_v17, %v2519_v45  ;;  %v884_v44 = vshrl.u32 %v849_v14, 16 }
 0x295   : > { %v663_v23 = vcombine.low %v654_v19, %v662_v20  ;;  %v1154_v24 = vsel %vm1057_vm2, %v883_v21, 0  ;;  %v880_v37 = vpack.i.b16 %v879_v27, %v878_v35 }
 0x296   : > { %v687_v26 = vrot.slane %v680_v22, %v2519_v45  ;;  %2107 = vmatpush3.bf16.xpose.msra.mxu1 %v1154_v24  ;;  %v886_v49 = vpack.i.b16 %v885_v41, %v884_v44 }
 0x297   : > { %2118 = vmatprep.subr.bf16.mxu1 %v2328_v5  ;;  %v670_v30 = vrot.slane %v663_v23, %v2522_v48  ;;  %v1108_v42 = vsel %vm1057_vm2, %v880_v37, 0 }
 0x298   : > { %v688_v29 = vcombine.low %v679_v25, %v687_v26  ;;  %v1200_v51 = vsel %vm1057_vm2, %v886_v49, 0 }
 0x299   : > { %v671_v39 = vcombine.high %v670_v30, %v2336_v58  ;;  %v700_v47 = vshrl.u32 %v670_v30, 16 }
 0x29a   : > { %v695_v36 = vrot.slane %v688_v29, %v2522_v48 }
 0x29b   : > { %v706_v31 = vshrl.u32 %v671_v39, 16 }
 0x29c   : > { %v699_v38 = vpack.i.b16 %v695_v36, %v670_v30  ;;  %v696_v40 = vcombine.high %v695_v36, %v2336_v58  ;;  %v701_v46 = vshrl.u32 %v695_v36, 16 }
 0x29e   : > { %2097 = vmatmul.mubr.msk.bf16.vlgmr.msra.gmra.mxu0 %vm1057_vm2, %v699_v38  ;;  %v705_v43 = vpack.i.b16 %v696_v40, %v671_v39  ;;  %v702_v50 = vpack.i.b16 %v701_v46, %v700_v47  ;;  %v707_v52 = vshrl.u32 %v696_v40, 16 }
 0x29f   : > { %2101 = vmatpush3.bf16.xpose.msra.mxu0 %v1108_v42  ;;  %2102 = vmatprep.mubr.msk.bf16.mxu0 %vm2329_vm1, %v2328_v5 }
 0x2a0   : > { %2109 = vmatmul.mubr.msk.bf16.vlgmr.msra.gmra.mxu1 %vm1057_vm2, %v705_v43  ;;  %2112 = vmatprep.subr.bf16.mxu0 %v2328_v5  ;;  %v708_v53 = vpack.i.b16 %v707_v52, %v706_v31 }
 0x2a1   : > { %2120 = vmatprep.mubr.msk.bf16.mxu1 %vm2329_vm1, %v2328_v5 }
 0x2a6   : > { %2103 = vmatmul.mubr.msk.bf16.vlgmr.msra.gmra.mxu0 %vm1057_vm2, %v702_v50 }
 0x2a7   : > { %2113 = vmatpush3.bf16.xpose.msra.mxu0 %v1200_v51  ;;  %2114 = vmatprep.mubr.msk.bf16.mxu0 %vm2329_vm1, %v2328_v5 }
 0x2a8   : > { %2124 = vmatprep.subr.bf16.mxu0 %v2328_v5 }
 0x2ae   : > { %2115 = vmatmul.mubr.msk.bf16.vlgmr.msra.gmra.mxu0 %vm1057_vm2, %v708_v53 }
 0x2af   : > { %2126 = vmatprep.mubr.msk.bf16.mxu0 %vm2329_vm1, %v2328_v5 }
 0x35e   : > { %v1098_v54 = vpop.f32.mrf.mxu0 }
 0x35f   : > { %v1242_v55 = vsel %vm1057_vm2, %v1098_v54, -inf }
 0x360   : > { %v1190_v56 = vpop.f32.mrf.mxu1  ;;  %1243 = vmax.xlane.f32.xlu1 %v1242_v55  ;;  %v2098_v57 = vpop.f32.mrf.mxu0 }
 0x361   : > { %v1248_v59 = vsel %vm1057_vm2, %v1190_v56, -inf }
 0x362   : > { %1249 = vmax.xlane.f32.xlu0 %v1248_v59  ;;  %v1101_v60 = vpop.f32.mrf.mxu0  ;;  %v2110_v61 = vpop.f32.mrf.mxu1 }
 0x364   : > { %v2099_v62 = vpop.f32.mrf.mxu0  ;;  %v1193_v63 = vpop.f32.mrf.mxu1 }
 0x366   : > { %v1144_v1 = vpop.f32.mrf.mxu0  ;;  %v2111_v2 = vpop.f32.mrf.mxu1 }
 0x367   : > { %v1245_v3 = vsel %vm1057_vm2, %v1144_v1, -inf }
 0x368   : > { %1246 = vmax.xlane.f32.xlu0 %v1245_v3  ;;  %v2104_v4 = vpop.f32.mrf.mxu0 }
 0x36a   : > { %v1147_v6 = vpop.f32.mrf.mxu0 }
 0x36c   : > { %v2105_v7 = vpop.f32.mrf.mxu0 }
 0x36e   : > { %v1236_v8 = vpop.f32.mrf.mxu0 }
 0x36f   : > { %v1251_v9 = vsel %vm1057_vm2, %v1236_v8, -inf }
 0x370   : > { %1252 = vmax.xlane.f32.xlu1 %v1251_v9  ;;  %v2116_v10 = vpop.f32.mrf.mxu0 }
 0x372   : > { %v1239_v11 = vpop.f32.mrf.mxu0 }
 0x374   : > { %v2117_v12 = vpop.f32.mrf.mxu0 }
 0x37e   : > { %887 = vrot.lane.b32.xlu0 %v2499_v28, %s2337_s23 }
 0x381   : > { %889 = vrot.lane.b32.xlu1 %v2508_v32, %s2337_s23 }
 0x3e9   : > { %v1244_v13 = vpop.xlane.xlu1 %1243 }
 0x3ea   : > { %v1254_v14 = vsub.f32 %v1098_v54, %v1244_v13 }
 0x3eb   : > { %v1250_v16 = vpop.xlane.xlu0 %1249 }
 0x3ec   : > { %v1258_v15 = vmul.f32 1.442695, %v1254_v14  ;;  %v1256_v25 = vsub.f32 %v1190_v56, %v1250_v16 }
 0x3ee   : > { %2246 = vpow2.f32 %v1258_v15  ;;  %v1262_v26 = vmul.f32 1.442695, %v1256_v25 }
 0x3f1   : > { %v1247_v17 = vpop.xlane.xlu0 %1246 }
 0x3f2   : > { %v1255_v18 = vsub.f32 %v1144_v1, %v1247_v17 }
 0x3f4   : > { %v1260_v19 = vmul.f32 1.442695, %v1255_v18 }
 0x3f5   : > { %v888_v35 = vpop.permute.xlu0 %887 }
 0x3f6   : > { %2248 = vpow2.f32 %v1260_v19  ;;  %v902_v46 = vrot.slane %v888_v35, %v2519_v45 }
 0x3f9   : > { %v1253_v32 = vpop.xlane.xlu1 %1252 }
 0x3fa   : > { %v1257_v23 = vsub.f32 %v1236_v8, %v1253_v32 }
 0x3fb   : > { %v2590_v20 = vpop.eup %2246 }
 0x3fc   : > { %v1266_v21 = vsel %vm1057_vm2, %v2590_v20, 0.0  ;;  %v1264_v24 = vmul.f32 1.442695, %v1257_v23 }
 0x3fd   : > { %1267 = vadd.xlane.f32.xlu0 %v1266_v21  ;;  %v890_v36 = vpop.permute.xlu1 %889 }
 0x3fe   : > { %2250 = vpow2.f32 %v1264_v24  ;;  %v936_v39 = vrot.slane %v890_v36, %v2519_v45 }
 0x3ff   : > { %2252 = vpow2.f32 %v1262_v26 }
 0x403   : > { %v2594_v22 = vpop.eup %2248 }
 0x404   : > { %v1269_v28 = vsel %vm1057_vm2, %v2594_v22, 0.0 }
 0x405   : > { %1270 = vadd.xlane.f32.xlu1 %v1269_v28 }
 0x40b   : > { %v2600_v27 = vpop.eup %2250 }
 0x40c   : > { %v1275_v29 = vsel %vm1057_vm2, %v2600_v27, 0.0  ;;  %v2604_v30 = vpop.eup %2252 }
 0x413   : > { %893 = vrot.lane.b32.xlu0 %v2514_v34, %s2337_s23  ;;  %v1272_v34 = vsel %vm1057_vm2, %v2604_v30, 0.0 }
 0x416   : > { %891 = vrot.lane.b32.xlu1 %v2511_v33, %s2337_s23  ;;  %s2049_s23 = sshll.u32 %s2433_s29, 7  ;;  %s1937_s29 = scalar_lea.sflag [#allocation3], %s429_s16 }
 0x417   : > { %s2753_s1 = scalar_lea.hbm %s2808_s13, %s2049_s23 }
 0x432   : > { %1276 = vadd.xlane.f32.xlu0 %v1275_v29 }
 0x43a   : > { %1273 = vadd.xlane.f32.xlu1 %v1272_v34 }
 0x486   : > { %v1268_v33 = vpop.xlane.xlu0 %1267 }
 0x487   : > { %2254 = vrcp.f32 %v1268_v33 }
 0x48a   : > { %v894_v37 = vpop.permute.xlu0 %893 }
 0x48b   : > { %v944_v38 = vrot.slane %v894_v37, %v2519_v45 }
 0x48d   : > { %v945_v40 = vcombine.low %v936_v39, %v944_v38  ;;  %v946_v42 = vcombine.high %v936_v39, %v944_v38 }
 0x48e   : > { %v1271_v41 = vpop.xlane.xlu1 %1270 }
 0x48f   : > { %v953_v43 = vrot.slane %v945_v40, %v2522_v48  ;;  %v960_v49 = vrot.slane %v946_v42, %v2522_v48  ;;  %2256 = vrcp.f32 %v1271_v41 }
 0x491   : > { %v961_v52 = vcombine.high %v953_v43, %v2336_v58  ;;  %v962_v54 = vcombine.high %v960_v49, %v2336_v58  ;;  %v968_v55 = vshrl.u32 %v953_v43, 16  ;;  %v984_v62 = vshrl.u32 %v960_v49, 16 }
 0x492   : > { %v892_v44 = vpop.permute.xlu1 %891 }
 0x493   : > { %v910_v47 = vrot.slane %v892_v44, %v2519_v45  ;;  %v976_v61 = vshrl.u32 %v961_v52, 16  ;;  %v992_v7 = vshrl.u32 %v962_v54, 16 }
 0x494   : > { %v2255_v32 = vpop.eup %2254 }
 0x495   : > { %v911_v50 = vcombine.low %v902_v46, %v910_v47  ;;  %v912_v51 = vcombine.high %v902_v46, %v910_v47  ;;  %v1282_v29 = vmul.f32 %v2255_v32, %v2590_v20 }
 0x497   : > { %v919_v31 = vrot.slane %v911_v50, %v2522_v48  ;;  %v926_v53 = vrot.slane %v912_v51, %v2522_v48  ;;  %v1286_v44 = vpack.c.bf16 %v1282_v29, %v1282_v29 }
 0x499   : > { %v927_v56 = vcombine.high %v919_v31, %v2336_v58  ;;  %v928_v57 = vcombine.high %v926_v53, %v2336_v58  ;;  %v965_v59 = vpack.i.b16 %v953_v43, %v919_v31  ;;  %v967_v60 = vshrl.u32 %v919_v31, 16 }
 0x49a   : > { %v981_v63 = vpack.i.b16 %v960_v49, %v926_v53  ;;  %v983_v1 = vshrl.u32 %v926_v53, 16 }
 0x49b   : > { %v969_v2 = vpack.i.b16 %v968_v55, %v967_v60  ;;  %v973_v3 = vpack.i.b16 %v961_v52, %v927_v56  ;;  %v975_v4 = vshrl.u32 %v927_v56, 16  ;;  %v989_v6 = vpack.i.b16 %v962_v54, %v928_v57  ;;  %v2232_v56 = vld [vmem:[%s2800_s5 + $0x8] sm:$0xff]  }
 0x49c   : > { %v985_v8 = vpack.i.b16 %v984_v62, %v983_v1  ;;  %v991_v9 = vshrl.u32 %v928_v57, 16  ;;  %v995_v10 = vcombine.low %v965_v59, %v981_v63  ;;  %v2257_v24 = vpop.eup %2256 }
 0x49d   : > { %v977_v11 = vpack.i.b16 %v976_v61, %v975_v4  ;;  %v1003_v12 = vcombine.low %v973_v3, %v989_v6  ;;  %v1283_v37 = vmul.f32 %v2257_v24, %v2594_v22 }
 0x49e   : > { %v993_v13 = vpack.i.b16 %v992_v7, %v991_v9  ;;  %v1020_v14 = vcombine.low %v969_v2, %v985_v8  ;;  %v1002_v15 = vrot.slane %v995_v10, %v2519_v45 }
 0x49f   : > { %v1010_v16 = vrot.slane %v1003_v12, %v2519_v45  ;;  %v1287_v47 = vpack.c.bf16 %v1283_v37, %v1283_v37 }
 0x4a0   : > { %v1028_v17 = vcombine.low %v977_v11, %v993_v13  ;;  %v1027_v19 = vrot.slane %v1020_v14, %v2519_v45 }
 0x4a1   : > { %v1011_v18 = vcombine.low %v1002_v15, %v1010_v16 }
 0x4a2   : > { %v1035_v21 = vrot.slane %v1028_v17, %v2519_v45 }
 0x4a3   : > { %v1018_v28 = vrot.slane %v1011_v18, %v2522_v48 }
 0x4a4   : > { %v1036_v23 = vcombine.low %v1027_v19, %v1035_v21 }
 0x4a5   : > { %v1019_v25 = vcombine.high %v1018_v28, %v2336_v58  ;;  %v1048_v35 = vshrl.u32 %v1018_v28, 16 }
 0x4a6   : > { %v1043_v26 = vrot.slane %v1036_v23, %v2522_v48 }
 0x4a7   : > { %v1054_v38 = vshrl.u32 %v1019_v25, 16 }
 0x4a8   : > { %v1047_v34 = vpack.i.b16 %v1043_v26, %v1018_v28  ;;  %v1049_v33 = vshrl.u32 %v1043_v26, 16  ;;  %v1044_v36 = vcombine.high %v1043_v26, %v2336_v58 }
 0x4aa   : > { %v1295_v39 = vsel %vm1293_vm3, %v1047_v34, 0  ;;  %v1050_v40 = vpack.i.b16 %v1049_v33, %v1048_v35  ;;  %v1053_v41 = vpack.i.b16 %v1044_v36, %v1019_v25  ;;  %v1055_v42 = vshrl.u32 %v1044_v36, 16 }
 0x4ab   : > { %2119 = vmatpush3.bf16.msra.mxu1 %v1295_v39 }
 0x4ac   : > { %v1341_v43 = vsel %vm1293_vm3, %v1050_v40, 0  ;;  %2130 = vmatprep.subr.bf16.mxu1 %v2328_v5  ;;  %v1056_v20 = vpack.i.b16 %v1055_v42, %v1054_v38  ;;  %v1387_v46 = vsel %vm1293_vm3, %v1053_v41, 0 }
 0x4ad   : > { %2125 = vmatpush3.bf16.msra.mxu0 %v1341_v43 }
 0x4ae   : > { %2121 = vmatmul.mubr.msk.bf16.vlgmr.msra.gmra.mxu1 %vm1057_vm2, %v1286_v44  ;;  %2136 = vmatprep.subr.bf16.mxu0 %v2328_v5  ;;  %v1433_v22 = vsel %vm1293_vm3, %v1056_v20, 0 }
 0x4af   : > { %2131 = vmatpush3.bf16.msra.mxu1 %v1387_v46  ;;  %2132 = vmatprep.mubr.msk.bf16.mxu1 %vm2329_vm1, %v2328_v5 }
 0x4b0   : > { %2127 = vmatmul.mubr.msk.bf16.vlgmr.msra.gmra.mxu0 %vm1057_vm2, %v1287_v47  ;;  %2142 = vmatprep.subr.bf16.mxu1 %v2328_v5 }
 0x4b1   : > { %2137 = vmatpush3.bf16.msra.mxu0 %v1433_v22  ;;  %2138 = vmatprep.mubr.msk.bf16.mxu0 %vm2329_vm1, %v2328_v5 }
 0x4b2   : > { %2150 = vmatprep.subr.bf16.mxu0 %v2328_v5 }
 0x4bb   : > { %v1277_v49 = vpop.xlane.xlu0 %1276 }
 0x4bc   : > { %2258 = vrcp.f32 %v1277_v49 }
 0x4c3   : > { %v1274_v50 = vpop.xlane.xlu1 %1273 }
 0x4c4   : > { %2260 = vrcp.f32 %v1274_v50 }
 0x4c9   : > { %v2259_v51 = vpop.eup %2258 }
 0x4ca   : > { %v1285_v52 = vmul.f32 %v2259_v51, %v2600_v27 }
 0x4cc   : > { %v1289_v31 = vpack.c.bf16 %v1285_v52, %v1285_v52 }
 0x4ce   : > { %2139 = vmatmul.mubr.msk.bf16.vlgmr.msra.gmra.mxu0 %vm1057_vm2, %v1289_v31 }
 0x4cf   : > { %2154 = vmatprep.mubr.msk.bf16.mxu0 %vm2329_vm1, %v2328_v5 }
 0x4d1   : > { %v2261_v53 = vpop.eup %2260 }
 0x4d2   : > { %v1284_v54 = vmul.f32 %v2261_v53, %v2604_v30 }
 0x4d4   : > { %v1288_v55 = vpack.c.bf16 %v1284_v54, %v1284_v54 }
 0x4d6   : > { %2133 = vmatmul.mubr.msk.bf16.vlgmr.msra.gmra.mxu1 %vm1057_vm2, %v1288_v55  ;;  %v2233_v55 = vld [vmem:[%s2800_s5] sm:$0xff]  }
 0x4d7   : > { %2146 = vmatprep.mubr.msk.bf16.mxu1 %vm2329_vm1, %v2328_v5  ;;  %2143 = vmatpush3.bf16.msra.mxu1 %v2232_v56 }
 0x4d8   : > { %2144 = vmatprep.subr.bf16.mxu1 %v2328_v5 }
 0x4db   : > { %2145 = vmatpush3.bf16.msra.mxu1 %v2233_v55 }
 0x4dc   : > { %2158 = vmatprep.subr.bf16.mxu1 %v2328_v5 }
 0x56e   : > { %v1331_v27 = vpop.f32.mrf.mxu1 }
 0x56f   : > { %v1475_v11 = vpack.c.bf16 %v1331_v27, %v1331_v27 }
 0x570   : > { %v2122_v57 = vpop.f32.mrf.mxu1  ;;  %v1377_v59 = vpop.f32.mrf.mxu0 }
 0x571   : > { %v1509_v2 = vpack.c.bf16 %v1377_v59, %v1377_v59  ;;  %v1482_v17 = vrot.slane %v1475_v11, %v2519_v45 }
 0x572   : > { %v1334_v60 = vpop.f32.mrf.mxu1  ;;  %v2128_v61 = vpop.f32.mrf.mxu0 }
 0x573   : > { %v1516_v8 = vrot.slane %v1509_v2, %v2519_v45 }
 0x574   : > { %v2123_v62 = vpop.f32.mrf.mxu1  ;;  %v1380_v30 = vpop.f32.mrf.mxu0 }
 0x576   : > { %v2129_v63 = vpop.f32.mrf.mxu0 }
 0x58e   : > { %v1469_v1 = vpop.f32.mrf.mxu0 }
 0x58f   : > { %v1517_v3 = vpack.c.bf16 %v1469_v1, %v1469_v1 }
 0x590   : > { %v2140_v4 = vpop.f32.mrf.mxu0 }
 0x591   : > { %v1524_v6 = vrot.slane %v1517_v3, %v2519_v45 }
 0x592   : > { %v1472_v7 = vpop.f32.mrf.mxu0 }
 0x593   : > { %v1525_v10 = vcombine.low %v1516_v8, %v1524_v6  ;;  %v1526_v13 = vcombine.high %v1516_v8, %v1524_v6 }
 0x594   : > { %v2141_v9 = vpop.f32.mrf.mxu0 }
 0x595   : > { %v1533_v16 = vrot.slane %v1525_v10, %v2522_v48  ;;  %v1540_v21 = vrot.slane %v1526_v13, %v2522_v48  ;;  %v2029_v13 = vld [vmem:[%s2801_s6] ss:$0 sm:$0xff] }
 0x596   : > { %v1423_v12 = vpop.f32.mrf.mxu1 }
 0x597   : > { %v1483_v14 = vpack.c.bf16 %v1423_v12, %v1423_v12  ;;  %v1541_v24 = vcombine.high %v1533_v16, %v2336_v58  ;;  %v1542_v29 = vcombine.high %v1540_v21, %v2336_v58  ;;  %v1548_v34 = vshrl.u32 %v1533_v16, 16 }
 0x598   : > { %v2134_v15 = vpop.f32.mrf.mxu1  ;;  %v1564_v39 = vshrl.u32 %v1540_v21, 16 }
 0x599   : > { %v1490_v18 = vrot.slane %v1483_v14, %v2519_v45  ;;  %v1556_v38 = vshrl.u32 %v1541_v24, 16  ;;  %v1572_v46 = vshrl.u32 %v1542_v29, 16 }
 0x59a   : > { %v1426_v19 = vpop.f32.mrf.mxu1 }
 0x59b   : > { %v1491_v28 = vcombine.low %v1482_v17, %v1490_v18  ;;  %v1492_v32 = vcombine.high %v1482_v17, %v1490_v18 }
 0x59c   : > { %v2135_v23 = vpop.f32.mrf.mxu1 }
 0x59d   : > { %v1499_v25 = vrot.slane %v1491_v28, %v2522_v48  ;;  %v1506_v26 = vrot.slane %v1492_v32, %v2522_v48  ;;  %v2234_v23 = vld [vmem:[%s2804_s9 + $0x8] sm:$0xff]  }
 0x59e   : > { %2151 = vmatpush3.bf16.msra.mxu0 %v2234_v23 }
 0x59f   : > { %v1507_v35 = vcombine.high %v1499_v25, %v2336_v58  ;;  %v1508_v33 = vcombine.high %v1506_v26, %v2336_v58  ;;  %v1545_v36 = vpack.i.b16 %v1533_v16, %v1499_v25  ;;  %v1547_v37 = vshrl.u32 %v1499_v25, 16  ;;  %2152 = vmatprep.subr.bf16.mxu0 %v2328_v5  ;;  %v2237_v25 = vld [vmem:[%s2806_s11 + $0x30] sm:$0xff]  }
 0x5a0   : > { %v1561_v40 = vpack.i.b16 %v1540_v21, %v1506_v26  ;;  %v1563_v41 = vshrl.u32 %v1506_v26, 16 }
 0x5a1   : > { %v1549_v42 = vpack.i.b16 %v1548_v34, %v1547_v37  ;;  %v1553_v43 = vpack.i.b16 %v1541_v24, %v1507_v35  ;;  %v1555_v44 = vshrl.u32 %v1507_v35, 16  ;;  %v1569_v20 = vpack.i.b16 %v1542_v29, %v1508_v33  ;;  %v2236_v24 = vld [vmem:[%s2806_s11 + $0x38] sm:$0xff]  }
 0x5a2   : > { %v1565_v47 = vpack.i.b16 %v1564_v39, %v1563_v41  ;;  %v1571_v22 = vshrl.u32 %v1508_v33, 16  ;;  %v1575_v49 = vcombine.low %v1545_v36, %v1561_v40  ;;  %v2033_v41 = vld [vmem:[%s2802_s7] ss:$0 sm:$0xff] }
 0x5a3   : > { %v1557_v50 = vpack.i.b16 %v1556_v38, %v1555_v44  ;;  %v1583_v51 = vcombine.low %v1553_v43, %v1569_v20  ;;  %v2034_v43 = vld [vmem:[%s2803_s8] ss:$0 sm:$0xff] }
 0x5a4   : > { %v1573_v52 = vpack.i.b16 %v1572_v46, %v1571_v22  ;;  %v1600_v31 = vcombine.low %v1549_v42, %v1565_v47  ;;  %v1582_v53 = vrot.slane %v1575_v49, %v2519_v45  ;;  %v2238_v47 = vld [vmem:[%s2806_s11 + $0x28] sm:$0xff]   ;;  %v2239_v22 = vld [vmem:[%s2806_s11 + $0x20] sm:$0xff]   ;;  %v2240_v49 = vld [vmem:[%s2806_s11 + $0x18] sm:$0xff]  }
 0x5a5   : > { %v1590_v54 = vrot.slane %v1583_v51, %v2519_v45  ;;  %v2242_v51 = vld [vmem:[%s2806_s11 + $0x8] sm:$0xff]  }
 0x5a6   : > { %v1608_v56 = vcombine.low %v1557_v50, %v1573_v52  ;;  %v1607_v57 = vrot.slane %v1600_v31, %v2519_v45  ;;  %v2241_v50 = vld [vmem:[%s2806_s11 + $0x10] sm:$0xff]   ;;  %v2243_v52 = vld [vmem:[%s2806_s11] sm:$0xff]  }
 0x5a7   : > { %v1591_v27 = vcombine.low %v1582_v53, %v1590_v54  ;;  %v2035_v31 = vld [vmem:[%s2805_s10] ss:$0 sm:$0xff] }
 0x5a8   : > { %v1615_v59 = vrot.slane %v1608_v56, %v2519_v45 }
 0x5a9   : > { %v1598_v60 = vrot.slane %v1591_v27, %v2522_v48 }
 0x5aa   : > { %v1616_v61 = vcombine.low %v1607_v57, %v1615_v59 }
 0x5ab   : > { %v1628_v30 = vshrl.u32 %v1598_v60, 16  ;;  %v1599_v1 = vcombine.high %v1598_v60, %v2336_v58 }
 0x5ac   : > { %v1623_v62 = vrot.slane %v1616_v61, %v2522_v48 }
 0x5ad   : > { %v1634_v45 = vshrl.u32 %v1599_v1, 16 }
 0x5ae   : > { %v1629_v63 = vshrl.u32 %v1623_v62, 16  ;;  %v1624_v2 = vcombine.high %v1623_v62, %v2336_v58  ;;  %v1627_v3 = vpack.i.b16 %v1623_v62, %v1598_v60 }
 0x5b0   : > { %v1630_v4 = vpack.i.b16 %v1629_v63, %v1628_v30  ;;  %v1633_v6 = vpack.i.b16 %v1624_v2, %v1599_v1  ;;  %v1635_v7 = vshrl.u32 %v1624_v2, 16  ;;  %v2039_v30 = vld [vmem:[%s2807_s12] ss:$0 sm:$0xff] }
 0x5b2   : > { %1637 = vrot.lane.b32.xlu0 %v1630_v4, %s2338_s20  ;;  %1639 = vrot.lane.b32.xlu1 %v1633_v6, %s2339_s21  ;;  %v1636_v8 = vpack.i.b16 %v1635_v7, %v1634_v45  ;;  %s2013_s20 = sshll.u32 %s429_s16, 3  ;;  %s2341_s21 = smov [#allocation2]  }
 0x5b3   : > { %s431_s24 = scalar_lea.vmem [#allocation2], %s2013_s20 }
 0x5b4   : > { %s1950_s30 = sshll.u32 %s431_s24, 4  ;;  %s2755_s30 = int_to_ptr.vmem [resolvable:$true] %s1950_s30 }
 0x5b5   : > { %s2266_s20 = scalar_lea.vmem %s2755_s30, 128 }
 0x5b6   : > { %1641 = vrot.lane.b32.xlu1 %v1636_v8, %s2340_s22  ;;  %p2267_p11 = scmp.ne.s32.totalorder %s2755_s30, %s2266_s20  ;;  %s2270_s22 = sshll.u32 %s2341_s21, 4  ;;  %s2271_s22 = int_to_ptr.vmem [resolvable:$false] %s2270_s22 }
 0x5b7   : > { %s2272_s0 = scalar_lea.vmem %s2271_s22, 256  ;;  %p2273_p0 = scmp.lt.s32.totalorder %s2755_s30, %s2271_s22 }
 0x5b8   : > { %p2268_p12 = pnand %p2267_p11, %p2450_p5  ;;  %p2274_p1 = scmp.lt.s32.totalorder %s2272_s0, %s2266_s20 }
 0x5ba   : > { %p2269_p13 = pneg %p2268_p12  ;;  %p2275_p2 = por %p2274_p1, %p2273_p0 }
 0x5bc   : > { %p2276_p3 = pnand %p2275_p2, %p2269_p13 }
 0x624   : > { %v1638_v9 = vpop.permute.xlu0 %1637  ;;  %v1640_v48 = vpop.permute.xlu1 %1639 }
 0x625   : > { %v1645_v10 = vsel %vm1057_vm2, %v1627_v3, %v1638_v9 }
 0x626   : > { %v1648_v11 = vsel %vm1646_vm4, %v1645_v10, %v1640_v48 }
 0x628   : > { %v1642_v58 = vpop.permute.xlu1 %1641 }
 0x629   : > { %v1651_v12 = vsel %vm1649_vm5, %v1648_v11, %v1642_v58 }
 0x62a   : > { %2147 = vmatmul.mubr.msk.bf16.vlgmr.msra.gmra.mxu1 %vm440_vm0, %v1651_v12 }
 0x62b   : > { %2174 = vmatprep.mubr.msk.bf16.mxu1 %vm2329_vm1, %v2328_v5  ;;  %2159 = vmatpush3.bf16.msra.mxu1 %v2236_v24 }
 0x62c   : > { %2160 = vmatprep.subr.bf16.mxu1 %v2328_v5 }
 0x62f   : > { %2161 = vmatpush3.bf16.msra.mxu1 %v2237_v25 }
 0x630   : > { %2162 = vmatprep.subr.bf16.mxu1 %v2328_v5 }
 0x633   : > { %2163 = vmatpush3.bf16.msra.mxu1 %v2238_v47 }
 0x634   : > { %2164 = vmatprep.subr.bf16.mxu1 %v2328_v5 }
 0x637   : > { %2165 = vmatpush3.bf16.msra.mxu1 %v2239_v22 }
 0x638   : > { %2166 = vmatprep.subr.bf16.mxu1 %v2328_v5 }
 0x63b   : > { %2167 = vmatpush3.bf16.msra.mxu1 %v2240_v49 }
 0x63c   : > { %2168 = vmatprep.subr.bf16.mxu1 %v2328_v5 }
 0x63f   : > { %2169 = vmatpush3.bf16.msra.mxu1 %v2241_v50 }
 0x640   : > { %2170 = vmatprep.subr.bf16.mxu1 %v2328_v5 }
 0x643   : > { %2171 = vmatpush3.bf16.msra.mxu1 %v2242_v51 }
 0x644   : > { %2172 = vmatprep.subr.bf16.mxu1 %v2328_v5 }
 0x647   : > { %2173 = vmatpush3.bf16.msra.mxu1 %v2243_v52 }
 0x6ea   : > { %v1711_v14 = vpop.f32.mrf.mxu1 }
 0x6eb   : > { %v1712_v15 = vadd.f32 %v2029_v13, %v1711_v14 }
 0x6ec   : > { %v2148_v16 = vpop.f32.mrf.mxu1 }
 0x6ed   : > { %v2688_v17 = vadd.f32 %v1712_v15, %v2465_v0  ;;  %v2235_v0 = vld [vmem:[%s2804_s9] sm:$0xff]  }
 0x6ee   : > { %v1714_v18 = vpop.f32.mrf.mxu1  ;;  %2153 = vmatpush3.bf16.msra.mxu0 %v2235_v0 }
 0x6ef   : > { %v1720_v19 = vsel %vm440_vm0, %v2688_v17, 0.0  ;;  %v1724_v21 = vmul.f32 %v2688_v17, %v2688_v17 }
 0x6f0   : > { %1721 = vadd.xlane.f32.xlu0 %v1720_v19  ;;  %v2149_v28 = vpop.f32.mrf.mxu1 }
 0x6f1   : > { %v1725_v32 = vsel %vm440_vm0, %v1724_v21, 0.0 }
 0x6f2   : > { %1726 = vadd.xlane.f32.xlu1 %v1725_v32 }
 0x779   : > { %v1722_v26 = vpop.xlane.xlu0 %1721 }
 0x77a   : > { %v1723_v29 = vmul.f32 0.03125, %v1722_v26 }
 0x77b   : > { %v1727_v34 = vpop.xlane.xlu1 %1726 }
 0x77c   : > { %v1729_v35 = vmul.f32 %v1723_v29, %v1723_v29  ;;  %v1728_v33 = vmul.f32 0.03125, %v1727_v34  ;;  %v1732_v39 = vsub.f32 %v2688_v17, %v1723_v29 }
 0x77e   : > { %v1730_v36 = vsub.f32 %v1728_v33, %v1729_v35 }
 0x780   : > { %v1731_v37 = vmax.f32 %v1730_v36, 0.0 }
 0x782   : > { %v1733_v38 = vadd.f32 1e-05, %v1731_v37 }
 0x784   : > { %2262 = vrsqrt.f32 %v1733_v38 }
 0x791   : > { %v2263_v40 = vpop.eup %2262 }
 0x792   : > { %v1735_v42 = vmul.f32 %v2263_v40, %v1732_v39 }
 0x794   : > { %v1742_v44 = vmul.f32 %v2033_v41, %v1735_v42 }
 0x796   : > { %v1749_v20 = vadd.f32 %v2034_v43, %v1742_v44 }
 0x798   : > { %v1750_v46 = vpack.c.bf16 %v1749_v20, %v1749_v20 }
 0x79a   : > { %2155 = vmatmul.mubr.msk.bf16.vlgmr.msra.gmra.mxu0 %vm440_vm0, %v1750_v46 }
 0x85a   : > { %v1811_v53 = vpop.f32.mrf.mxu0 }
 0x85b   : > { %v1812_v54 = vadd.f32 %v2035_v31, %v1811_v53 }
 0x85c   : > { %v2156_v55 = vpop.f32.mrf.mxu0 }
 0x85d   : > { %v1818_v56 = vmul.f32 0.70710677, %v1812_v54  ;;  %v1817_v5 = vmul.f32 0.5, %v1812_v54 }
 0x85e   : > { %v1814_v27 = vpop.f32.mrf.mxu0 }
 0x85f   : > { %2264 = verf.f32 %v1818_v56 }
 0x860   : > { %v2157_v57 = vpop.f32.mrf.mxu0 }
 0x86c   : > { %v2265_v59 = vpop.eup %2264 }
 0x86d   : > { %v1820_v60 = vadd.f32 1.0, %v2265_v59 }
 0x86f   : > { %v1821_v61 = vmul.f32 %v1820_v60, %v1817_v5 }
 0x871   : > { %v1822_v62 = vpack.c.bf16 %v1821_v61, %v1821_v61 }
 0x873   : > { %2175 = vmatmul.mubr.bf16.vlgmr.msra.gmra.mxu1 %v1822_v62 }
 0x933   : > { %v1928_v63 = vpop.f32.mrf.mxu1 }
 0x934   : > { %v1929_v1 = vadd.f32 %v2039_v30, %v1928_v63 }
 0x935   : > { %v2176_v2 = vpop.f32.mrf.mxu1 }
 0x936   : > { %v1934_v3 = vadd.f32 %v1929_v1, %v2688_v17 }
 0x937   : > { %v1931_v4 = vpop.f32.mrf.mxu1 }
 0x938   : > { %1935 = vst.msk [vmem:[%s431_s24] sm:$0xff] %vm440_vm0, %v1934_v3 }
 0x939   : > { %v2177_v6 = vpop.f32.mrf.mxu1 }
 0x93a   : > { %2279 = shalt.err (!%p2276_p3)
}
 0x93b   : > { %s2280_s23 = scalar_lea.hbm %s2753_s1, 128  ;;  %s2284_s15 = scalar_lea.hbm %s2808_s13, 256 }
 0x93c   : > { %p2281_p4 = scmp.ne.s32.totalorder %s2753_s1, %s2280_s23  ;;  %p2285_p9 = scmp.lt.s32.totalorder %s2753_s1, %s2808_s13 }
 0x93d   : > { %p2286_p10 = scmp.lt.s32.totalorder %s2284_s15, %s2280_s23 }
 0x93e   : > { %p2282_p7 = pnand %p2281_p4, %p2450_p5 }
 0x93f   : > { %p2287_p11 = por %p2286_p10, %p2285_p9 }
 0x940   : > { %p2283_p8 = pneg %p2282_p7 }
 0x942   : > { %p2288_p12 = pnand %p2287_p11, %p2283_p8 }
 0x944   : > { %2291 = shalt.err (!%p2288_p12)
}
 0x945   : > { %2178 = dma.vmem_to_hbm [thread:$0]  (%p2450_p5), %s2755_s30, 128, %s2753_s1, %s1937_s29  }
 0x946 PF: > { %p2184_p13 = scmp.ge.s32.totalorder %s2326_s28, 2  ;;  %s1962_s20 = sand.u32 1, %s2314_s25  }
 0x947   : > { %s1963_s2 = scalar_lea.sflag [#allocation3], %s1962_s20 }
 0x948   : > { %p2181_p0 = pnand %p2184_p13, %p2454_p6 }
 0x94a   : > { %p2182_p1 = pneg %p2181_p0 }
 0x94c   : > { %2309 = dma.done.wait (%p2182_p1), %s1963_s2, 128  }
 0x94d   : > { %2311 = vsyncadd (%p2182_p1), %s1963_s2, 4294967168  ;;  %p23_p2 = scmp.ge.s32.totalorder %s2437_s14, 4   ;;  %s2817_s25 = smov %s2318_s26 }
 0x94e   : > { %s2818_s26 = smov %s2322_s27  ;;  %s2819_s27 = smov %s2448_s17 }
 0x94f   : > { %s2820_s28 = smov %s2437_s14  ;;  %25 = sbr.rel (!%p23_p2) target bundleno = 7 (0x7), region = 107 }
 0x954   :  { %1968 = vsyncpa [#allocation3], 1 }
 0x955   :  { %1970 = vsyncpa [#allocation3 + $0x1], 1 }

// kernel: tpu_custom_call.1
= control target key start
LH: loop header
LB: loop body
LE: loop exit
PB: predicated region body
PF: predicated region fallthrough
CT: control target
= control target key end

     0   :  { %s2037_s0 = inlined_call_operand.vmem [shape: f32[2,8,32], index: 0, kind: input, shape index: {}]   ;;  %s2038_s1 = inlined_call_operand.vmem [shape: f32[1,32], index: 1, kind: input, shape index: {}]   ;;  %s2039_s2 = inlined_call_operand.vmem [shape: f32[1,32], index: 2, kind: input, shape index: {}]   ;;  %s2040_s3 = inlined_call_operand.vmem [shape: bf16[32,96], index: 3, kind: input, shape index: {}]   ;;  %s2041_s4 = inlined_call_operand.vmem [shape: f32[1,96], index: 4, kind: input, shape index: {}]   ;;  %s2042_s5 = inlined_call_operand.vmem [shape: bf16[32,32], index: 5, kind: input, shape index: {}]   ;;  %s2043_s6 = inlined_call_operand.vmem [shape: f32[1,32], index: 6, kind: input, shape index: {}]   ;;  %s2044_s7 = inlined_call_operand.vmem [shape: f32[1,32], index: 7, kind: input, shape index: {}]   ;;  %s2045_s8 = inlined_call_operand.vmem [shape: f32[1,32], index: 8, kind: input, shape index: {}]   ;;  %s2046_s9 = inlined_call_operand.vmem [shape: bf16[32,128], index: 9, kind: input, shape index: {}]   ;;  %s2047_s10 = inlined_call_operand.vmem [shape: f32[1,128], index: 10, kind: input, shape index: {}]   ;;  %s2048_s11 = inlined_call_operand.vmem [shape: bf16[128,32], index: 11, kind: input, shape index: {}]   ;;  %s2049_s12 = inlined_call_operand.vmem [shape: f32[1,32], index: 12, kind: input, shape index: {}]   ;;  %s2050_s13 = inlined_call_operand.hbm [shape: f32[2,8,32], index: 13, kind: output, shape index: {}]  }
   0x1   :  { %2051 = sst [smem:[#allocation5_spill]] %s2037_s0 }
   0x2   :  { %2052 = sst [smem:[#allocation6_spill]] %s2038_s1 }
   0x3   :  { %2053 = sst [smem:[#allocation7_spill]] %s2039_s2 }
   0x4   :  { %18 = vsyncpa [#allocation3], 0 }
   0x5   :  { %20 = vsyncpa [#allocation3 + $0x1], 0  ;;  %s1769_s25 = smov 0   ;;  %s1771_s26 = smov 0  }
   0x6   :  { %s1773_s27 = smov 0   ;;  %s1775_s28 = smov 0  }
   0x7 LB: > { %s1790_s29 = sadd.s32 4294967295, %s1680_s28   ;;  %s1360_s30 = sadd.s32 4294967294, %s1680_s28   ;;  %s1680_s28 = sphi %s1775_s28, %s2062_s28   ;;  %s1676_s27 = sphi %s1773_s27, %s2061_s27   ;;  %s1672_s26 = sphi %s1771_s26, %s2060_s26   ;;  %s1668_s25 = sphi %s1769_s25, %s2059_s25  }
   0x8   : > { %s1794_s14 = sadd.s32 1, %s1680_s28   ;;  %s311_s15 = sadd.s32 1, %s1676_s27 }
   0x9   : > { %s308_s16 = ssub.s32 %s1680_s28, %s1794_s14  ;;  %p321_p0 = scmp.ne.s32.totalorder %s1676_s27, %s1672_s26 }
   0xa   : > { %p309_p1 = scmp.eq.s32.totalorder %s308_s16, 0  ;;  %p322_p2 = scmp.eq.s32.totalorder %s1790_s29, 1 }
   0xb   : > { %p327_p3 = scmp.ne.s32.totalorder %s1672_s26, %s1668_s25  ;;  %p328_p4 = scmp.eq.s32.totalorder %s1360_s30, 1 }
   0xc   : > { %s1805_s17 = scalar_select %p309_p1, %s1676_s27, %s311_s15  }
   0xd   : > { %p1807_p5 = por %p322_p2, %p321_p0  ;;  %p1811_p6 = por %p328_p4, %p327_p3 }
   0xe   : > { %p1363_p7 = scmp.ge.s32.totalorder %s1680_s28, 1  ;;  %p389_p8 = scmp.lt.s32.totalorder %s1680_s28, 3 }
  0x10   : > { %p390_p9 = pnand %p1363_p7, %p389_p8 }
  0x11   : > { %p432_p10 = scmp.lt.s32.totalorder (!%p390_p9), %s1790_s29, 1  ;;  %s2056_s0 = sld [smem:[#allocation5_spill]] (!%p390_p9) }
  0x12   : > { %393 = sbr.rel (%p390_p9) target bundleno = 2196 (0x894), region = 72  ;;  %s2057_s1 = sld [smem:[#allocation6_spill]] (!%p390_p9) }
  0x13   : > { %s2058_s2 = sld [smem:[#allocation7_spill]] (!%p390_p9)  ;;  %s1684_s16 = smov (!%p390_p9), 96  }
  0x14   : > { %s1687_s22 = smov (!%p390_p9), 80   ;;  %s1688_s23 = smov (!%p390_p9), 112  }
  0x15   : > { %s1690_s30 = smov (!%p390_p9), 104   ;;  %s1691_s15 = smov (!%p390_p9), 64  }
  0x17   : > { %s433_s20 = scalar_select %p432_p10, %s1790_s29, 1  ;;  %vm440_vm0 = vcmask 261120   ;;  %v1584_v4 = vld [vmem:[%s2040_s3 + $0x8] sm:$0xff]   ;;  %v1682_v5 = vmov 0.0   ;;  %vm1683_vm1 = vmmov 0   ;;  %v1585_v6 = vld [vmem:[%s2040_s3] sm:$0xff]  }
  0x18   : > { %1437 = vmatprep.subr.bf16.mxu0 %v1682_v5  ;;  %1441 = vmatprep.mubr.msk.bf16.mxu0 %vm1683_vm1, %v1682_v5  ;;  %v1366_v17 = vld [vmem:[%s2057_s1] ss:$0 sm:$0xff]  ;;  %vm545_vm2 = vcmask 64512   ;;  %vm609_vm3 = vcmask 1043456   ;;  %vm997_vm4 = vcmask 130048   ;;  %vm999_vm5 = vcmask 195584  }
  0x19   : > { %s1365_s21 = sshll.u32 %s433_s20, 3  ;;  %1438 = vmatpush3.bf16.msra.mxu0 %v1584_v4  ;;  %1457 = vmatprep.subr.bf16.mxu1 %v1682_v5  ;;  %v1367_v19 = vld [vmem:[%s2058_s2] ss:$0 sm:$0xff]  ;;  %s1685_s20 = smov 120  }
  0x1a   : > { %s435_s24 = scalar_lea.vmem %s2056_s0, %s1365_s21  ;;  %1439 = vmatprep.subr.bf16.mxu0 %v1682_v5  ;;  %1459 = vmatprep.mubr.msk.bf16.mxu1 %vm1683_vm1, %v1682_v5  ;;  %v1368_v23 = vld [vmem:[%s2041_s4] ss:$0 sm:$0xff]  ;;  %s1686_s21 = smov 88  }
  0x1b   : > { %v1822_v0 = vld [vmem:[%s435_s24] sm:$0xff]  ;;  %s1689_s24 = smov 72  }
  0x1c   : > { %v441_v1 = vsel %vm440_vm0, %v1822_v0, 0.0  ;;  %v446_v2 = vmul.f32 %v1822_v0, %v1822_v0 }
  0x1d   : > { %442 = vadd.xlane.f32.xlu0 %v441_v1  ;;  %1440 = vmatpush3.bf16.msra.mxu0 %v1585_v6 }
  0x1e   : > { %v447_v3 = vsel %vm440_vm0, %v446_v2, 0.0  ;;  %1445 = vmatprep.subr.bf16.mxu0 %v1682_v5 }
  0x21   : > { %448 = vadd.xlane.f32.xlu0 %v447_v3 }
  0xa6   : > { %v443_v7 = vpop.xlane.xlu0 %442 }
  0xa7   : > { %v445_v8 = vmul.f32 0.03125, %v443_v7 }
  0xa9   : > { %v451_v10 = vmul.f32 %v445_v8, %v445_v8  ;;  %v454_v15 = vsub.f32 %v1822_v0, %v445_v8 }
  0xaa   : > { %v449_v9 = vpop.xlane.xlu0 %448 }
  0xab   : > { %v450_v11 = vmul.f32 0.03125, %v449_v9 }
  0xad   : > { %v452_v12 = vsub.f32 %v450_v11, %v451_v10 }
  0xaf   : > { %v453_v13 = vmax.f32 %v452_v12, 0.0 }
  0xb1   : > { %v455_v14 = vadd.f32 1e-05, %v453_v13 }
  0xb3   : > { %1598 = vrsqrt.f32 %v455_v14 }
  0xc0   : > { %v1599_v16 = vpop.eup %1598 }
  0xc1   : > { %v457_v18 = vmul.f32 %v1599_v16, %v454_v15 }
  0xc3   : > { %v464_v20 = vmul.f32 %v1366_v17, %v457_v18 }
  0xc5   : > { %v471_v21 = vadd.f32 %v1367_v19, %v464_v20 }
  0xc7   : > { %v472_v22 = vpack.c.bf16 %v471_v21, %v471_v21 }
  0xc9   : > { %1442 = vmatmul.mubr.msk.bf16.vlgmr.msra.gmra.mxu0 %vm440_vm0, %v472_v22 }
  0xca   : > { %1447 = vmatprep.mubr.msk.bf16.mxu0 %vm1683_vm1, %v1682_v5 }
 0x189   : > { %v533_v24 = vpop.f32.mrf.mxu0 }
 0x18a   : > { %v534_v25 = vadd.f32 %v1368_v23, %v533_v24 }
 0x18b   : > { %v1443_v26 = vpop.f32.mrf.mxu0 }
 0x18c   : > { %v539_v27 = vmul.f32 0.35355338, %v534_v25  ;;  %v1856_v28 = vpack.c.bf16 %v534_v25, %v534_v25 }
 0x18d   : > { %v536_v29 = vpop.f32.mrf.mxu0 }
 0x18e   : > { %v540_v30 = vpack.c.bf16 %v539_v27, %v539_v27  ;;  %543 = vrot.lane.b32.xlu1 %v1856_v28, %s1684_s16  ;;  %s1692_s16 = smov 56  }
 0x18f   : > { %v1444_v31 = vpop.f32.mrf.mxu0 }
 0x190   : > { %654 = vrot.lane.b32.xlu0 %v540_v30, %s1685_s20  ;;  %s1693_s20 = smov 48  }
 0x192   : > { %656 = vrot.lane.b32.xlu1 %v1856_v28, %s1686_s21  ;;  %s1694_s21 = smov 40  }
 0x196   : > { %766 = vrot.lane.b32.xlu1 %v1856_v28, %s1687_s22  ;;  %s1695_s22 = smov 8  }
 0x19a   : > { %764 = vrot.lane.b32.xlu1 %v540_v30, %s1688_s23 }
 0x19e   : > { %876 = vrot.lane.b32.xlu1 %v1856_v28, %s1689_s24 }
 0x1a2   : > { %874 = vrot.lane.b32.xlu1 %v540_v30, %s1690_s30  ;;  %s429_s30 = sand.u32 1, %s1672_s26  }
 0x200   : > { %v544_v32 = vpop.permute.xlu1 %543 }
 0x201   : > { %v550_v33 = vsel %vm545_vm2, %v544_v32, 0 }
 0x202   : > { %1446 = vmatpush3.bf16.xpose.msra.mxu0 %v550_v33  ;;  %v655_v37 = vpop.permute.xlu0 %654 }
 0x203   : > { %1451 = vmatprep.subr.bf16.mxu0 %v1682_v5 }
 0x204   : > { %v657_v34 = vpop.permute.xlu1 %656 }
 0x205   : > { %v662_v35 = vsel %vm545_vm2, %v657_v34, 0 }
 0x206   : > { %1458 = vmatpush3.bf16.xpose.msra.mxu1 %v662_v35 }
 0x207   : > { %1469 = vmatprep.subr.bf16.mxu1 %v1682_v5 }
 0x208   : > { %v767_v36 = vpop.permute.xlu1 %766 }
 0x209   : > { %1448 = vmatmul.mubr.msk.bf16.vlgmr.msra.gmra.mxu0 %vm545_vm2, %v540_v30  ;;  %v772_v39 = vsel %vm545_vm2, %v767_v36, 0 }
 0x20a   : > { %1453 = vmatprep.mubr.msk.bf16.mxu0 %vm1683_vm1, %v1682_v5 }
 0x20c   : > { %v765_v38 = vpop.permute.xlu1 %764 }
 0x20d   : > { %1460 = vmatmul.mubr.msk.bf16.vlgmr.msra.gmra.mxu1 %vm545_vm2, %v655_v37 }
 0x20e   : > { %1470 = vmatpush3.bf16.xpose.msra.mxu1 %v772_v39  ;;  %1471 = vmatprep.mubr.msk.bf16.mxu1 %vm1683_vm1, %v1682_v5 }
 0x20f   : > { %1481 = vmatprep.subr.bf16.mxu1 %v1682_v5 }
 0x210   : > { %v877_v40 = vpop.permute.xlu1 %876 }
 0x211   : > { %v882_v41 = vsel %vm545_vm2, %v877_v40, 0 }
 0x214   : > { %v875_v42 = vpop.permute.xlu1 %874 }
 0x215   : > { %1472 = vmatmul.mubr.msk.bf16.vlgmr.msra.gmra.mxu1 %vm545_vm2, %v765_v38 }
 0x216   : > { %1482 = vmatpush3.bf16.xpose.msra.mxu1 %v882_v41  ;;  %1483 = vmatprep.mubr.msk.bf16.mxu1 %vm1683_vm1, %v1682_v5 }
 0x217   : > { %1493 = vmatprep.subr.bf16.mxu1 %v1682_v5 }
 0x21d   : > { %1484 = vmatmul.mubr.msk.bf16.vlgmr.msra.gmra.mxu1 %vm545_vm2, %v875_v42 }
 0x21e   : > { %1497 = vmatprep.mubr.msk.bf16.mxu1 %vm1683_vm1, %v1682_v5 }
 0x2c9   : > { %v586_v43 = vpop.f32.mrf.mxu0 }
 0x2ca   : > { %v592_v44 = vsel %vm545_vm2, %v586_v43, -inf }
 0x2cb   : > { %593 = vmax.xlane.f32.xlu1 %v592_v44  ;;  %v1449_v45 = vpop.f32.mrf.mxu0 }
 0x2cd   : > { %v589_v46 = vpop.f32.mrf.mxu0  ;;  %v698_v47 = vpop.f32.mrf.mxu1 }
 0x2ce   : > { %v704_v48 = vsel %vm545_vm2, %v698_v47, -inf }
 0x2cf   : > { %705 = vmax.xlane.f32.xlu0 %v704_v48  ;;  %v1450_v49 = vpop.f32.mrf.mxu0  ;;  %v1461_v50 = vpop.f32.mrf.mxu1 }
 0x2d1   : > { %v701_v51 = vpop.f32.mrf.mxu1 }
 0x2d3   : > { %v1462_v52 = vpop.f32.mrf.mxu1 }
 0x2d5   : > { %v808_v53 = vpop.f32.mrf.mxu1 }
 0x2d6   : > { %v814_v54 = vsel %vm545_vm2, %v808_v53, -inf }
 0x2d7   : > { %v1473_v55 = vpop.f32.mrf.mxu1  ;;  %815 = vmax.xlane.f32.xlu1 %v814_v54  ;;  %v1587_v54 = vld [vmem:[%s2042_s5] sm:$0xff]  }
 0x2d9   : > { %v811_v56 = vpop.f32.mrf.mxu1 }
 0x2db   : > { %v1474_v57 = vpop.f32.mrf.mxu1 }
 0x2dd   : > { %v918_v58 = vpop.f32.mrf.mxu1 }
 0x2de   : > { %v924_v59 = vsel %vm545_vm2, %v918_v58, -inf }
 0x2df   : > { %925 = vmax.xlane.f32.xlu0 %v924_v59  ;;  %v1485_v60 = vpop.f32.mrf.mxu1 }
 0x2e1   : > { %v921_v61 = vpop.f32.mrf.mxu1 }
 0x2e3   : > { %v1486_v62 = vpop.f32.mrf.mxu1 }
 0x354   : > { %v594_v63 = vpop.xlane.xlu1 %593 }
 0x355   : > { %v595_v1 = vsub.f32 %v586_v43, %v594_v63 }
 0x357   : > { %v596_v2 = vmul.f32 1.442695, %v595_v1 }
 0x358   : > { %v706_v3 = vpop.xlane.xlu0 %705 }
 0x359   : > { %1600 = vpow2.f32 %v596_v2  ;;  %v707_v4 = vsub.f32 %v698_v47, %v706_v3 }
 0x35b   : > { %v708_v6 = vmul.f32 1.442695, %v707_v4 }
 0x35d   : > { %1602 = vpow2.f32 %v708_v6 }
 0x360   : > { %v816_v16 = vpop.xlane.xlu1 %815 }
 0x361   : > { %v817_v17 = vsub.f32 %v808_v53, %v816_v16  ;;  %v1586_v53 = vld [vmem:[%s2042_s5 + $0x8] sm:$0xff]  }
 0x362   : > { %1494 = vmatpush3.bf16.msra.mxu1 %v1586_v53 }
 0x363   : > { %v818_v18 = vmul.f32 1.442695, %v817_v17  ;;  %1495 = vmatprep.subr.bf16.mxu1 %v1682_v5 }
 0x366   : > { %v1601_v7 = vpop.eup %1600  ;;  %1496 = vmatpush3.bf16.msra.mxu1 %v1587_v54  ;;  %v1390_v54 = vld [vmem:[%s2049_s12] ss:$0 sm:$0xff] }
 0x367   : > { %v598_v8 = vsel %vm545_vm2, %v1601_v7, 0.0  ;;  %1509 = vmatprep.subr.bf16.mxu1 %v1682_v5 }
 0x368   : > { %v926_v9 = vpop.xlane.xlu0 %925  ;;  %599 = vadd.xlane.f32.xlu1 %v598_v8  ;;  %v1380_v8 = vld [vmem:[%s2043_s6] ss:$0 sm:$0xff] }
 0x369   : > { %v927_v10 = vsub.f32 %v918_v58, %v926_v9 }
 0x36a   : > { %v1603_v11 = vpop.eup %1602 }
 0x36b   : > { %v928_v12 = vmul.f32 1.442695, %v927_v10  ;;  %v710_v13 = vsel %vm545_vm2, %v1603_v11, 0.0 }
 0x36c   : > { %711 = vadd.xlane.f32.xlu0 %v710_v13 }
 0x36d   : > { %1604 = vpow2.f32 %v928_v12 }
 0x36e   : > { %1606 = vpow2.f32 %v818_v18  ;;  %v1588_v18 = vld [vmem:[%s2046_s9 + $0x8] sm:$0xff]  }
 0x379   : > { %604 = vrot.lane.b32.xlu1 %v1856_v28, %s1691_s15  ;;  %s1364_s15 = sshll.u32 %s429_s30, 3 }
 0x37a   : > { %v1605_v14 = vpop.eup %1604 }
 0x37b   : > { %v930_v15 = vsel %vm545_vm2, %v1605_v14, 0.0  ;;  %v1607_v19 = vpop.eup %1606 }
 0x37c   : > { %931 = vadd.xlane.f32.xlu0 %v930_v15  ;;  %v820_v20 = vsel %vm545_vm2, %v1607_v19, 0.0 }
 0x392   : > { %716 = vrot.lane.b32.xlu0 %v1856_v28, %s1692_s16  ;;  %s1696_s16 = smov 16  }
 0x39d   : > { %821 = vadd.xlane.f32.xlu1 %v820_v20  ;;  %v1591_v20 = vld [vmem:[%s2048_s11 + $0x30] sm:$0xff]  }
 0x3ae   : > { %826 = vrot.lane.b32.xlu1 %v1856_v28, %s1693_s20  ;;  %s1697_s20 = smov 24  }
 0x3b2   : > { %936 = vrot.lane.b32.xlu1 %v1856_v28, %s1694_s21  ;;  %s1400_s21 = sshll.u32 %s1790_s29, 7  ;;  %s1288_s29 = scalar_lea.sflag [#allocation3], %s429_s30 }
 0x3b3   : > { %s1995_s1 = scalar_lea.hbm %s2050_s13, %s1400_s21 }
 0x3f1   : > { %v600_v21 = vpop.xlane.xlu1 %599 }
 0x3f2   : > { %1608 = vrcp.f32 %v600_v21 }
 0x3f5   : > { %v712_v22 = vpop.xlane.xlu0 %711  ;;  %v605_v23 = vpop.permute.xlu1 %604 }
 0x3f6   : > { %v611_v24 = vsel %vm609_vm3, %v605_v23, 0  ;;  %1610 = vrcp.f32 %v712_v22 }
 0x3f7   : > { %1452 = vmatpush3.bf16.msra.mxu0 %v611_v24 }
 0x3f8   : > { %1463 = vmatprep.subr.bf16.mxu0 %v1682_v5 }
 0x3ff   : > { %v1609_v25 = vpop.eup %1608 }
 0x400   : > { %v602_v26 = vmul.f32 %v1609_v25, %v1601_v7 }
 0x402   : > { %v603_v27 = vpack.c.bf16 %v602_v26, %v602_v26 }
 0x403   : > { %v1611_v29 = vpop.eup %1610 }
 0x404   : > { %1454 = vmatmul.mubr.msk.bf16.vlgmr.msra.gmra.mxu0 %vm545_vm2, %v603_v27  ;;  %v714_v28 = vmul.f32 %v1611_v29, %v1603_v11 }
 0x405   : > { %v932_v30 = vpop.xlane.xlu0 %931  ;;  %1465 = vmatprep.mubr.msk.bf16.mxu0 %vm1683_vm1, %v1682_v5 }
 0x406   : > { %v715_v33 = vpack.c.bf16 %v714_v28, %v714_v28 }
 0x409   : > { %v717_v31 = vpop.permute.xlu0 %716 }
 0x40a   : > { %v722_v32 = vsel %vm609_vm3, %v717_v31, 0  ;;  %v1384_v31 = vld [vmem:[%s2044_s7] ss:$0 sm:$0xff] }
 0x40b   : > { %1464 = vmatpush3.bf16.msra.mxu0 %v722_v32 }
 0x40c   : > { %1475 = vmatprep.subr.bf16.mxu0 %v1682_v5 }
 0x40e   : > { %1466 = vmatmul.mubr.msk.bf16.vlgmr.msra.gmra.mxu0 %vm545_vm2, %v715_v33  ;;  %v1385_v33 = vld [vmem:[%s2045_s8] ss:$0 sm:$0xff] }
 0x40f   : > { %1477 = vmatprep.mubr.msk.bf16.mxu0 %vm1683_vm1, %v1682_v5 }
 0x426   : > { %v822_v34 = vpop.xlane.xlu1 %821 }
 0x427   : > { %1612 = vrcp.f32 %v822_v34 }
 0x428   : > { %1614 = vrcp.f32 %v932_v30 }
 0x42a   : > { %v827_v35 = vpop.permute.xlu1 %826 }
 0x42b   : > { %v832_v36 = vsel %vm609_vm3, %v827_v35, 0 }
 0x42c   : > { %1476 = vmatpush3.bf16.msra.mxu0 %v832_v36 }
 0x42d   : > { %1487 = vmatprep.subr.bf16.mxu0 %v1682_v5 }
 0x42e   : > { %v937_v39 = vpop.permute.xlu1 %936 }
 0x42f   : > { %v942_v42 = vsel %vm609_vm3, %v937_v39, 0  ;;  %v1594_v39 = vld [vmem:[%s2048_s11 + $0x18] sm:$0xff]  }
 0x434   : > { %v1613_v37 = vpop.eup %1612 }
 0x435   : > { %v824_v38 = vmul.f32 %v1613_v37, %v1607_v19  ;;  %v1615_v41 = vpop.eup %1614  ;;  %v1590_v19 = vld [vmem:[%s2048_s11 + $0x38] sm:$0xff]   ;;  %v1592_v37 = vld [vmem:[%s2048_s11 + $0x28] sm:$0xff]  }
 0x436   : > { %v934_v43 = vmul.f32 %v1615_v41, %v1605_v14  ;;  %v1596_v41 = vld [vmem:[%s2048_s11 + $0x8] sm:$0xff]  }
 0x437   : > { %v825_v40 = vpack.c.bf16 %v824_v38, %v824_v38  ;;  %v1593_v38 = vld [vmem:[%s2048_s11 + $0x20] sm:$0xff]  }
 0x438   : > { %v935_v44 = vpack.c.bf16 %v934_v43, %v934_v43  ;;  %v1386_v43 = vld [vmem:[%s2047_s10] ss:$0 sm:$0xff] }
 0x439   : > { %1478 = vmatmul.mubr.msk.bf16.vlgmr.msra.gmra.mxu0 %vm545_vm2, %v825_v40  ;;  %v1595_v40 = vld [vmem:[%s2048_s11 + $0x10] sm:$0xff]  }
 0x43a   : > { %1488 = vmatpush3.bf16.msra.mxu0 %v942_v42  ;;  %1489 = vmatprep.mubr.msk.bf16.mxu0 %vm1683_vm1, %v1682_v5  ;;  %v1597_v42 = vld [vmem:[%s2048_s11] sm:$0xff]  }
 0x43b   : > { %1501 = vmatprep.subr.bf16.mxu0 %v1682_v5 }
 0x441   : > { %1490 = vmatmul.mubr.msk.bf16.vlgmr.msra.gmra.mxu0 %vm545_vm2, %v935_v44 }
 0x442   : > { %1505 = vmatprep.mubr.msk.bf16.mxu0 %vm1683_vm1, %v1682_v5  ;;  %1502 = vmatpush3.bf16.msra.mxu0 %v1588_v18 }
 0x443   : > { %1503 = vmatprep.subr.bf16.mxu0 %v1682_v5 }
 0x4c4   : > { %v647_v45 = vpop.f32.mrf.mxu0 }
 0x4c6   : > { %v1455_v46 = vpop.f32.mrf.mxu0 }
 0x4c8   : > { %v650_v47 = vpop.f32.mrf.mxu0 }
 0x4ca   : > { %v1456_v48 = vpop.f32.mrf.mxu0 }
 0x4ce   : > { %v758_v49 = vpop.f32.mrf.mxu0 }
 0x4cf   : > { %985 = vrot.lane.b32.xlu0 %v758_v49, %s1695_s22  ;;  %s431_s22 = scalar_lea.vmem [#allocation2], %s1364_s15 }
 0x4d0   : > { %v1467_v50 = vpop.f32.mrf.mxu0  ;;  %s1301_s23 = sshll.u32 %s431_s22, 4  ;;  %s1997_s23 = int_to_ptr.vmem [resolvable:$true] %s1301_s23 }
 0x4d1   : > { %s1620_s15 = scalar_lea.vmem %s1997_s23, 128 }
 0x4d2   : > { %v761_v51 = vpop.f32.mrf.mxu0  ;;  %p1621_p11 = scmp.ne.s32.totalorder %s1997_s23, %s1620_s15 }
 0x4d4   : > { %v1468_v52 = vpop.f32.mrf.mxu0  ;;  %p1622_p12 = pnand %p1621_p11, %p1807_p5 }
 0x4d6   : > { %p1623_p13 = pneg %p1622_p12 }
 0x4f9   : > { %v868_v55 = vpop.f32.mrf.mxu0 }
 0x4fa   : > { %989 = vrot.lane.b32.xlu1 %v868_v55, %s1696_s16  ;;  %s1698_s16 = smov [#allocation2]  }
 0x4fb   : > { %v1479_v56 = vpop.f32.mrf.mxu0 }
 0x4fd   : > { %v871_v57 = vpop.f32.mrf.mxu0 }
 0x4ff   : > { %v1480_v58 = vpop.f32.mrf.mxu0 }
 0x501   : > { %v978_v59 = vpop.f32.mrf.mxu0 }
 0x502   : > { %993 = vrot.lane.b32.xlu0 %v978_v59, %s1697_s20  ;;  %s1624_s20 = sshll.u32 %s1698_s16, 4  ;;  %s1625_s20 = int_to_ptr.vmem [resolvable:$false] %s1624_s20 }
 0x503   : > { %v1491_v60 = vpop.f32.mrf.mxu0  ;;  %s1626_s0 = scalar_lea.vmem %s1625_s20, 256  ;;  %p1627_p0 = scmp.lt.s32.totalorder %s1997_s23, %s1625_s20 }
 0x504   : > { %p1628_p1 = scmp.lt.s32.totalorder %s1626_s0, %s1620_s15 }
 0x505   : > { %v981_v61 = vpop.f32.mrf.mxu0 }
 0x506   : > { %p1629_p2 = por %p1628_p1, %p1627_p0 }
 0x507   : > { %v1492_v62 = vpop.f32.mrf.mxu0 }
 0x508   : > { %p1630_p3 = pnand %p1629_p2, %p1623_p13 }
 0x541   : > { %v986_v63 = vpop.permute.xlu0 %985 }
 0x542   : > { %v996_v2 = vsel %vm545_vm2, %v647_v45, %v986_v63 }
 0x56c   : > { %v990_v1 = vpop.permute.xlu1 %989 }
 0x56d   : > { %v998_v3 = vsel %vm997_vm4, %v996_v2, %v990_v1 }
 0x574   : > { %v994_v4 = vpop.permute.xlu0 %993 }
 0x575   : > { %v1000_v6 = vsel %vm999_vm5, %v998_v3, %v994_v4 }
 0x576   : > { %v1001_v7 = vpack.c.bf16 %v1000_v6, %v1000_v6 }
 0x578   : > { %1498 = vmatmul.mubr.msk.bf16.vlgmr.msra.gmra.mxu1 %vm440_vm0, %v1001_v7 }
 0x579   : > { %1525 = vmatprep.mubr.msk.bf16.mxu1 %vm1683_vm1, %v1682_v5  ;;  %1510 = vmatpush3.bf16.msra.mxu1 %v1590_v19 }
 0x57a   : > { %1511 = vmatprep.subr.bf16.mxu1 %v1682_v5 }
 0x57d   : > { %1512 = vmatpush3.bf16.msra.mxu1 %v1591_v20 }
 0x57e   : > { %1513 = vmatprep.subr.bf16.mxu1 %v1682_v5 }
 0x581   : > { %1514 = vmatpush3.bf16.msra.mxu1 %v1592_v37 }
 0x582   : > { %1515 = vmatprep.subr.bf16.mxu1 %v1682_v5 }
 0x585   : > { %1516 = vmatpush3.bf16.msra.mxu1 %v1593_v38 }
 0x586   : > { %1517 = vmatprep.subr.bf16.mxu1 %v1682_v5 }
 0x589   : > { %1518 = vmatpush3.bf16.msra.mxu1 %v1594_v39 }
 0x58a   : > { %1519 = vmatprep.subr.bf16.mxu1 %v1682_v5 }
 0x58d   : > { %1520 = vmatpush3.bf16.msra.mxu1 %v1595_v40 }
 0x58e   : > { %1521 = vmatprep.subr.bf16.mxu1 %v1682_v5 }
 0x591   : > { %1522 = vmatpush3.bf16.msra.mxu1 %v1596_v41 }
 0x592   : > { %1523 = vmatprep.subr.bf16.mxu1 %v1682_v5 }
 0x595   : > { %1524 = vmatpush3.bf16.msra.mxu1 %v1597_v42 }
 0x638   : > { %v1062_v9 = vpop.f32.mrf.mxu1 }
 0x639   : > { %v1063_v10 = vadd.f32 %v1380_v8, %v1062_v9 }
 0x63a   : > { %v1499_v11 = vpop.f32.mrf.mxu1 }
 0x63b   : > { %v1930_v12 = vadd.f32 %v1063_v10, %v1822_v0  ;;  %v1589_v0 = vld [vmem:[%s2046_s9] sm:$0xff]  }
 0x63c   : > { %v1065_v13 = vpop.f32.mrf.mxu1  ;;  %1504 = vmatpush3.bf16.msra.mxu0 %v1589_v0 }
 0x63d   : > { %v1071_v14 = vsel %vm440_vm0, %v1930_v12, 0.0  ;;  %v1075_v15 = vmul.f32 %v1930_v12, %v1930_v12 }
 0x63e   : > { %1072 = vadd.xlane.f32.xlu1 %v1071_v14  ;;  %v1500_v16 = vpop.f32.mrf.mxu1 }
 0x63f   : > { %v1076_v17 = vsel %vm440_vm0, %v1075_v15, 0.0 }
 0x640   : > { %1077 = vadd.xlane.f32.xlu0 %v1076_v17 }
 0x6c7   : > { %v1073_v21 = vpop.xlane.xlu1 %1072 }
 0x6c8   : > { %v1074_v22 = vmul.f32 0.03125, %v1073_v21 }
 0x6c9   : > { %v1078_v23 = vpop.xlane.xlu0 %1077 }
 0x6ca   : > { %v1080_v24 = vmul.f32 %v1074_v22, %v1074_v22  ;;  %v1079_v25 = vmul.f32 0.03125, %v1078_v23  ;;  %v1083_v30 = vsub.f32 %v1930_v12, %v1074_v22 }
 0x6cc   : > { %v1081_v26 = vsub.f32 %v1079_v25, %v1080_v24 }
 0x6ce   : > { %v1082_v27 = vmax.f32 %v1081_v26, 0.0 }
 0x6d0   : > { %v1084_v29 = vadd.f32 1e-05, %v1082_v27 }
 0x6d2   : > { %1616 = vrsqrt.f32 %v1084_v29 }
 0x6df   : > { %v1617_v28 = vpop.eup %1616 }
 0x6e0   : > { %v1086_v32 = vmul.f32 %v1617_v28, %v1083_v30 }
 0x6e2   : > { %v1093_v34 = vmul.f32 %v1384_v31, %v1086_v32 }
 0x6e4   : > { %v1100_v35 = vadd.f32 %v1385_v33, %v1093_v34 }
 0x6e6   : > { %v1101_v36 = vpack.c.bf16 %v1100_v35, %v1100_v35 }
 0x6e8   : > { %1506 = vmatmul.mubr.msk.bf16.vlgmr.msra.gmra.mxu0 %vm440_vm0, %v1101_v36 }
 0x7a8   : > { %v1162_v44 = vpop.f32.mrf.mxu0 }
 0x7a9   : > { %v1163_v45 = vadd.f32 %v1386_v43, %v1162_v44 }
 0x7aa   : > { %v1507_v46 = vpop.f32.mrf.mxu0 }
 0x7ab   : > { %v1169_v47 = vmul.f32 0.70710677, %v1163_v45  ;;  %v1168_v5 = vmul.f32 0.5, %v1163_v45 }
 0x7ac   : > { %v1165_v48 = vpop.f32.mrf.mxu0 }
 0x7ad   : > { %1618 = verf.f32 %v1169_v47 }
 0x7ae   : > { %v1508_v49 = vpop.f32.mrf.mxu0 }
 0x7ba   : > { %v1619_v50 = vpop.eup %1618 }
 0x7bb   : > { %v1171_v51 = vadd.f32 1.0, %v1619_v50 }
 0x7bd   : > { %v1172_v52 = vmul.f32 %v1171_v51, %v1168_v5 }
 0x7bf   : > { %v1173_v53 = vpack.c.bf16 %v1172_v52, %v1172_v52 }
 0x7c1   : > { %1526 = vmatmul.mubr.bf16.vlgmr.msra.gmra.mxu1 %v1173_v53 }
 0x881   : > { %v1279_v55 = vpop.f32.mrf.mxu1 }
 0x882   : > { %v1280_v56 = vadd.f32 %v1390_v54, %v1279_v55 }
 0x883   : > { %v1527_v57 = vpop.f32.mrf.mxu1 }
 0x884   : > { %v1285_v58 = vadd.f32 %v1280_v56, %v1930_v12 }
 0x885   : > { %v1282_v59 = vpop.f32.mrf.mxu1 }
 0x886   : > { %1286 = vst.msk [vmem:[%s431_s22] sm:$0xff] %vm440_vm0, %v1285_v58 }
 0x887   : > { %v1528_v60 = vpop.f32.mrf.mxu1 }
 0x888   : > { %1633 = shalt.err (!%p1630_p3)
}
 0x889   : > { %s1634_s21 = scalar_lea.hbm %s1995_s1, 128  ;;  %s1638_s24 = scalar_lea.hbm %s2050_s13, 256 }
 0x88a   : > { %p1635_p4 = scmp.ne.s32.totalorder %s1995_s1, %s1634_s21  ;;  %p1639_p9 = scmp.lt.s32.totalorder %s1995_s1, %s2050_s13 }
 0x88b   : > { %p1640_p10 = scmp.lt.s32.totalorder %s1638_s24, %s1634_s21 }
 0x88c   : > { %p1636_p7 = pnand %p1635_p4, %p1807_p5 }
 0x88d   : > { %p1641_p11 = por %p1640_p10, %p1639_p9 }
 0x88e   : > { %p1637_p8 = pneg %p1636_p7 }
 0x890   : > { %p1642_p12 = pnand %p1641_p11, %p1637_p8 }
 0x892   : > { %1645 = shalt.err (!%p1642_p12)
}
 0x893   : > { %1529 = dma.vmem_to_hbm [thread:$0]  (%p1807_p5), %s1997_s23, 128, %s1995_s1, %s1288_s29  }
 0x894 PF: > { %p1535_p13 = scmp.ge.s32.totalorder %s1680_s28, 2  ;;  %s1313_s15 = sand.u32 1, %s1668_s25  }
 0x895   : > { %s1314_s2 = scalar_lea.sflag [#allocation3], %s1313_s15 }
 0x896   : > { %p1532_p0 = pnand %p1535_p13, %p1811_p6 }
 0x898   : > { %p1533_p1 = pneg %p1532_p0 }
 0x89a   : > { %1663 = dma.done.wait (%p1533_p1), %s1314_s2, 128  }
 0x89b   : > { %1665 = vsyncadd (%p1533_p1), %s1314_s2, 4294967168  ;;  %p23_p2 = scmp.ge.s32.totalorder %s1794_s14, 4   ;;  %s2059_s25 = smov %s1672_s26 }
 0x89c   : > { %s2060_s26 = smov %s1676_s27  ;;  %s2061_s27 = smov %s1805_s17 }
 0x89d   : > { %s2062_s28 = smov %s1794_s14  ;;  %25 = sbr.rel (!%p23_p2) target bundleno = 7 (0x7), region = 107 }
 0x8a2   :  { %1319 = vsyncpa [#allocation3], 1 }
 0x8a3   :  { %1321 = vsyncpa [#allocation3 + $0x1], 1 }

// kernel: tpu_custom_call.1
= control target key start
LH: loop header
LB: loop body
LE: loop exit
PB: predicated region body
PF: predicated region fallthrough
CT: control target
= control target key end

     0   :  { %s2037_s0 = inlined_call_operand.vmem [shape: f32[2,8,32], index: 0, kind: input, shape index: {}]   ;;  %s2038_s1 = inlined_call_operand.vmem [shape: f32[1,32], index: 1, kind: input, shape index: {}]   ;;  %s2039_s2 = inlined_call_operand.vmem [shape: f32[1,32], index: 2, kind: input, shape index: {}]   ;;  %s2040_s3 = inlined_call_operand.vmem [shape: bf16[32,96], index: 3, kind: input, shape index: {}]   ;;  %s2041_s4 = inlined_call_operand.vmem [shape: f32[1,96], index: 4, kind: input, shape index: {}]   ;;  %s2042_s5 = inlined_call_operand.vmem [shape: bf16[32,32], index: 5, kind: input, shape index: {}]   ;;  %s2043_s6 = inlined_call_operand.vmem [shape: f32[1,32], index: 6, kind: input, shape index: {}]   ;;  %s2044_s7 = inlined_call_operand.vmem [shape: f32[1,32], index: 7, kind: input, shape index: {}]   ;;  %s2045_s8 = inlined_call_operand.vmem [shape: f32[1,32], index: 8, kind: input, shape index: {}]   ;;  %s2046_s9 = inlined_call_operand.vmem [shape: bf16[32,128], index: 9, kind: input, shape index: {}]   ;;  %s2047_s10 = inlined_call_operand.vmem [shape: f32[1,128], index: 10, kind: input, shape index: {}]   ;;  %s2048_s11 = inlined_call_operand.vmem [shape: bf16[128,32], index: 11, kind: input, shape index: {}]   ;;  %s2049_s12 = inlined_call_operand.vmem [shape: f32[1,32], index: 12, kind: input, shape index: {}]   ;;  %s2050_s13 = inlined_call_operand.hbm [shape: f32[2,8,32], index: 13, kind: output, shape index: {}]  }
   0x1   :  { %2051 = sst [smem:[#allocation5_spill]] %s2037_s0 }
   0x2   :  { %2052 = sst [smem:[#allocation6_spill]] %s2038_s1 }
   0x3   :  { %2053 = sst [smem:[#allocation7_spill]] %s2039_s2 }
   0x4   :  { %18 = vsyncpa [#allocation3], 0 }
   0x5   :  { %20 = vsyncpa [#allocation3 + $0x1], 0  ;;  %s1769_s25 = smov 0   ;;  %s1771_s26 = smov 0  }
   0x6   :  { %s1773_s27 = smov 0   ;;  %s1775_s28 = smov 0  }
   0x7 LB: > { %s1790_s29 = sadd.s32 4294967295, %s1680_s28   ;;  %s1360_s30 = sadd.s32 4294967294, %s1680_s28   ;;  %s1680_s28 = sphi %s1775_s28, %s2062_s28   ;;  %s1676_s27 = sphi %s1773_s27, %s2061_s27   ;;  %s1672_s26 = sphi %s1771_s26, %s2060_s26   ;;  %s1668_s25 = sphi %s1769_s25, %s2059_s25  }
   0x8   : > { %s1794_s14 = sadd.s32 1, %s1680_s28   ;;  %s311_s15 = sadd.s32 1, %s1676_s27 }
   0x9   : > { %s308_s16 = ssub.s32 %s1680_s28, %s1794_s14  ;;  %p321_p0 = scmp.ne.s32.totalorder %s1676_s27, %s1672_s26 }
   0xa   : > { %p309_p1 = scmp.eq.s32.totalorder %s308_s16, 0  ;;  %p322_p2 = scmp.eq.s32.totalorder %s1790_s29, 1 }
   0xb   : > { %p327_p3 = scmp.ne.s32.totalorder %s1672_s26, %s1668_s25  ;;  %p328_p4 = scmp.eq.s32.totalorder %s1360_s30, 1 }
   0xc   : > { %s1805_s17 = scalar_select %p309_p1, %s1676_s27, %s311_s15  }
   0xd   : > { %p1807_p5 = por %p322_p2, %p321_p0  ;;  %p1811_p6 = por %p328_p4, %p327_p3 }
   0xe   : > { %p1363_p7 = scmp.ge.s32.totalorder %s1680_s28, 1  ;;  %p389_p8 = scmp.lt.s32.totalorder %s1680_s28, 3 }
  0x10   : > { %p390_p9 = pnand %p1363_p7, %p389_p8 }
  0x11   : > { %p432_p10 = scmp.lt.s32.totalorder (!%p390_p9), %s1790_s29, 1  ;;  %s2056_s0 = sld [smem:[#allocation5_spill]] (!%p390_p9) }
  0x12   : > { %393 = sbr.rel (%p390_p9) target bundleno = 2196 (0x894), region = 72  ;;  %s2057_s1 = sld [smem:[#allocation6_spill]] (!%p390_p9) }
  0x13   : > { %s2058_s2 = sld [smem:[#allocation7_spill]] (!%p390_p9)  ;;  %s1684_s16 = smov (!%p390_p9), 96  }
  0x14   : > { %s1687_s22 = smov (!%p390_p9), 80   ;;  %s1688_s23 = smov (!%p390_p9), 112  }
  0x15   : > { %s1690_s30 = smov (!%p390_p9), 104   ;;  %s1691_s15 = smov (!%p390_p9), 64  }
  0x17   : > { %s433_s20 = scalar_select %p432_p10, %s1790_s29, 1  ;;  %vm440_vm0 = vcmask 261120   ;;  %v1584_v4 = vld [vmem:[%s2040_s3 + $0x8] sm:$0xff]   ;;  %v1682_v5 = vmov 0.0   ;;  %vm1683_vm1 = vmmov 0   ;;  %v1585_v6 = vld [vmem:[%s2040_s3] sm:$0xff]  }
  0x18   : > { %1437 = vmatprep.subr.bf16.mxu0 %v1682_v5  ;;  %1441 = vmatprep.mubr.msk.bf16.mxu0 %vm1683_vm1, %v1682_v5  ;;  %v1366_v17 = vld [vmem:[%s2057_s1] ss:$0 sm:$0xff]  ;;  %vm545_vm2 = vcmask 64512   ;;  %vm609_vm3 = vcmask 1043456   ;;  %vm997_vm4 = vcmask 130048   ;;  %vm999_vm5 = vcmask 195584  }
  0x19   : > { %s1365_s21 = sshll.u32 %s433_s20, 3  ;;  %1438 = vmatpush3.bf16.msra.mxu0 %v1584_v4  ;;  %1457 = vmatprep.subr.bf16.mxu1 %v1682_v5  ;;  %v1367_v19 = vld [vmem:[%s2058_s2] ss:$0 sm:$0xff]  ;;  %s1685_s20 = smov 120  }
  0x1a   : > { %s435_s24 = scalar_lea.vmem %s2056_s0, %s1365_s21  ;;  %1439 = vmatprep.subr.bf16.mxu0 %v1682_v5  ;;  %1459 = vmatprep.mubr.msk.bf16.mxu1 %vm1683_vm1, %v1682_v5  ;;  %v1368_v23 = vld [vmem:[%s2041_s4] ss:$0 sm:$0xff]  ;;  %s1686_s21 = smov 88  }
  0x1b   : > { %v1822_v0 = vld [vmem:[%s435_s24] sm:$0xff]  ;;  %s1689_s24 = smov 72  }
  0x1c   : > { %v441_v1 = vsel %vm440_vm0, %v1822_v0, 0.0  ;;  %v446_v2 = vmul.f32 %v1822_v0, %v1822_v0 }
  0x1d   : > { %442 = vadd.xlane.f32.xlu0 %v441_v1  ;;  %1440 = vmatpush3.bf16.msra.mxu0 %v1585_v6 }
  0x1e   : > { %v447_v3 = vsel %vm440_vm0, %v446_v2, 0.0  ;;  %1445 = vmatprep.subr.bf16.mxu0 %v1682_v5 }
  0x21   : > { %448 = vadd.xlane.f32.xlu0 %v447_v3 }
  0xa6   : > { %v443_v7 = vpop.xlane.xlu0 %442 }
  0xa7   : > { %v445_v8 = vmul.f32 0.03125, %v443_v7 }
  0xa9   : > { %v451_v10 = vmul.f32 %v445_v8, %v445_v8  ;;  %v454_v15 = vsub.f32 %v1822_v0, %v445_v8 }
  0xaa   : > { %v449_v9 = vpop.xlane.xlu0 %448 }
  0xab   : > { %v450_v11 = vmul.f32 0.03125, %v449_v9 }
  0xad   : > { %v452_v12 = vsub.f32 %v450_v11, %v451_v10 }
  0xaf   : > { %v453_v13 = vmax.f32 %v452_v12, 0.0 }
  0xb1   : > { %v455_v14 = vadd.f32 1e-05, %v453_v13 }
  0xb3   : > { %1598 = vrsqrt.f32 %v455_v14 }
  0xc0   : > { %v1599_v16 = vpop.eup %1598 }
  0xc1   : > { %v457_v18 = vmul.f32 %v1599_v16, %v454_v15 }
  0xc3   : > { %v464_v20 = vmul.f32 %v1366_v17, %v457_v18 }
  0xc5   : > { %v471_v21 = vadd.f32 %v1367_v19, %v464_v20 }
  0xc7   : > { %v472_v22 = vpack.c.bf16 %v471_v21, %v471_v21 }
  0xc9   : > { %1442 = vmatmul.mubr.msk.bf16.vlgmr.msra.gmra.mxu0 %vm440_vm0, %v472_v22 }
  0xca   : > { %1447 = vmatprep.mubr.msk.bf16.mxu0 %vm1683_vm1, %v1682_v5 }
 0x189   : > { %v533_v24 = vpop.f32.mrf.mxu0 }
 0x18a   : > { %v534_v25 = vadd.f32 %v1368_v23, %v533_v24 }
 0x18b   : > { %v1443_v26 = vpop.f32.mrf.mxu0 }
 0x18c   : > { %v539_v27 = vmul.f32 0.35355338, %v534_v25  ;;  %v1856_v28 = vpack.c.bf16 %v534_v25, %v534_v25 }
 0x18d   : > { %v536_v29 = vpop.f32.mrf.mxu0 }
 0x18e   : > { %v540_v30 = vpack.c.bf16 %v539_v27, %v539_v27  ;;  %543 = vrot.lane.b32.xlu1 %v1856_v28, %s1684_s16  ;;  %s1692_s16 = smov 56  }
 0x18f   : > { %v1444_v31 = vpop.f32.mrf.mxu0 }
 0x190   : > { %654 = vrot.lane.b32.xlu0 %v540_v30, %s1685_s20  ;;  %s1693_s20 = smov 48  }
 0x192   : > { %656 = vrot.lane.b32.xlu1 %v1856_v28, %s1686_s21  ;;  %s1694_s21 = smov 40  }
 0x196   : > { %766 = vrot.lane.b32.xlu1 %v1856_v28, %s1687_s22  ;;  %s1695_s22 = smov 8  }
 0x19a   : > { %764 = vrot.lane.b32.xlu1 %v540_v30, %s1688_s23 }
 0x19e   : > { %876 = vrot.lane.b32.xlu1 %v1856_v28, %s1689_s24 }
 0x1a2   : > { %874 = vrot.lane.b32.xlu1 %v540_v30, %s1690_s30  ;;  %s429_s30 = sand.u32 1, %s1672_s26  }
 0x200   : > { %v544_v32 = vpop.permute.xlu1 %543 }
 0x201   : > { %v550_v33 = vsel %vm545_vm2, %v544_v32, 0 }
 0x202   : > { %1446 = vmatpush3.bf16.xpose.msra.mxu0 %v550_v33  ;;  %v655_v37 = vpop.permute.xlu0 %654 }
 0x203   : > { %1451 = vmatprep.subr.bf16.mxu0 %v1682_v5 }
 0x204   : > { %v657_v34 = vpop.permute.xlu1 %656 }
 0x205   : > { %v662_v35 = vsel %vm545_vm2, %v657_v34, 0 }
 0x206   : > { %1458 = vmatpush3.bf16.xpose.msra.mxu1 %v662_v35 }
 0x207   : > { %1469 = vmatprep.subr.bf16.mxu1 %v1682_v5 }
 0x208   : > { %v767_v36 = vpop.permute.xlu1 %766 }
 0x209   : > { %1448 = vmatmul.mubr.msk.bf16.vlgmr.msra.gmra.mxu0 %vm545_vm2, %v540_v30  ;;  %v772_v39 = vsel %vm545_vm2, %v767_v36, 0 }
 0x20a   : > { %1453 = vmatprep.mubr.msk.bf16.mxu0 %vm1683_vm1, %v1682_v5 }
 0x20c   : > { %v765_v38 = vpop.permute.xlu1 %764 }
 0x20d   : > { %1460 = vmatmul.mubr.msk.bf16.vlgmr.msra.gmra.mxu1 %vm545_vm2, %v655_v37 }
 0x20e   : > { %1470 = vmatpush3.bf16.xpose.msra.mxu1 %v772_v39  ;;  %1471 = vmatprep.mubr.msk.bf16.mxu1 %vm1683_vm1, %v1682_v5 }
 0x20f   : > { %1481 = vmatprep.subr.bf16.mxu1 %v1682_v5 }
 0x210   : > { %v877_v40 = vpop.permute.xlu1 %876 }
 0x211   : > { %v882_v41 = vsel %vm545_vm2, %v877_v40, 0 }
 0x214   : > { %v875_v42 = vpop.permute.xlu1 %874 }
 0x215   : > { %1472 = vmatmul.mubr.msk.bf16.vlgmr.msra.gmra.mxu1 %vm545_vm2, %v765_v38 }
 0x216   : > { %1482 = vmatpush3.bf16.xpose.msra.mxu1 %v882_v41  ;;  %1483 = vmatprep.mubr.msk.bf16.mxu1 %vm1683_vm1, %v1682_v5 }
 0x217   : > { %1493 = vmatprep.subr.bf16.mxu1 %v1682_v5 }
 0x21d   : > { %1484 = vmatmul.mubr.msk.bf16.vlgmr.msra.gmra.mxu1 %vm545_vm2, %v875_v42 }
 0x21e   : > { %1497 = vmatprep.mubr.msk.bf16.mxu1 %vm1683_vm1, %v1682_v5 }
 0x2c9   : > { %v586_v43 = vpop.f32.mrf.mxu0 }
 0x2ca   : > { %v592_v44 = vsel %vm545_vm2, %v586_v43, -inf }
 0x2cb   : > { %593 = vmax.xlane.f32.xlu1 %v592_v44  ;;  %v1449_v45 = vpop.f32.mrf.mxu0 }
 0x2cd   : > { %v589_v46 = vpop.f32.mrf.mxu0  ;;  %v698_v47 = vpop.f32.mrf.mxu1 }
 0x2ce   : > { %v704_v48 = vsel %vm545_vm2, %v698_v47, -inf }
 0x2cf   : > { %705 = vmax.xlane.f32.xlu0 %v704_v48  ;;  %v1450_v49 = vpop.f32.mrf.mxu0  ;;  %v1461_v50 = vpop.f32.mrf.mxu1 }
 0x2d1   : > { %v701_v51 = vpop.f32.mrf.mxu1 }
 0x2d3   : > { %v1462_v52 = vpop.f32.mrf.mxu1 }
 0x2d5   : > { %v808_v53 = vpop.f32.mrf.mxu1 }
 0x2d6   : > { %v814_v54 = vsel %vm545_vm2, %v808_v53, -inf }
 0x2d7   : > { %v1473_v55 = vpop.f32.mrf.mxu1  ;;  %815 = vmax.xlane.f32.xlu1 %v814_v54  ;;  %v1587_v54 = vld [vmem:[%s2042_s5] sm:$0xff]  }
 0x2d9   : > { %v811_v56 = vpop.f32.mrf.mxu1 }
 0x2db   : > { %v1474_v57 = vpop.f32.mrf.mxu1 }
 0x2dd   : > { %v918_v58 = vpop.f32.mrf.mxu1 }
 0x2de   : > { %v924_v59 = vsel %vm545_vm2, %v918_v58, -inf }
 0x2df   : > { %925 = vmax.xlane.f32.xlu0 %v924_v59  ;;  %v1485_v60 = vpop.f32.mrf.mxu1 }
 0x2e1   : > { %v921_v61 = vpop.f32.mrf.mxu1 }
 0x2e3   : > { %v1486_v62 = vpop.f32.mrf.mxu1 }
 0x354   : > { %v594_v63 = vpop.xlane.xlu1 %593 }
 0x355   : > { %v595_v1 = vsub.f32 %v586_v43, %v594_v63 }
 0x357   : > { %v596_v2 = vmul.f32 1.442695, %v595_v1 }
 0x358   : > { %v706_v3 = vpop.xlane.xlu0 %705 }
 0x359   : > { %1600 = vpow2.f32 %v596_v2  ;;  %v707_v4 = vsub.f32 %v698_v47, %v706_v3 }
 0x35b   : > { %v708_v6 = vmul.f32 1.442695, %v707_v4 }
 0x35d   : > { %1602 = vpow2.f32 %v708_v6 }
 0x360   : > { %v816_v16 = vpop.xlane.xlu1 %815 }
 0x361   : > { %v817_v17 = vsub.f32 %v808_v53, %v816_v16  ;;  %v1586_v53 = vld [vmem:[%s2042_s5 + $0x8] sm:$0xff]  }
 0x362   : > { %1494 = vmatpush3.bf16.msra.mxu1 %v1586_v53 }
 0x363   : > { %v818_v18 = vmul.f32 1.442695, %v817_v17  ;;  %1495 = vmatprep.subr.bf16.mxu1 %v1682_v5 }
 0x366   : > { %v1601_v7 = vpop.eup %1600  ;;  %1496 = vmatpush3.bf16.msra.mxu1 %v1587_v54  ;;  %v1390_v54 = vld [vmem:[%s2049_s12] ss:$0 sm:$0xff] }
 0x367   : > { %v598_v8 = vsel %vm545_vm2, %v1601_v7, 0.0  ;;  %1509 = vmatprep.subr.bf16.mxu1 %v1682_v5 }
 0x368   : > { %v926_v9 = vpop.xlane.xlu0 %925  ;;  %599 = vadd.xlane.f32.xlu1 %v598_v8  ;;  %v1380_v8 = vld [vmem:[%s2043_s6] ss:$0 sm:$0xff] }
 0x369   : > { %v927_v10 = vsub.f32 %v918_v58, %v926_v9 }
 0x36a   : > { %v1603_v11 = vpop.eup %1602 }
 0x36b   : > { %v928_v12 = vmul.f32 1.442695, %v927_v10  ;;  %v710_v13 = vsel %vm545_vm2, %v1603_v11, 0.0 }
 0x36c   : > { %711 = vadd.xlane.f32.xlu0 %v710_v13 }
 0x36d   : > { %1604 = vpow2.f32 %v928_v12 }
 0x36e   : > { %1606 = vpow2.f32 %v818_v18  ;;  %v1588_v18 = vld [vmem:[%s2046_s9 + $0x8] sm:$0xff]  }
 0x379   : > { %604 = vrot.lane.b32.xlu1 %v1856_v28, %s1691_s15  ;;  %s1364_s15 = sshll.u32 %s429_s30, 3 }
 0x37a   : > { %v1605_v14 = vpop.eup %1604 }
 0x37b   : > { %v930_v15 = vsel %vm545_vm2, %v1605_v14, 0.0  ;;  %v1607_v19 = vpop.eup %1606 }
 0x37c   : > { %931 = vadd.xlane.f32.xlu0 %v930_v15  ;;  %v820_v20 = vsel %vm545_vm2, %v1607_v19, 0.0 }
 0x392   : > { %716 = vrot.lane.b32.xlu0 %v1856_v28, %s1692_s16  ;;  %s1696_s16 = smov 16  }
 0x39d   : > { %821 = vadd.xlane.f32.xlu1 %v820_v20  ;;  %v1591_v20 = vld [vmem:[%s2048_s11 + $0x30] sm:$0xff]  }
 0x3ae   : > { %826 = vrot.lane.b32.xlu1 %v1856_v28, %s1693_s20  ;;  %s1697_s20 = smov 24  }
 0x3b2   : > { %936 = vrot.lane.b32.xlu1 %v1856_v28, %s1694_s21  ;;  %s1400_s21 = sshll.u32 %s1790_s29, 7  ;;  %s1288_s29 = scalar_lea.sflag [#allocation3], %s429_s30 }
 0x3b3   : > { %s1995_s1 = scalar_lea.hbm %s2050_s13, %s1400_s21 }
 0x3f1   : > { %v600_v21 = vpop.xlane.xlu1 %599 }
 0x3f2   : > { %1608 = vrcp.f32 %v600_v21 }
 0x3f5   : > { %v712_v22 = vpop.xlane.xlu0 %711  ;;  %v605_v23 = vpop.permute.xlu1 %604 }
 0x3f6   : > { %v611_v24 = vsel %vm609_vm3, %v605_v23, 0  ;;  %1610 = vrcp.f32 %v712_v22 }
 0x3f7   : > { %1452 = vmatpush3.bf16.msra.mxu0 %v611_v24 }
 0x3f8   : > { %1463 = vmatprep.subr.bf16.mxu0 %v1682_v5 }
 0x3ff   : > { %v1609_v25 = vpop.eup %1608 }
 0x400   : > { %v602_v26 = vmul.f32 %v1609_v25, %v1601_v7 }
 0x402   : > { %v603_v27 = vpack.c.bf16 %v602_v26, %v602_v26 }
 0x403   : > { %v1611_v29 = vpop.eup %1610 }
 0x404   : > { %1454 = vmatmul.mubr.msk.bf16.vlgmr.msra.gmra.mxu0 %vm545_vm2, %v603_v27  ;;  %v714_v28 = vmul.f32 %v1611_v29, %v1603_v11 }
 0x405   : > { %v932_v30 = vpop.xlane.xlu0 %931  ;;  %1465 = vmatprep.mubr.msk.bf16.mxu0 %vm1683_vm1, %v1682_v5 }
 0x406   : > { %v715_v33 = vpack.c.bf16 %v714_v28, %v714_v28 }
 0x409   : > { %v717_v31 = vpop.permute.xlu0 %716 }
 0x40a   : > { %v722_v32 = vsel %vm609_vm3, %v717_v31, 0  ;;  %v1384_v31 = vld [vmem:[%s2044_s7] ss:$0 sm:$0xff] }
 0x40b   : > { %1464 = vmatpush3.bf16.msra.mxu0 %v722_v32 }
 0x40c   : > { %1475 = vmatprep.subr.bf16.mxu0 %v1682_v5 }
 0x40e   : > { %1466 = vmatmul.mubr.msk.bf16.vlgmr.msra.gmra.mxu0 %vm545_vm2, %v715_v33  ;;  %v1385_v33 = vld [vmem:[%s2045_s8] ss:$0 sm:$0xff] }
 0x40f   : > { %1477 = vmatprep.mubr.msk.bf16.mxu0 %vm1683_vm1, %v1682_v5 }
 0x426   : > { %v822_v34 = vpop.xlane.xlu1 %821 }
 0x427   : > { %1612 = vrcp.f32 %v822_v34 }
 0x428   : > { %1614 = vrcp.f32 %v932_v30 }
 0x42a   : > { %v827_v35 = vpop.permute.xlu1 %826 }
 0x42b   : > { %v832_v36 = vsel %vm609_vm3, %v827_v35, 0 }
 0x42c   : > { %1476 = vmatpush3.bf16.msra.mxu0 %v832_v36 }
 0x42d   : > { %1487 = vmatprep.subr.bf16.mxu0 %v1682_v5 }
 0x42e   : > { %v937_v39 = vpop.permute.xlu1 %936 }
 0x42f   : > { %v942_v42 = vsel %vm609_vm3, %v937_v39, 0  ;;  %v1594_v39 = vld [vmem:[%s2048_s11 + $0x18] sm:$0xff]  }
 0x434   : > { %v1613_v37 = vpop.eup %1612 }
 0x435   : > { %v824_v38 = vmul.f32 %v1613_v37, %v1607_v19  ;;  %v1615_v41 = vpop.eup %1614  ;;  %v1590_v19 = vld [vmem:[%s2048_s11 + $0x38] sm:$0xff]   ;;  %v1592_v37 = vld [vmem:[%s2048_s11 + $0x28] sm:$0xff]  }
 0x436   : > { %v934_v43 = vmul.f32 %v1615_v41, %v1605_v14  ;;  %v1596_v41 = vld [vmem:[%s2048_s11 + $0x8] sm:$0xff]  }
 0x437   : > { %v825_v40 = vpack.c.bf16 %v824_v38, %v824_v38  ;;  %v1593_v38 = vld [vmem:[%s2048_s11 + $0x20] sm:$0xff]  }
 0x438   : > { %v935_v44 = vpack.c.bf16 %v934_v43, %v934_v43  ;;  %v1386_v43 = vld [vmem:[%s2047_s10] ss:$0 sm:$0xff] }
 0x439   : > { %1478 = vmatmul.mubr.msk.bf16.vlgmr.msra.gmra.mxu0 %vm545_vm2, %v825_v40  ;;  %v1595_v40 = vld [vmem:[%s2048_s11 + $0x10] sm:$0xff]  }
 0x43a   : > { %1488 = vmatpush3.bf16.msra.mxu0 %v942_v42  ;;  %1489 = vmatprep.mubr.msk.bf16.mxu0 %vm1683_vm1, %v1682_v5  ;;  %v1597_v42 = vld [vmem:[%s2048_s11] sm:$0xff]  }
 0x43b   : > { %1501 = vmatprep.subr.bf16.mxu0 %v1682_v5 }
 0x441   : > { %1490 = vmatmul.mubr.msk.bf16.vlgmr.msra.gmra.mxu0 %vm545_vm2, %v935_v44 }
 0x442   : > { %1505 = vmatprep.mubr.msk.bf16.mxu0 %vm1683_vm1, %v1682_v5  ;;  %1502 = vmatpush3.bf16.msra.mxu0 %v1588_v18 }
 0x443   : > { %1503 = vmatprep.subr.bf16.mxu0 %v1682_v5 }
 0x4c4   : > { %v647_v45 = vpop.f32.mrf.mxu0 }
 0x4c6   : > { %v1455_v46 = vpop.f32.mrf.mxu0 }
 0x4c8   : > { %v650_v47 = vpop.f32.mrf.mxu0 }
 0x4ca   : > { %v1456_v48 = vpop.f32.mrf.mxu0 }
 0x4ce   : > { %v758_v49 = vpop.f32.mrf.mxu0 }
 0x4cf   : > { %985 = vrot.lane.b32.xlu0 %v758_v49, %s1695_s22  ;;  %s431_s22 = scalar_lea.vmem [#allocation2], %s1364_s15 }
 0x4d0   : > { %v1467_v50 = vpop.f32.mrf.mxu0  ;;  %s1301_s23 = sshll.u32 %s431_s22, 4  ;;  %s1997_s23 = int_to_ptr.vmem [resolvable:$true] %s1301_s23 }
 0x4d1   : > { %s1620_s15 = scalar_lea.vmem %s1997_s23, 128 }
 0x4d2   : > { %v761_v51 = vpop.f32.mrf.mxu0  ;;  %p1621_p11 = scmp.ne.s32.totalorder %s1997_s23, %s1620_s15 }
 0x4d4   : > { %v1468_v52 = vpop.f32.mrf.mxu0  ;;  %p1622_p12 = pnand %p1621_p11, %p1807_p5 }
 0x4d6   : > { %p1623_p13 = pneg %p1622_p12 }
 0x4f9   : > { %v868_v55 = vpop.f32.mrf.mxu0 }
 0x4fa   : > { %989 = vrot.lane.b32.xlu1 %v868_v55, %s1696_s16  ;;  %s1698_s16 = smov [#allocation2]  }
 0x4fb   : > { %v1479_v56 = vpop.f32.mrf.mxu0 }
 0x4fd   : > { %v871_v57 = vpop.f32.mrf.mxu0 }
 0x4ff   : > { %v1480_v58 = vpop.f32.mrf.mxu0 }
 0x501   : > { %v978_v59 = vpop.f32.mrf.mxu0 }
 0x502   : > { %993 = vrot.lane.b32.xlu0 %v978_v59, %s1697_s20  ;;  %s1624_s20 = sshll.u32 %s1698_s16, 4  ;;  %s1625_s20 = int_to_ptr.vmem [resolvable:$false] %s1624_s20 }
 0x503   : > { %v1491_v60 = vpop.f32.mrf.mxu0  ;;  %s1626_s0 = scalar_lea.vmem %s1625_s20, 256  ;;  %p1627_p0 = scmp.lt.s32.totalorder %s1997_s23, %s1625_s20 }
 0x504   : > { %p1628_p1 = scmp.lt.s32.totalorder %s1626_s0, %s1620_s15 }
 0x505   : > { %v981_v61 = vpop.f32.mrf.mxu0 }
 0x506   : > { %p1629_p2 = por %p1628_p1, %p1627_p0 }
 0x507   : > { %v1492_v62 = vpop.f32.mrf.mxu0 }
 0x508   : > { %p1630_p3 = pnand %p1629_p2, %p1623_p13 }
 0x541   : > { %v986_v63 = vpop.permute.xlu0 %985 }
 0x542   : > { %v996_v2 = vsel %vm545_vm2, %v647_v45, %v986_v63 }
 0x56c   : > { %v990_v1 = vpop.permute.xlu1 %989 }
 0x56d   : > { %v998_v3 = vsel %vm997_vm4, %v996_v2, %v990_v1 }
 0x574   : > { %v994_v4 = vpop.permute.xlu0 %993 }
 0x575   : > { %v1000_v6 = vsel %vm999_vm5, %v998_v3, %v994_v4 }
 0x576   : > { %v1001_v7 = vpack.c.bf16 %v1000_v6, %v1000_v6 }
 0x578   : > { %1498 = vmatmul.mubr.msk.bf16.vlgmr.msra.gmra.mxu1 %vm440_vm0, %v1001_v7 }
 0x579   : > { %1525 = vmatprep.mubr.msk.bf16.mxu1 %vm1683_vm1, %v1682_v5  ;;  %1510 = vmatpush3.bf16.msra.mxu1 %v1590_v19 }
 0x57a   : > { %1511 = vmatprep.subr.bf16.mxu1 %v1682_v5 }
 0x57d   : > { %1512 = vmatpush3.bf16.msra.mxu1 %v1591_v20 }
 0x57e   : > { %1513 = vmatprep.subr.bf16.mxu1 %v1682_v5 }
 0x581   : > { %1514 = vmatpush3.bf16.msra.mxu1 %v1592_v37 }
 0x582   : > { %1515 = vmatprep.subr.bf16.mxu1 %v1682_v5 }
 0x585   : > { %1516 = vmatpush3.bf16.msra.mxu1 %v1593_v38 }
 0x586   : > { %1517 = vmatprep.subr.bf16.mxu1 %v1682_v5 }
 0x589   : > { %1518 = vmatpush3.bf16.msra.mxu1 %v1594_v39 }
 0x58a   : > { %1519 = vmatprep.subr.bf16.mxu1 %v1682_v5 }
 0x58d   : > { %1520 = vmatpush3.bf16.msra.mxu1 %v1595_v40 }
 0x58e   : > { %1521 = vmatprep.subr.bf16.mxu1 %v1682_v5 }
 0x591   : > { %1522 = vmatpush3.bf16.msra.mxu1 %v1596_v41 }
 0x592   : > { %1523 = vmatprep.subr.bf16.mxu1 %v1682_v5 }
 0x595   : > { %1524 = vmatpush3.bf16.msra.mxu1 %v1597_v42 }
 0x638   : > { %v1062_v9 = vpop.f32.mrf.mxu1 }
 0x639   : > { %v1063_v10 = vadd.f32 %v1380_v8, %v1062_v9 }
 0x63a   : > { %v1499_v11 = vpop.f32.mrf.mxu1 }
 0x63b   : > { %v1930_v12 = vadd.f32 %v1063_v10, %v1822_v0  ;;  %v1589_v0 = vld [vmem:[%s2046_s9] sm:$0xff]  }
 0x63c   : > { %v1065_v13 = vpop.f32.mrf.mxu1  ;;  %1504 = vmatpush3.bf16.msra.mxu0 %v1589_v0 }
 0x63d   : > { %v1071_v14 = vsel %vm440_vm0, %v1930_v12, 0.0  ;;  %v1075_v15 = vmul.f32 %v1930_v12, %v1930_v12 }
 0x63e   : > { %1072 = vadd.xlane.f32.xlu1 %v1071_v14  ;;  %v1500_v16 = vpop.f32.mrf.mxu1 }
 0x63f   : > { %v1076_v17 = vsel %vm440_vm0, %v1075_v15, 0.0 }
 0x640   : > { %1077 = vadd.xlane.f32.xlu0 %v1076_v17 }
 0x6c7   : > { %v1073_v21 = vpop.xlane.xlu1 %1072 }
 0x6c8   : > { %v1074_v22 = vmul.f32 0.03125, %v1073_v21 }
 0x6c9   : > { %v1078_v23 = vpop.xlane.xlu0 %1077 }
 0x6ca   : > { %v1080_v24 = vmul.f32 %v1074_v22, %v1074_v22  ;;  %v1079_v25 = vmul.f32 0.03125, %v1078_v23  ;;  %v1083_v30 = vsub.f32 %v1930_v12, %v1074_v22 }
 0x6cc   : > { %v1081_v26 = vsub.f32 %v1079_v25, %v1080_v24 }
 0x6ce   : > { %v1082_v27 = vmax.f32 %v1081_v26, 0.0 }
 0x6d0   : > { %v1084_v29 = vadd.f32 1e-05, %v1082_v27 }
 0x6d2   : > { %1616 = vrsqrt.f32 %v1084_v29 }
 0x6df   : > { %v1617_v28 = vpop.eup %1616 }
 0x6e0   : > { %v1086_v32 = vmul.f32 %v1617_v28, %v1083_v30 }
 0x6e2   : > { %v1093_v34 = vmul.f32 %v1384_v31, %v1086_v32 }
 0x6e4   : > { %v1100_v35 = vadd.f32 %v1385_v33, %v1093_v34 }
 0x6e6   : > { %v1101_v36 = vpack.c.bf16 %v1100_v35, %v1100_v35 }
 0x6e8   : > { %1506 = vmatmul.mubr.msk.bf16.vlgmr.msra.gmra.mxu0 %vm440_vm0, %v1101_v36 }
 0x7a8   : > { %v1162_v44 = vpop.f32.mrf.mxu0 }
 0x7a9   : > { %v1163_v45 = vadd.f32 %v1386_v43, %v1162_v44 }
 0x7aa   : > { %v1507_v46 = vpop.f32.mrf.mxu0 }
 0x7ab   : > { %v1169_v47 = vmul.f32 0.70710677, %v1163_v45  ;;  %v1168_v5 = vmul.f32 0.5, %v1163_v45 }
 0x7ac   : > { %v1165_v48 = vpop.f32.mrf.mxu0 }
 0x7ad   : > { %1618 = verf.f32 %v1169_v47 }
 0x7ae   : > { %v1508_v49 = vpop.f32.mrf.mxu0 }
 0x7ba   : > { %v1619_v50 = vpop.eup %1618 }
 0x7bb   : > { %v1171_v51 = vadd.f32 1.0, %v1619_v50 }
 0x7bd   : > { %v1172_v52 = vmul.f32 %v1171_v51, %v1168_v5 }
 0x7bf   : > { %v1173_v53 = vpack.c.bf16 %v1172_v52, %v1172_v52 }
 0x7c1   : > { %1526 = vmatmul.mubr.bf16.vlgmr.msra.gmra.mxu1 %v1173_v53 }
 0x881   : > { %v1279_v55 = vpop.f32.mrf.mxu1 }
 0x882   : > { %v1280_v56 = vadd.f32 %v1390_v54, %v1279_v55 }
 0x883   : > { %v1527_v57 = vpop.f32.mrf.mxu1 }
 0x884   : > { %v1285_v58 = vadd.f32 %v1280_v56, %v1930_v12 }
 0x885   : > { %v1282_v59 = vpop.f32.mrf.mxu1 }
 0x886   : > { %1286 = vst.msk [vmem:[%s431_s22] sm:$0xff] %vm440_vm0, %v1285_v58 }
 0x887   : > { %v1528_v60 = vpop.f32.mrf.mxu1 }
 0x888   : > { %1633 = shalt.err (!%p1630_p3)
}
 0x889   : > { %s1634_s21 = scalar_lea.hbm %s1995_s1, 128  ;;  %s1638_s24 = scalar_lea.hbm %s2050_s13, 256 }
 0x88a   : > { %p1635_p4 = scmp.ne.s32.totalorder %s1995_s1, %s1634_s21  ;;  %p1639_p9 = scmp.lt.s32.totalorder %s1995_s1, %s2050_s13 }
 0x88b   : > { %p1640_p10 = scmp.lt.s32.totalorder %s1638_s24, %s1634_s21 }
 0x88c   : > { %p1636_p7 = pnand %p1635_p4, %p1807_p5 }
 0x88d   : > { %p1641_p11 = por %p1640_p10, %p1639_p9 }
 0x88e   : > { %p1637_p8 = pneg %p1636_p7 }
 0x890   : > { %p1642_p12 = pnand %p1641_p11, %p1637_p8 }
 0x892   : > { %1645 = shalt.err (!%p1642_p12)
}
 0x893   : > { %1529 = dma.vmem_to_hbm [thread:$0]  (%p1807_p5), %s1997_s23, 128, %s1995_s1, %s1288_s29  }
 0x894 PF: > { %p1535_p13 = scmp.ge.s32.totalorder %s1680_s28, 2  ;;  %s1313_s15 = sand.u32 1, %s1668_s25  }
 0x895   : > { %s1314_s2 = scalar_lea.sflag [#allocation3], %s1313_s15 }
 0x896   : > { %p1532_p0 = pnand %p1535_p13, %p1811_p6 }
 0x898   : > { %p1533_p1 = pneg %p1532_p0 }
 0x89a   : > { %1663 = dma.done.wait (%p1533_p1), %s1314_s2, 128  }
 0x89b   : > { %1665 = vsyncadd (%p1533_p1), %s1314_s2, 4294967168  ;;  %p23_p2 = scmp.ge.s32.totalorder %s1794_s14, 4   ;;  %s2059_s25 = smov %s1672_s26 }
 0x89c   : > { %s2060_s26 = smov %s1676_s27  ;;  %s2061_s27 = smov %s1805_s17 }
 0x89d   : > { %s2062_s28 = smov %s1794_s14  ;;  %25 = sbr.rel (!%p23_p2) target bundleno = 7 (0x7), region = 107 }
 0x8a2   :  { %1319 = vsyncpa [#allocation3], 1 }
 0x8a3   :  { %1321 = vsyncpa [#allocation3 + $0x1], 1 }

</bundles_post_ra>
